<compile_context>
chip_gen: v7x
topology: tpu7x:2x2x1
jax: 0.10.0
libtpu: 0.0.40
codegen_flags: <defaults>
</compile_context>

<pallas_src>
import functools

import jax
import jax.numpy as jnp
from jax.experimental import pallas as pl
from jax.experimental.pallas import tpu as pltpu

LATENT_DIM = 1280
LANE = 128


def _round_up(x, m):
    return ((x + m - 1) // m) * m


def _hardswish(x):
    # f32 VPU math (v5e has no bf16 VPU path).
    return x * jnp.clip(x + 3.0, 0.0, 6.0) * (1.0 / 6.0)


# ----------------------------------------------------------------------------
# Single fused kernel: stem conv (im2col matmul, all models dense in N) +
# hardswish + pool-as-matmul accumulation; at the last row tile: conv_head
# (block-diagonal) + hardswish + per-target heads + ensemble means.
# ----------------------------------------------------------------------------
def _fused_kernel(patches_ref, wstem_ref, whead_ref, bhead_ref,
                  wheads_ref, bheads_ref, out_ref, mlat_ref, pooled_acc,
                  *, num_models, batch, spatial, is_cls):
    r = pl.program_id(0)
    tile_rows = patches_ref.shape[0]

    @pl.when(r == 0)
    def _():
        pooled_acc[...] = jnp.zeros_like(pooled_acc)

    # Stem conv for ALL models: (TR, 32) bf16 @ (32, 128) bf16 -> f32.
    feat = jnp.dot(patches_ref[...], wstem_ref[...],
                   preferred_element_type=jnp.float32)        # (TR, 128)
    feat = _hardswish(feat)

    # Global average pool as a matmul with an in-kernel selector (entries 1.0;
    # 1/S applied once in f32 at finalize).
    ids = (jax.lax.broadcasted_iota(jnp.int32, (batch, tile_rows), 1)
           + r * tile_rows)
    lo = jax.lax.broadcasted_iota(jnp.int32, (batch, tile_rows), 0) * spatial
    mask = jnp.logical_and(ids >= lo, ids < lo + spatial)
    sel = jnp.where(mask, 1.0, 0.0).astype(jnp.bfloat16)      # (B, TR)

    pooled_acc[...] += jnp.dot(sel, feat.astype(jnp.bfloat16),
                               preferred_element_type=jnp.float32)  # (B, 128)

    @pl.when(r == pl.num_programs(0) - 1)
    def _():
        inv_s = 1.0 / float(spatial)
        inv_m = 1.0 / float(num_models)

        # conv_head for ALL models as one block-diagonal lane-dense matmul.
        pooled = (pooled_acc[...] * inv_s).astype(jnp.bfloat16)   # (B, 128)
        lat = jnp.dot(pooled, whead_ref[...],
                      preferred_element_type=jnp.float32) + bhead_ref[...]
        lat = _hardswish(lat)                                     # (B, M*1280)

        # Latent mean over models (128-lane-aligned slices, static loop).
        mlat = lat[:, 0:LATENT_DIM]
        for m in range(1, num_models):
            mlat = mlat + lat[:, m * LATENT_DIM:(m + 1) * LATENT_DIM]
        mlat_ref[...] = mlat * inv_m

        lat_b = lat.astype(jnp.bfloat16)
        for t, cls in enumerate(is_cls):                          # static, small
            if cls:
                # Softmax must precede the mean: per-model matmuls.
                acc = None
                for m in range(num_models):
                    logits = jnp.dot(
                        lat_b[:, m * LATENT_DIM:(m + 1) * LATENT_DIM],
                        wheads_ref[t, m * LATENT_DIM:(m + 1) * LATENT_DIM, :],
                        preferred_element_type=jnp.float32) + bheads_ref[t, m]
                    z = logits - jnp.max(logits, axis=-1, keepdims=True)
                    e = jnp.exp(z)
                    probs = e / jnp.sum(e, axis=-1, keepdims=True)
                    acc = probs if acc is None else acc + probs
                out_ref[t] = acc * inv_m
            else:
                # Fold the model mean into one stacked-K matmul.
                bias_sum = jnp.sum(bheads_ref[t], axis=0)         # (1, d_pad)
                out = jnp.dot(lat_b, wheads_ref[t],
                              preferred_element_type=jnp.float32) + bias_sum
                out_ref[t] = out * inv_m


def backbone_heads_forward(patches, packed, *, batch, spatial, tile_rows):
    num_models = packed["num_models"]
    kp = patches.shape[1]
    num_row_tiles = patches.shape[0] // tile_rows
    cs_total_pad = packed["w_stem_all"].shape[1]          # 128
    n_head = packed["w_head_blkdiag"].shape[1]            # M*1280
    num_targets, _, d_pad = packed["w_heads"].shape

    kernel = functools.partial(
        _fused_kernel, num_models=num_models, batch=batch,
        spatial=spatial, is_cls=packed["is_cls"])

    return pl.pallas_call(
        kernel,
        out_shape=(
            jax.ShapeDtypeStruct((num_targets, batch, d_pad), jnp.float32),
            jax.ShapeDtypeStruct((batch, LATENT_DIM), jnp.float32),
        ),
        grid_spec=pltpu.PrefetchScalarGridSpec(
            num_scalar_prefetch=0,
            grid=(num_row_tiles,),
            in_specs=[
                # patch tile: last dim = full array dim (32), lane-pad free
                pl.BlockSpec((tile_rows, kp), lambda r: (r, 0)),
                pl.BlockSpec((kp, cs_total_pad), lambda r: (0, 0)),
                pl.BlockSpec((cs_total_pad, n_head), lambda r: (0, 0)),
                pl.BlockSpec((1, n_head), lambda r: (0, 0)),
                pl.BlockSpec((num_targets, num_models * LATENT_DIM, d_pad),
                             lambda r: (0, 0, 0)),
                pl.BlockSpec((num_targets, num_models, 1, d_pad),
                             lambda r: (0, 0, 0, 0)),
            ],
            out_specs=(
                pl.BlockSpec((num_targets, batch, d_pad), lambda r: (0, 0, 0)),
                pl.BlockSpec((batch, LATENT_DIM), lambda r: (0, 0)),
            ),
            scratch_shapes=[pltpu.VMEM((batch, cs_total_pad), jnp.float32)],
        ),
        compiler_params=pltpu.CompilerParams(
            dimension_semantics=("arbitrary",)),          # row axis is a reduction
    )(patches, packed["w_stem_all"], packed["w_head_blkdiag"],
      packed["b_head_all"], packed["w_heads"], packed["b_heads"])


# ----------------------------------------------------------------------------
# Glue: im2col for the 3x3 / stride-2 / pad-1 stem conv (plain JAX reshapes)
# ----------------------------------------------------------------------------
def im2col_3x3_s2(x_nhwc):
    b, h, w, c = x_nhwc.shape
    ho, wo = h // 2, w // 2
    xp = jnp.pad(x_nhwc, ((0, 0), (1, 1), (1, 1), (0, 0)))
    cols = []
    for kh in range(3):
        for kw in range(3):
            cols.append(xp[:, kh:kh + 2 * ho:2, kw:kw + 2 * wo:2, :])
    patches = jnp.concatenate(cols, axis=-1)          # (B, Ho, Wo, 9*C)
    return patches.reshape(b * ho * wo, 9 * c), ho * wo


# ----------------------------------------------------------------------------
# Full ensemble forward (mirrors EnsembleInferenceModel.forward)
# ----------------------------------------------------------------------------
def ensemble_forward(img_nchw, packed, targets):
    x = jnp.transpose(img_nchw, (0, 2, 3, 1)).astype(jnp.float32)  # NCHW->NHWC
    batch = x.shape[0]
    patches, spatial = im2col_3x3_s2(x)               # (B*S, 9*Cin) f32
    rows = patches.shape[0]
    kp = packed["kp"]                                  # small (e.g. 32), not 128

    tile_rows = 2048
    if rows <= tile_rows:
        tile_rows = max(8, _round_up(rows, 8))
    rows_padded = _round_up(rows, tile_rows)

    patches_p = jnp.pad(
        patches,
        ((0, rows_padded - rows), (0, kp - patches.shape[1]))
    ).astype(jnp.bfloat16)

    out_all, mean_lat = backbone_heads_forward(
        patches_p, packed, batch=batch, spatial=spatial, tile_rows=tile_rows)

    final = {}
    for t, key in enumerate(targets.keys()):
        final[key] = out_all[t, :, :targets[key]["out_dim"]]
    return final, mean_lat


# ----------------------------------------------------------------------------
# Deterministic synthetic parameter construction + packing (pad / stack / cast)
# ----------------------------------------------------------------------------
def make_params(key, num_models, in_chans, stem_ch, targets):
    params = {"models": [], "heads": {}}
    keys = jax.random.split(key, num_models * 3 + len(targets) * 2)
    ki = 0
    for _ in range(num_models):
        w_stem = jax.random.normal(keys[ki], (9 * in_chans, stem_ch),
                                   jnp.float32) * 0.1
        w_head = jax.random.normal(keys[ki + 1], (stem_ch, LATENT_DIM),
                                   jnp.float32) * 0.1
        b_head = jax.random.normal(keys[ki + 2], (1, LATENT_DIM),
                                   jnp.float32) * 0.01
        ki += 3
        params["models"].append(
            {"w_stem": w_stem, "w_head": w_head, "b_head": b_head})
    for key_name, cfg in targets.items():
        d = cfg["out_dim"]
        w = jax.random.normal(keys[ki], (num_models, LATENT_DIM, d),
                              jnp.float32) * 0.05
        b = jax.random.normal(keys[ki + 1], (num_models, 1, d),
                              jnp.float32) * 0.01
        ki += 2
        params["heads"][key_name] = {"w": w, "b": b}
    return params


def pack_params(params, targets):
    num_models = len(params["models"])
    k_raw, stem_ch = params["models"][0]["w_stem"].shape
    kp = _round_up(k_raw, 8)                        # pad K only to 8 (e.g. 27->32)
    cs_total = num_models * stem_ch
    cs_total_pad = _round_up(cs_total, LANE)        # dense channel packing -> 128

    # Stem: concat model channels densely, pad once.
    ws = [jnp.pad(p["w_stem"], ((0, kp - k_raw), (0, 0)))
          for p in params["models"]]
    w_stem_all = jnp.concatenate(ws, axis=1)                          # (kp, M*32)
    w_stem_all = jnp.pad(w_stem_all, ((0, 0), (0, cs_total_pad - cs_total)))
    w_stem_all = w_stem_all.astype(jnp.bfloat16)                      # (kp, 128)

    # conv_head: block-diagonal (128, M*1280), bf16.
    n_head = num_models * LATENT_DIM
    w_blk = jnp.zeros((cs_total_pad, n_head), jnp.float32)
    for m, p in enumerate(params["models"]):
        w_blk = w_blk.at[m * stem_ch:(m + 1) * stem_ch,
                         m * LATENT_DIM:(m + 1) * LATENT_DIM].set(p["w_head"])
    w_head_blkdiag = w_blk.astype(jnp.bfloat16)
    b_head_all = jnp.concatenate([p["b_head"] for p in params["models"]],
                                 axis=1).astype(jnp.float32)          # (1, M*1280)

    d_pad = _round_up(max(cfg["out_dim"] for cfg in targets.values()), LANE)
    hw_list, hb_list, is_cls = [], [], []
    for key_name, cfg in targets.items():
        d = cfg["out_dim"]
        w = jnp.pad(params["heads"][key_name]["w"],
                    ((0, 0), (0, 0), (0, d_pad - d)))
        w = w.reshape(num_models * LATENT_DIM, d_pad)   # stacked along K
        pad_val = -1e30 if cfg["isClassification"] else 0.0
        b = jnp.pad(params["heads"][key_name]["b"],
                    ((0, 0), (0, 0), (0, d_pad - d)),
                    constant_values=pad_val)            # (M, 1, d_pad), f32
        hw_list.append(w)
        hb_list.append(b)
        is_cls.append(bool(cfg["isClassification"]))

    return {
        "num_models": num_models,
        "kp": kp,
        "w_stem_all": w_stem_all,                               # (kp, 128) bf16
        "w_head_blkdiag": w_head_blkdiag,                       # (128, M*1280) bf16
        "b_head_all": b_head_all,                               # (1, M*1280) f32
        "w_heads": jnp.stack(hw_list).astype(jnp.bfloat16),     # (T, M*1280, Dp)
        "b_heads": jnp.stack(hb_list).astype(jnp.float32),      # (T, M, 1, Dp)
        "is_cls": tuple(is_cls),
    }


if __name__ == "__main__":
    targets = {
        "grapheme": {"out_dim": 5, "isClassification": True},
        "quality": {"out_dim": 3, "isClassification": False},
    }
    num_models = 3
    batch, in_chans, hw = 2, 3, 16
    stem_ch = 32

    root = jax.random.PRNGKey(0)
    k_img, k_par = jax.random.split(root)
    img = jax.random.normal(k_img, (batch, in_chans, hw, hw), jnp.float32)
    params = make_params(k_par, num_models, in_chans, stem_ch, targets)
    packed = pack_params(params, targets)

    final, mean_lat = ensemble_forward(img, packed, targets)
    jax.block_until_ready(mean_lat)
    for k in final:
        jax.block_until_ready(final[k])

    # shape / sanity checks
    assert mean_lat.shape == (batch, LATENT_DIM)
    assert final["grapheme"].shape == (batch, 5)
    assert final["quality"].shape == (batch, 3)
    # softmax-then-mean of a classification target sums to 1 per row
    assert jnp.allclose(jnp.sum(final["grapheme"], axis=-1), 1.0, atol=1e-5)

    print("KERNEL_OK")
</pallas_src>

<mosaic_0001>
module attributes {stable_mosaic.version = 11 : i64} {
  func.func @_fused_kernel(%arg0: i32, %arg1: memref<128x32xbf16, #tpu.memory_space<vmem>>, %arg2: memref<32x128xbf16, #tpu.memory_space<vmem>>, %arg3: memref<128x3840xbf16, #tpu.memory_space<vmem>>, %arg4: memref<1x3840xf32, #tpu.memory_space<vmem>>, %arg5: memref<2x3840x128xbf16, #tpu.memory_space<vmem>>, %arg6: memref<2x3x1x128xf32, #tpu.memory_space<vmem>>, %arg7: memref<2x2x128xf32, #tpu.memory_space<vmem>>, %arg8: memref<2x1280xf32, #tpu.memory_space<vmem>>, %arg9: memref<2x128xf32, #tpu.memory_space<vmem>>) attributes {dimension_semantics = [#tpu.dimension_semantics<arbitrary>], iteration_bounds = array<i64: 1>, scalar_prefetch = 0 : i64, scratch_operands = 1 : i64, tpu.core_type = #tpu.core_type<tc>, window_params = [{transform_indices = @transform_0, window_bounds = array<i64: 128, 32>}, {pipeline_mode = #tpu.pipeline_mode<synchronous>, transform_indices = @transform_1, window_bounds = array<i64: 32, 128>}, {pipeline_mode = #tpu.pipeline_mode<synchronous>, transform_indices = @transform_2, window_bounds = array<i64: 128, 3840>}, {pipeline_mode = #tpu.pipeline_mode<synchronous>, transform_indices = @transform_3, window_bounds = array<i64: 1, 3840>}, {pipeline_mode = #tpu.pipeline_mode<synchronous>, transform_indices = @transform_4, window_bounds = array<i64: 2, 3840, 128>}, {pipeline_mode = #tpu.pipeline_mode<synchronous>, transform_indices = @transform_5, window_bounds = array<i64: 2, 3, 1, 128>}, {pipeline_mode = #tpu.pipeline_mode<synchronous>, transform_indices = @transform_6, window_bounds = array<i64: 2, 2, 128>}, {pipeline_mode = #tpu.pipeline_mode<synchronous>, transform_indices = @transform_7, window_bounds = array<i64: 2, 1280>}]} {
    %c0_i32 = arith.constant 0 : i32
    %0 = arith.cmpi eq, %arg0, %c0_i32 : i32
    %1 = arith.extui %0 : i1 to i32
    %c0_i32_0 = arith.constant 0 : i32
    %2 = arith.cmpi ne, %1, %c0_i32_0 : i32
    scf.if %2 {
      %cst_18 = arith.constant 0.000000e+00 : f32
      %39 = vector.broadcast %cst_18 : f32 to vector<2x128xf32>
      %c0_19 = arith.constant 0 : index
      %c0_20 = arith.constant 0 : index
      %40 = vector.load %arg9[%c0_19, %c0_20] : memref<2x128xf32, #tpu.memory_space<vmem>>, vector<2x128xf32>
      tpu.vector_store %arg9[%c0_19, %c0_20], %39 {strides = array<i32>} : memref<2x128xf32, #tpu.memory_space<vmem>>, vector<2x128xf32>,
    } else {
    }
    %c0 = arith.constant 0 : index
    %c0_1 = arith.constant 0 : index
    %3 = vector.load %arg1[%c0, %c0_1] : memref<128x32xbf16, #tpu.memory_space<vmem>>, vector<128x32xbf16>
    %c0_2 = arith.constant 0 : index
    %c0_3 = arith.constant 0 : index
    %4 = vector.load %arg2[%c0_2, %c0_3] : memref<32x128xbf16, #tpu.memory_space<vmem>>, vector<32x128xbf16>
    %cst = arith.constant dense<0.000000e+00> : vector<128x128xf32>
    %5 = tpu.matmul %3, %4, %cst {dimension_numbers = #tpu.dot_dimension_numbers<[1], [0], [0], [1], [0, 0, 1, 1], [], []>} : vector<128x32xbf16>, vector<32x128xbf16>, vector<128x128xf32> -> vector<128x128xf32>
    %cst_4 = arith.constant 3.000000e+00 : f32
    %6 = vector.broadcast %cst_4 : f32 to vector<128x128xf32>
    %7 = arith.addf %5, %6 : vector<128x128xf32>
    %cst_5 = arith.constant 0.000000e+00 : f32
    %cst_6 = arith.constant 6.000000e+00 : f32
    %8 = vector.broadcast %cst_5 : f32 to vector<128x128xf32>
    %9 = arith.maximumf %8, %7 : vector<128x128xf32>
    %10 = vector.broadcast %cst_6 : f32 to vector<128x128xf32>
    %11 = arith.minimumf %10, %9 : vector<128x128xf32>
    %12 = arith.mulf %5, %11 : vector<128x128xf32>
    %cst_7 = arith.constant 0.166666672 : f32
    %13 = vector.broadcast %cst_7 : f32 to vector<128x128xf32>
    %14 = arith.mulf %12, %13 : vector<128x128xf32>
    %15 = tpu.iota {dimensions = array<i32: 1>} : vector<2x128xi32>
    %c128_i32 = arith.constant 128 : i32
    %16 = arith.muli %arg0, %c128_i32 : i32
    %17 = vector.broadcast %16 : i32 to vector<2x128xi32>
    %18 = arith.addi %15, %17 : vector<2x128xi32>
    %19 = tpu.iota {dimensions = array<i32: 0>} : vector<2x128xi32>
    %c64_i32 = arith.constant 64 : i32
    %20 = vector.broadcast %c64_i32 : i32 to vector<2x128xi32>
    %21 = arith.muli %19, %20 : vector<2x128xi32>
    %22 = arith.cmpi sge, %18, %21 : vector<2x128xi32>
    %c64_i32_8 = arith.constant 64 : i32
    %23 = vector.broadcast %c64_i32_8 : i32 to vector<2x128xi32>
    %24 = arith.addi %21, %23 : vector<2x128xi32>
    %25 = arith.cmpi slt, %18, %24 : vector<2x128xi32>
    %26 = arith.andi %22, %25 : vector<2x128xi1>
    %cst_9 = arith.constant 1.000000e+00 : f32
    %cst_10 = arith.constant 0.000000e+00 : f32
    %27 = vector.broadcast %cst_9 : f32 to vector<2x128xf32>
    %28 = vector.broadcast %cst_10 : f32 to vector<2x128xf32>
    %29 = arith.select %26, %27, %28 : vector<2x128xi1>, vector<2x128xf32>
    %30 = arith.truncf %29 : vector<2x128xf32> to vector<2x128xbf16>
    %c0_11 = arith.constant 0 : index
    %c0_12 = arith.constant 0 : index
    %31 = vector.load %arg9[%c0_11, %c0_12] : memref<2x128xf32, #tpu.memory_space<vmem>>, vector<2x128xf32>
    %32 = arith.truncf %14 : vector<128x128xf32> to vector<128x128xbf16>
    %cst_13 = arith.constant dense<0.000000e+00> : vector<2x128xf32>
    %33 = tpu.matmul %30, %32, %cst_13 {dimension_numbers = #tpu.dot_dimension_numbers<[1], [0], [0], [1], [0, 0, 1, 1], [], []>} : vector<2x128xbf16>, vector<128x128xbf16>, vector<2x128xf32> -> vector<2x128xf32>
    %34 = arith.addf %31, %33 : vector<2x128xf32>
    %c0_14 = arith.constant 0 : index
    %c0_15 = arith.constant 0 : index
    %35 = vector.load %arg9[%c0_14, %c0_15] : memref<2x128xf32, #tpu.memory_space<vmem>>, vector<2x128xf32>
    tpu.vector_store %arg9[%c0_14, %c0_15], %34 {strides = array<i32>} : memref<2x128xf32, #tpu.memory_space<vmem>>, vector<2x128xf32>,
    %c0_i32_16 = arith.constant 0 : i32
    %36 = arith.cmpi eq, %arg0, %c0_i32_16 : i32
    %37 = arith.extui %36 : i1 to i32
    %c0_i32_17 = arith.constant 0 : i32
    %38 = arith.cmpi ne, %37, %c0_i32_17 : i32
    scf.if %38 {
      %c0_18 = arith.constant 0 : index
      %c0_19 = arith.constant 0 : index
      %39 = vector.load %arg9[%c0_18, %c0_19] : memref<2x128xf32, #tpu.memory_space<vmem>>, vector<2x128xf32>
      %cst_20 = arith.constant 1.562500e-02 : f32
      %40 = vector.broadcast %cst_20 : f32 to vector<2x128xf32>
      %41 = arith.mulf %39, %40 : vector<2x128xf32>
      %42 = arith.truncf %41 : vector<2x128xf32> to vector<2x128xbf16>
      %c0_21 = arith.constant 0 : index
      %c0_22 = arith.constant 0 : index
      %43 = vector.load %arg3[%c0_21, %c0_22] : memref<128x3840xbf16, #tpu.memory_space<vmem>>, vector<128x3840xbf16>
      %cst_23 = arith.constant dense<0.000000e+00> : vector<2x3840xf32>
      %44 = tpu.matmul %42, %43, %cst_23 {dimension_numbers = #tpu.dot_dimension_numbers<[1], [0], [0], [1], [0, 0, 1, 1], [], []>} : vector<2x128xbf16>, vector<128x3840xbf16>, vector<2x3840xf32> -> vector<2x3840xf32>
      %c0_24 = arith.constant 0 : index
      %c0_25 = arith.constant 0 : index
      %45 = vector.load %arg4[%c0_24, %c0_25] : memref<1x3840xf32, #tpu.memory_space<vmem>>, vector<1x3840xf32>
      %46 = vector.broadcast %45 : vector<1x3840xf32> to vector<2x3840xf32>
      %47 = arith.addf %44, %46 : vector<2x3840xf32>
      %cst_26 = arith.constant 3.000000e+00 : f32
      %48 = vector.broadcast %cst_26 : f32 to vector<2x3840xf32>
      %49 = arith.addf %47, %48 : vector<2x3840xf32>
      %cst_27 = arith.constant 0.000000e+00 : f32
      %cst_28 = arith.constant 6.000000e+00 : f32
      %50 = vector.broadcast %cst_27 : f32 to vector<2x3840xf32>
      %51 = arith.maximumf %50, %49 : vector<2x3840xf32>
      %52 = vector.broadcast %cst_28 : f32 to vector<2x3840xf32>
      %53 = arith.minimumf %52, %51 : vector<2x3840xf32>
      %54 = arith.mulf %47, %53 : vector<2x3840xf32>
      %cst_29 = arith.constant 0.166666672 : f32
      %55 = vector.broadcast %cst_29 : f32 to vector<2x3840xf32>
      %56 = arith.mulf %54, %55 : vector<2x3840xf32>
      %57 = vector.extract_strided_slice %56 {offsets = [0, 0], sizes = [2, 1280], strides = [1, 1]} : vector<2x3840xf32> to vector<2x1280xf32>
      %58 = vector.extract_strided_slice %56 {offsets = [0, 1280], sizes = [2, 1280], strides = [1, 1]} : vector<2x3840xf32> to vector<2x1280xf32>
      %59 = arith.addf %57, %58 : vector<2x1280xf32>
      %60 = vector.extract_strided_slice %56 {offsets = [0, 2560], sizes = [2, 1280], strides = [1, 1]} : vector<2x3840xf32> to vector<2x1280xf32>
      %61 = arith.addf %59, %60 : vector<2x1280xf32>
      %cst_30 = arith.constant 0.333333343 : f32
      %62 = vector.broadcast %cst_30 : f32 to vector<2x1280xf32>
      %63 = arith.mulf %61, %62 : vector<2x1280xf32>
      %c0_31 = arith.constant 0 : index
      %c0_32 = arith.constant 0 : index
      %64 = vector.load %arg8[%c0_31, %c0_32] : memref<2x1280xf32, #tpu.memory_space<vmem>>, vector<2x1280xf32>
      tpu.vector_store %arg8[%c0_31, %c0_32], %63 {strides = array<i32>} : memref<2x1280xf32, #tpu.memory_space<vmem>>, vector<2x1280xf32>,
      %65 = arith.truncf %56 : vector<2x3840xf32> to vector<2x3840xbf16>
      %66 = vector.extract_strided_slice %65 {offsets = [0, 0], sizes = [2, 1280], strides = [1, 1]} : vector<2x3840xbf16> to vector<2x1280xbf16>
      %c0_33 = arith.constant 0 : index
      %c0_34 = arith.constant 0 : index
      %c0_35 = arith.constant 0 : index
      %67 = vector.load %arg5[%c0_33, %c0_34, %c0_35] : memref<2x3840x128xbf16, #tpu.memory_space<vmem>>, vector<1x1280x128xbf16>
      %68 = vector.shape_cast %67 : vector<1x1280x128xbf16> to vector<1280x128xbf16>
      %cst_36 = arith.constant dense<0.000000e+00> : vector<2x128xf32>
      %69 = tpu.matmul %66, %68, %cst_36 {dimension_numbers = #tpu.dot_dimension_numbers<[1], [0], [0], [1], [0, 0, 1, 1], [], []>} : vector<2x1280xbf16>, vector<1280x128xbf16>, vector<2x128xf32> -> vector<2x128xf32>
      %c0_37 = arith.constant 0 : index
      %c0_38 = arith.constant 0 : index
      %c0_39 = arith.constant 0 : index
      %c0_40 = arith.constant 0 : index
      %70 = vector.load %arg6[%c0_37, %c0_38, %c0_39, %c0_40] : memref<2x3x1x128xf32, #tpu.memory_space<vmem>>, vector<1x1x1x128xf32>
      %71 = vector.shape_cast %70 : vector<1x1x1x128xf32> to vector<1x128xf32>
      %72 = vector.broadcast %71 : vector<1x128xf32> to vector<2x128xf32>
      %73 = arith.addf %69, %72 : vector<2x128xf32>
      %cst_41 = arith.constant dense<0xFF800000> : vector<2xf32>
      %74 = vector.multi_reduction <maximumf>, %73, %cst_41 [1] : vector<2x128xf32> to vector<2xf32>
      %75 = vector.shape_cast %74 : vector<2xf32> to vector<2x1xf32>
      %76 = vector.broadcast %75 : vector<2x1xf32> to vector<2x128xf32>
      %77 = arith.subf %73, %76 : vector<2x128xf32>
      %78 = math.exp %77 : vector<2x128xf32>
      %cst_42 = arith.constant dense<0.000000e+00> : vector<2xf32>
      %79 = vector.multi_reduction <add>, %78, %cst_42 [1] : vector<2x128xf32> to vector<2xf32>
      %80 = vector.shape_cast %79 : vector<2xf32> to vector<2x1xf32>
      %81 = vector.broadcast %80 : vector<2x1xf32> to vector<2x128xf32>
      %82 = arith.divf %78, %81 : vector<2x128xf32>
      %83 = vector.extract_strided_slice %65 {offsets = [0, 1280], sizes = [2, 1280], strides = [1, 1]} : vector<2x3840xbf16> to vector<2x1280xbf16>
      %c0_43 = arith.constant 0 : index
      %c1280 = arith.constant 1280 : index
      %c0_44 = arith.constant 0 : index
      %84 = vector.load %arg5[%c0_43, %c1280, %c0_44] : memref<2x3840x128xbf16, #tpu.memory_space<vmem>>, vector<1x1280x128xbf16>
      %85 = vector.shape_cast %84 : vector<1x1280x128xbf16> to vector<1280x128xbf16>
      %cst_45 = arith.constant dense<0.000000e+00> : vector<2x128xf32>
      %86 = tpu.matmul %83, %85, %cst_45 {dimension_numbers = #tpu.dot_dimension_numbers<[1], [0], [0], [1], [0, 0, 1, 1], [], []>} : vector<2x1280xbf16>, vector<1280x128xbf16>, vector<2x128xf32> -> vector<2x128xf32>
      %c0_46 = arith.constant 0 : index
      %c1 = arith.constant 1 : index
      %c0_47 = arith.constant 0 : index
      %c0_48 = arith.constant 0 : index
      %87 = vector.load %arg6[%c0_46, %c1, %c0_47, %c0_48] : memref<2x3x1x128xf32, #tpu.memory_space<vmem>>, vector<1x1x1x128xf32>
      %88 = vector.shape_cast %87 : vector<1x1x1x128xf32> to vector<1x128xf32>
      %89 = vector.broadcast %88 : vector<1x128xf32> to vector<2x128xf32>
      %90 = arith.addf %86, %89 : vector<2x128xf32>
      %cst_49 = arith.constant dense<0xFF800000> : vector<2xf32>
      %91 = vector.multi_reduction <maximumf>, %90, %cst_49 [1] : vector<2x128xf32> to vector<2xf32>
      %92 = vector.shape_cast %91 : vector<2xf32> to vector<2x1xf32>
      %93 = vector.broadcast %92 : vector<2x1xf32> to vector<2x128xf32>
      %94 = arith.subf %90, %93 : vector<2x128xf32>
      %95 = math.exp %94 : vector<2x128xf32>
      %cst_50 = arith.constant dense<0.000000e+00> : vector<2xf32>
      %96 = vector.multi_reduction <add>, %95, %cst_50 [1] : vector<2x128xf32> to vector<2xf32>
      %97 = vector.shape_cast %96 : vector<2xf32> to vector<2x1xf32>
      %98 = vector.broadcast %97 : vector<2x1xf32> to vector<2x128xf32>
      %99 = arith.divf %95, %98 : vector<2x128xf32>
      %100 = arith.addf %82, %99 : vector<2x128xf32>
      %101 = vector.extract_strided_slice %65 {offsets = [0, 2560], sizes = [2, 1280], strides = [1, 1]} : vector<2x3840xbf16> to vector<2x1280xbf16>
      %c0_51 = arith.constant 0 : index
      %c2560 = arith.constant 2560 : index
      %c0_52 = arith.constant 0 : index
      %102 = vector.load %arg5[%c0_51, %c2560, %c0_52] : memref<2x3840x128xbf16, #tpu.memory_space<vmem>>, vector<1x1280x128xbf16>
      %103 = vector.shape_cast %102 : vector<1x1280x128xbf16> to vector<1280x128xbf16>
      %cst_53 = arith.constant dense<0.000000e+00> : vector<2x128xf32>
      %104 = tpu.matmul %101, %103, %cst_53 {dimension_numbers = #tpu.dot_dimension_numbers<[1], [0], [0], [1], [0, 0, 1, 1], [], []>} : vector<2x1280xbf16>, vector<1280x128xbf16>, vector<2x128xf32> -> vector<2x128xf32>
      %c0_54 = arith.constant 0 : index
      %c2 = arith.constant 2 : index
      %c0_55 = arith.constant 0 : index
      %c0_56 = arith.constant 0 : index
      %105 = vector.load %arg6[%c0_54, %c2, %c0_55, %c0_56] : memref<2x3x1x128xf32, #tpu.memory_space<vmem>>, vector<1x1x1x128xf32>
      %106 = vector.shape_cast %105 : vector<1x1x1x128xf32> to vector<1x128xf32>
      %107 = vector.broadcast %106 : vector<1x128xf32> to vector<2x128xf32>
      %108 = arith.addf %104, %107 : vector<2x128xf32>
      %cst_57 = arith.constant dense<0xFF800000> : vector<2xf32>
      %109 = vector.multi_reduction <maximumf>, %108, %cst_57 [1] : vector<2x128xf32> to vector<2xf32>
      %110 = vector.shape_cast %109 : vector<2xf32> to vector<2x1xf32>
      %111 = vector.broadcast %110 : vector<2x1xf32> to vector<2x128xf32>
      %112 = arith.subf %108, %111 : vector<2x128xf32>
      %113 = math.exp %112 : vector<2x128xf32>
      %cst_58 = arith.constant dense<0.000000e+00> : vector<2xf32>
      %114 = vector.multi_reduction <add>, %113, %cst_58 [1] : vector<2x128xf32> to vector<2xf32>
      %115 = vector.shape_cast %114 : vector<2xf32> to vector<2x1xf32>
      %116 = vector.broadcast %115 : vector<2x1xf32> to vector<2x128xf32>
      %117 = arith.divf %113, %116 : vector<2x128xf32>
      %118 = arith.addf %100, %117 : vector<2x128xf32>
      %cst_59 = arith.constant 0.333333343 : f32
      %119 = vector.broadcast %cst_59 : f32 to vector<2x128xf32>
      %120 = arith.mulf %118, %119 : vector<2x128xf32>
      %c0_60 = arith.constant 0 : index
      %c0_61 = arith.constant 0 : index
      %c0_62 = arith.constant 0 : index
      %121 = vector.load %arg7[%c0_60, %c0_61, %c0_62] : memref<2x2x128xf32, #tpu.memory_space<vmem>>, vector<1x2x128xf32>
      %122 = vector.shape_cast %121 : vector<1x2x128xf32> to vector<2x128xf32>
      %123 = vector.shape_cast %120 : vector<2x128xf32> to vector<1x2x128xf32>
      tpu.vector_store %arg7[%c0_60, %c0_61, %c0_62], %123 {strides = array<i32>} : memref<2x2x128xf32, #tpu.memory_space<vmem>>, vector<1x2x128xf32>,
      %c1_63 = arith.constant 1 : index
      %c0_64 = arith.constant 0 : index
      %c0_65 = arith.constant 0 : index
      %c0_66 = arith.constant 0 : index
      %124 = vector.load %arg6[%c1_63, %c0_64, %c0_65, %c0_66] : memref<2x3x1x128xf32, #tpu.memory_space<vmem>>, vector<1x3x1x128xf32>
      %125 = vector.shape_cast %124 : vector<1x3x1x128xf32> to vector<3x1x128xf32>
      %cst_67 = arith.constant dense<0.000000e+00> : vector<1x128xf32>
      %126 = vector.multi_reduction <add>, %125, %cst_67 [0] : vector<3x1x128xf32> to vector<1x128xf32>
      %c1_68 = arith.constant 1 : index
      %c0_69 = arith.constant 0 : index
      %c0_70 = arith.constant 0 : index
      %127 = vector.load %arg5[%c1_68, %c0_69, %c0_70] : memref<2x3840x128xbf16, #tpu.memory_space<vmem>>, vector<1x3840x128xbf16>
      %128 = vector.shape_cast %127 : vector<1x3840x128xbf16> to vector<3840x128xbf16>
      %cst_71 = arith.constant dense<0.000000e+00> : vector<2x128xf32>
      %129 = tpu.matmul %65, %128, %cst_71 {dimension_numbers = #tpu.dot_dimension_numbers<[1], [0], [0], [1], [0, 0, 1, 1], [], []>} : vector<2x3840xbf16>, vector<3840x128xbf16>, vector<2x128xf32> -> vector<2x128xf32>
      %130 = vector.broadcast %126 : vector<1x128xf32> to vector<2x128xf32>
      %131 = arith.addf %129, %130 : vector<2x128xf32>
      %cst_72 = arith.constant 0.333333343 : f32
      %132 = vector.broadcast %cst_72 : f32 to vector<2x128xf32>
      %133 = arith.mulf %131, %132 : vector<2x128xf32>
      %c1_73 = arith.constant 1 : index
      %c0_74 = arith.constant 0 : index
      %c0_75 = arith.constant 0 : index
      %134 = vector.load %arg7[%c1_73, %c0_74, %c0_75] : memref<2x2x128xf32, #tpu.memory_space<vmem>>, vector<1x2x128xf32>
      %135 = vector.shape_cast %134 : vector<1x2x128xf32> to vector<2x128xf32>
      %136 = vector.shape_cast %133 : vector<2x128xf32> to vector<1x2x128xf32>
      tpu.vector_store %arg7[%c1_73, %c0_74, %c0_75], %136 {strides = array<i32>} : memref<2x2x128xf32, #tpu.memory_space<vmem>>, vector<1x2x128xf32>,
    } else {
    }
    return
  }
  func.func @transform_0(%arg0: i32) -> (i32, i32) {
    %c0_i32 = arith.constant 0 : i32
    %c0_i32_0 = arith.constant 0 : i32
    return %arg0, %c0_i32 : i32, i32
  }
  func.func @transform_1(%arg0: i32) -> (i32, i32) {
    %c0_i32 = arith.constant 0 : i32
    %c0_i32_0 = arith.constant 0 : i32
    %c0_i32_1 = arith.constant 0 : i32
    return %c0_i32, %c0_i32_0 : i32, i32
  }
  func.func @transform_2(%arg0: i32) -> (i32, i32) {
    %c0_i32 = arith.constant 0 : i32
    %c0_i32_0 = arith.constant 0 : i32
    %c0_i32_1 = arith.constant 0 : i32
    return %c0_i32, %c0_i32_0 : i32, i32
  }
  func.func @transform_3(%arg0: i32) -> (i32, i32) {
    %c0_i32 = arith.constant 0 : i32
    %c0_i32_0 = arith.constant 0 : i32
    %c0_i32_1 = arith.constant 0 : i32
    return %c0_i32, %c0_i32_0 : i32, i32
  }
  func.func @transform_4(%arg0: i32) -> (i32, i32, i32) {
    %c0_i32 = arith.constant 0 : i32
    %c0_i32_0 = arith.constant 0 : i32
    %c0_i32_1 = arith.constant 0 : i32
    %c0_i32_2 = arith.constant 0 : i32
    return %c0_i32, %c0_i32_0, %c0_i32_1 : i32, i32, i32
  }
  func.func @transform_5(%arg0: i32) -> (i32, i32, i32, i32) {
    %c0_i32 = arith.constant 0 : i32
    %c0_i32_0 = arith.constant 0 : i32
    %c0_i32_1 = arith.constant 0 : i32
    %c0_i32_2 = arith.constant 0 : i32
    %c0_i32_3 = arith.constant 0 : i32
    return %c0_i32, %c0_i32_0, %c0_i32_1, %c0_i32_2 : i32, i32, i32, i32
  }
  func.func @transform_6(%arg0: i32) -> (i32, i32, i32) {
    %c0_i32 = arith.constant 0 : i32
    %c0_i32_0 = arith.constant 0 : i32
    %c0_i32_1 = arith.constant 0 : i32
    %c0_i32_2 = arith.constant 0 : i32
    return %c0_i32, %c0_i32_0, %c0_i32_1 : i32, i32, i32
  }
  func.func @transform_7(%arg0: i32) -> (i32, i32) {
    %c0_i32 = arith.constant 0 : i32
    %c0_i32_0 = arith.constant 0 : i32
    %c0_i32_1 = arith.constant 0 : i32
    return %c0_i32, %c0_i32_0 : i32, i32
  }
}

</mosaic_0001>

<bundles_post_ra>
// kernel: tpu_custom_call.1
= control target key start
LH: loop header
LB: loop body
LE: loop exit
PB: predicated region body
PF: predicated region fallthrough
CT: control target
= control target key end

     0   :  { %13 = vsyncpa [#allocation4], 0  ;;  %s11201_s0 = inlined_call_operand.vmem [shape: bf16[128,32], index: 0, kind: input, shape index: {}]   ;;  %s11202_s1 = inlined_call_operand.hbm [shape: bf16[32,128], index: 1, kind: input, shape index: {}]   ;;  %s11203_s2 = inlined_call_operand.hbm [shape: bf16[128,3840], index: 2, kind: input, shape index: {}]   ;;  %s11204_s3 = inlined_call_operand.hbm [shape: f32[1,3840], index: 3, kind: input, shape index: {}]   ;;  %s11205_s4 = inlined_call_operand.hbm [shape: bf16[2,3840,128], index: 4, kind: input, shape index: {}]   ;;  %s11206_s5 = inlined_call_operand.hbm [shape: f32[2,3,1,128], index: 5, kind: input, shape index: {}]   ;;  %s11207_s6 = inlined_call_operand.hbm [shape: f32[2,2,128], index: 6, kind: output, shape index: {0}]   ;;  %s11208_s7 = inlined_call_operand.hbm [shape: f32[2,1280], index: 7, kind: output, shape index: {1}]  }
   0x1   :  { %14 = vsyncpa [#allocation7], 0 }
   0x2   :  { %15 = vsyncpa [#allocation10], 0 }
   0x3   :  { %16 = vsyncpa [#allocation5], 0 }
   0x4   :  { %17 = vsyncpa [#allocation14], 0  ;;  %s10586_s24 = smov [#allocation6]   ;;  %s10422_s28 = scalar_lea.hbm %s11203_s2, 30720 }
   0x5   :  { %s37_s25 = sshll.u32 %s10586_s24, 4  ;;  %p10423_p0 = scmp.ne.s32.totalorder %s11203_s2, %s10422_s28  ;;  %s38_s25 = int_to_ptr.vmem [resolvable:$true] %s37_s25 }
   0x6   :  { %p10426_p1 = scmp.lt.u32.totalorder %s10422_s28, %s11203_s2 }
   0x8   :  { %p10428_p2 = pnand %p10426_p1, %p10423_p0 }
   0xa   :  { %10431 = shalt.err (!%p10428_p2)
}
   0xb   :  { %s10432_s10 = scalar_lea.vmem %s38_s25, 30720  ;;  %p10437_p4 = scmp.lt.s32.totalorder %s38_s25, %s38_s25 }
   0xc   :  { %p10433_p3 = scmp.ne.s32.totalorder %s38_s25, %s10432_s10  ;;  %p10438_p5 = scmp.lt.s32.totalorder %s10432_s10, %s10432_s10 }
   0xe   :  { %p10439_p6 = por %p10438_p5, %p10437_p4 }
  0x10   :  { %p10440_p7 = pnand %p10439_p6, %p10433_p3 }
  0x12   :  { %10443 = shalt.err (!%p10440_p7)
}
  0x13   :  { %s10587_s11 = smov 1920   ;;  %s10588_s12 = smov 120  }
  0x14   :  { %43 = dma.hbm_to_vmem [thread:$0]  %s11203_s2, 30720, %s38_s25, [#allocation7], %s10587_s11, %s10587_s11, %s10588_s12  }
  0x15   :  { %s10589_s15 = smov [#allocation9]   ;;  %s10590_s17 = smov [#allocation3]  }
  0x16   :  { %s59_s16 = sshll.u32 %s10589_s15, 4  ;;  %s25_s18 = sshll.u32 %s10590_s17, 4  ;;  %s60_s16 = int_to_ptr.vmem [resolvable:$true] %s59_s16  ;;  %s26_s18 = int_to_ptr.vmem [resolvable:$true] %s25_s18 }
  0x17   :  { %s10444_s21 = scalar_lea.hbm %s11205_s4, 61440 }
  0x18   :  { %p10445_p8 = scmp.ne.s32.totalorder %s11205_s4, %s10444_s21  ;;  %p10448_p9 = scmp.lt.u32.totalorder %s10444_s21, %s11205_s4 }
  0x1a   :  { %p10450_p10 = pnand %p10448_p9, %p10445_p8 }
  0x1c   :  { %10453 = shalt.err (!%p10450_p10)
}
  0x1d   :  { %s10454_s2 = scalar_lea.vmem %s60_s16, 61440  ;;  %p10459_p12 = scmp.lt.s32.totalorder %s60_s16, %s60_s16 }
  0x1e   :  { %p10455_p11 = scmp.ne.s32.totalorder %s60_s16, %s10454_s2  ;;  %p10460_p13 = scmp.lt.s32.totalorder %s10454_s2, %s10454_s2 }
  0x20   :  { %p10461_p0 = por %p10460_p13, %p10459_p12 }
  0x22   :  { %p10462_p1 = pnand %p10461_p0, %p10455_p11 }
  0x24   :  { %10465 = shalt.err (!%p10462_p1)
}
  0x25   :  { %s10591_s25 = smov 64   ;;  %s10592_s27 = smov 4  }
  0x26   :  { %65 = dma.hbm_to_vmem [thread:$0]  %s11205_s4, 61440, %s60_s16, [#allocation10], %s10591_s25, %s10591_s25, %s10592_s27  }
  0x27   :  { %s10466_s9 = scalar_lea.hbm %s11202_s1, 256 }
  0x28   :  { %p10467_p2 = scmp.ne.s32.totalorder %s11202_s1, %s10466_s9  ;;  %p10470_p3 = scmp.lt.u32.totalorder %s10466_s9, %s11202_s1 }
  0x2a   :  { %p10472_p4 = pnand %p10470_p3, %p10467_p2 }
  0x2c   :  { %10475 = shalt.err (!%p10472_p4)
}
  0x2d   :  { %s10476_s14 = scalar_lea.vmem %s26_s18, 256  ;;  %p10481_p6 = scmp.lt.s32.totalorder %s26_s18, %s26_s18 }
  0x2e   :  { %p10477_p5 = scmp.ne.s32.totalorder %s26_s18, %s10476_s14  ;;  %p10482_p7 = scmp.lt.s32.totalorder %s10476_s14, %s10476_s14 }
  0x30   :  { %p10483_p8 = por %p10482_p7, %p10481_p6 }
  0x32   :  { %p10484_p9 = pnand %p10483_p8, %p10477_p5 }
  0x34   :  { %10487 = shalt.err (!%p10484_p9)
}
  0x35   :  { %31 = dma.hbm_to_vmem [thread:$0]  %s11202_s1, 256, %s26_s18, [#allocation4], %s10591_s25, %s10591_s25, %s10592_s27  }
  0x36   :  { %s10593_s16 = smov [#allocation8]   ;;  %s10594_s19 = smov [#allocation11]  }
  0x37   :  { %s50_s17 = sshll.u32 %s10593_s16, 4  ;;  %s71_s20 = sshll.u32 %s10594_s19, 4  ;;  %s51_s17 = int_to_ptr.vmem [resolvable:$true] %s50_s17  ;;  %s72_s20 = int_to_ptr.vmem [resolvable:$true] %s71_s20 }
  0x38   :  { %s10488_s23 = scalar_lea.hbm %s11204_s3, 480 }
  0x39   :  { %p10489_p10 = scmp.ne.s32.totalorder %s11204_s3, %s10488_s23  ;;  %p10492_p11 = scmp.lt.u32.totalorder %s10488_s23, %s11204_s3 }
  0x3b   :  { %p10494_p12 = pnand %p10492_p11, %p10489_p10 }
  0x3d   :  { %10497 = shalt.err (!%p10494_p12)
}
  0x3e   :  { %s10498_s1 = scalar_lea.vmem %s51_s17, 480  ;;  %p10503_p0 = scmp.lt.s32.totalorder %s51_s17, %s51_s17 }
  0x3f   :  { %p10499_p13 = scmp.ne.s32.totalorder %s51_s17, %s10498_s1  ;;  %p10504_p1 = scmp.lt.s32.totalorder %s10498_s1, %s10498_s1 }
  0x41   :  { %p10505_p2 = por %p10504_p1, %p10503_p0 }
  0x43   :  { %p10506_p3 = pnand %p10505_p2, %p10499_p13 }
  0x45   :  { %10509 = shalt.err (!%p10506_p3)
}
  0x46   :  { %53 = dma.hbm_to_vmem [thread:$0]  %s11204_s3, 480, %s51_s17, [#allocation7]  }
  0x47   :  { %s10510_s30 = scalar_lea.hbm %s11206_s5, 96 }
  0x48   :  { %p10511_p4 = scmp.ne.s32.totalorder %s11206_s5, %s10510_s30  ;;  %p10514_p5 = scmp.lt.u32.totalorder %s10510_s30, %s11206_s5 }
  0x4a   :  { %p10516_p6 = pnand %p10514_p5, %p10511_p4 }
  0x4c   :  { %10519 = shalt.err (!%p10516_p6)
}
  0x4d   :  { %s10520_s12 = scalar_lea.vmem %s72_s20, 96  ;;  %p10525_p8 = scmp.lt.s32.totalorder %s72_s20, %s72_s20 }
  0x4e   :  { %p10521_p7 = scmp.ne.s32.totalorder %s72_s20, %s10520_s12  ;;  %p10526_p9 = scmp.lt.s32.totalorder %s10520_s12, %s10520_s12 }
  0x50   :  { %p10527_p10 = por %p10526_p9, %p10525_p8 }
  0x52   :  { %p10528_p11 = pnand %p10527_p10, %p10521_p7 }
  0x54   :  { %10531 = shalt.err (!%p10528_p11)
}
  0x55   :  { %s10595_s3 = smov 16   ;;  %s10596_s13 = smov 1  }
  0x56   :  { %77 = dma.hbm_to_vmem [thread:$0]  %s11206_s5, 96, %s72_s20, [#allocation10], %s10595_s3, %s10595_s3, %s10596_s13  }
  0x57   :  { %10576 = dma.done.wait [#allocation4], 256  }
  0x58   :  { %10577 = vsyncadd [#allocation4], 4294967040 }
  0x59   :  { %10578 = dma.done.wait [#allocation7], 31200  }
  0x5a   :  { %10579 = vsyncadd [#allocation7], 4294936096 }
  0x5b   :  { %10580 = dma.done.wait [#allocation10], 61536  }
  0x5c   :  { %10581 = vsyncadd [#allocation10], 4294905760  ;;  %v9560_v0 = vld [vmem:[#allocation3] sm:$0xff]   ;;  %v9561_v1 = vld [vmem:[#allocation3 + $0x8] sm:$0xff]   ;;  %vm171_vm0 = vcmask 261120   ;;  %v10597_v10 = vmov 0.0   ;;  %v373_v37 = vlaneseq }
  0x5d   :  { %9500 = vmatprep.subr.bf16.mxu0 %v9560_v0  ;;  %v9562_v2 = vld [vmem:[%s11201_s0] sm:$0xff]   ;;  %v9563_v3 = vld [vmem:[%s11201_s0 + $0x8] sm:$0xff]   ;;  %v9564_v4 = vld [vmem:[%s11201_s0 + $0x10] sm:$0xff]   ;;  %9520 = vmatprep.subr.bf16.mxu1 %v10597_v10  ;;  %98 = vst [vmem:[#allocation2] sm:$0x3] %v10597_v10  ;;  %vm10598_vm1 = vmmov 0  }
  0x5e   :  { %9501 = vmatpush3.bf16.msra.mxu0 %v9560_v0  ;;  %9504 = vmatprep.mubr.msk.bf16.mxu0 %vm171_vm0, %v9562_v2  ;;  %v9565_v5 = vld [vmem:[%s11201_s0 + $0x18] sm:$0xff]   ;;  %v9566_v6 = vld [vmem:[%s11201_s0 + $0x20] sm:$0xff]   ;;  %v9567_v7 = vld [vmem:[%s11201_s0 + $0x28] sm:$0xff]   ;;  %v10741_v53 = vshrl.u32 %v373_v37, 7  ;;  %vm3772_vm6 = vcmask 1041408   ;;  %vm5510_vm7 = vcmask 1040384  }
  0x5f   :  { %9502 = vmatprep.subr.bf16.mxu0 %v9561_v1  ;;  %v9568_v8 = vld [vmem:[%s11201_s0 + $0x30] sm:$0xff]   ;;  %v9569_v9 = vld [vmem:[%s11201_s0 + $0x38] sm:$0xff]   ;;  %9536 = vmatprep.mubr.msk.bf16.mxu1 %vm10598_vm1, %v10597_v10  ;;  %s10602_s0 = smov [#allocation13]  }
  0x60   :  { %v9570_v11 = vld [vmem:[#allocation6] ss:$120 sps:$4 sm:$0xff]   ;;  %v9572_v12 = vld [vmem:[#allocation6 + $0x4] ss:$120 sps:$4 sm:$0xff]   ;;  %v9578_v13 = vld [vmem:[#allocation6 + $0xf4] ss:$120 sps:$4 sm:$0xff]  }
  0x61   :  { %v9576_v14 = vld [vmem:[#allocation6 + $0xf0] ss:$120 sps:$4 sm:$0xff]   ;;  %v9584_v15 = vld [vmem:[#allocation6 + $0x1e4] ss:$120 sps:$4 sm:$0xff]   ;;  %v9582_v16 = vld [vmem:[#allocation6 + $0x1e0] ss:$120 sps:$4 sm:$0xff]  }
  0x62   :  { %9503 = vmatpush3.bf16.msra.mxu0 %v9561_v1  ;;  %v9590_v17 = vld [vmem:[#allocation6 + $0x2d4] ss:$120 sps:$4 sm:$0xff]   ;;  %v9588_v18 = vld [vmem:[#allocation6 + $0x2d0] ss:$120 sps:$4 sm:$0xff]   ;;  %v9596_v19 = vld [vmem:[#allocation6 + $0x3c4] ss:$120 sps:$4 sm:$0xff]  }
  0x63   :  { %2042 = vmatprep.subr.bf16.mxu0 %v9572_v12  ;;  %v9594_v20 = vld [vmem:[#allocation6 + $0x3c0] ss:$120 sps:$4 sm:$0xff]   ;;  %v380_v1 = vmul.u32 64, %v10741_v53  ;;  %s8062_s27 = sshll.u32 %s10602_s0, 4  ;;  %s8063_s27 = int_to_ptr.vmem [resolvable:$true] %s8062_s27 }
  0x64   :  { %s10532_s29 = scalar_lea.vmem %s8063_s27, 320  ;;  %p10537_p13 = scmp.lt.s32.totalorder %s8063_s27, %s8063_s27 }
  0x65   :  { %9505 = vmatmul.mubr.msk.bf16.vlgmr.msra.gmra.mrb[0].mxu0 %vm171_vm0, %v9563_v3  ;;  %p10533_p12 = scmp.ne.s32.totalorder %s8063_s27, %s10532_s29  ;;  %p10538_p0 = scmp.lt.s32.totalorder %s10532_s29, %s10532_s29 }
  0x66   :  { %9508 = vmatprep.mubr.msk.bf16.mxu0 %vm171_vm0, %v9564_v4  ;;  %2043 = vmatpush1.bf16.msra.mxu0 %v9570_v11 }
  0x67   :  { %2044 = vmatprep.subr.bf16.mxu0 %v9578_v13  ;;  %p10539_p1 = por %p10538_p0, %p10537_p13 }
  0x69   :  { %p10540_p2 = pnand %p10539_p1, %p10533_p12 }
  0x6a   :  { %2045 = vmatpush1.bf16.msra.mxu0 %v9576_v14 }
  0x6b   :  { %2046 = vmatprep.subr.bf16.mxu0 %v9584_v15 }
  0x6d   :  { %9509 = vmatmul.mubr.msk.bf16.gmra.mrb[4].mxu0 %vm171_vm0, %v9565_v5 }
  0x6e   :  { %9512 = vmatprep.mubr.msk.bf16.mxu0 %vm171_vm0, %v9566_v6  ;;  %2047 = vmatpush1.bf16.msra.mxu0 %v9582_v16 }
  0x6f   :  { %2048 = vmatprep.subr.bf16.mxu0 %v9590_v17 }
  0x72   :  { %2049 = vmatpush1.bf16.msra.mxu0 %v9588_v18  ;;  %v374_v18 = vand.u32 127, %v373_v37 }
  0x73   :  { %2050 = vmatprep.subr.bf16.mxu0 %v9596_v19 }
  0x74   :  { %vm381_vm2 = vcmp.ge.s32.totalorder %v374_v18, %v380_v1 }
  0x75   :  { %9513 = vmatmul.mubr.msk.bf16.gmra.mrb[8].mxu0 %vm171_vm0, %v9567_v7 }
  0x76   :  { %9516 = vmatprep.mubr.msk.bf16.mxu0 %vm171_vm0, %v9568_v8  ;;  %2051 = vmatpush1.bf16.msra.mxu0 %v9594_v20 }
  0x7d   :  { %9517 = vmatmul.mubr.msk.bf16.gmra.mrb[12].mxu0 %vm171_vm0, %v9569_v9 }
 0x138   :  { %v9506_v21 = vpop.f32.mrb[0].mxu0 }
 0x139   :  { %v295_v22 = vadd.f32 3.0, %v9506_v21  ;;  %v230_v23 = vpop.f32.mrb[1].mxu0 }
 0x13a   :  { %v293_v24 = vadd.f32 3.0, %v230_v23  ;;  %v9507_v25 = vpop.f32.mrb[2].mxu0 }
 0x13b   :  { %v311_v26 = vmax.f32 %v295_v22, 0.0  ;;  %v296_v27 = vadd.f32 3.0, %v9507_v25  ;;  %v233_v28 = vpop.f32.mrb[3].mxu0 }
 0x13c   :  { %v309_v29 = vmax.f32 %v293_v24, 0.0  ;;  %v294_v30 = vadd.f32 3.0, %v233_v28 }
 0x13d   :  { %v327_v31 = vmin.f32 %v311_v26, 6.0  ;;  %v312_v32 = vmax.f32 %v296_v27, 0.0 }
 0x13e   :  { %v325_v33 = vmin.f32 %v309_v29, 6.0  ;;  %v310_v34 = vmax.f32 %v294_v30, 0.0  ;;  %v382_v30 = vadd.s32 64, %v380_v1 }
 0x13f   :  { %v343_v35 = vmul.f32 %v9506_v21, %v327_v31  ;;  %v328_v36 = vmin.f32 %v312_v32, 6.0 }
 0x140   :  { %v341_v38 = vmul.f32 %v325_v33, %v230_v23  ;;  %v326_v39 = vmin.f32 %v310_v34, 6.0  ;;  %v9510_v40 = vpop.f32.mrb[4].mxu0  ;;  %vm383_vm3 = vcmp.lt.s32.totalorder %v374_v18, %v382_v30  ;;  %v9600_v18 = vld [vmem:[#allocation6 + $0x4b0] ss:$120 sps:$4 sm:$0xff]   ;;  %v10600_v30 = vmov 0  }
 0x141   :  { %v359_v41 = vmul.f32 0.16666667, %v343_v35  ;;  %v344_v42 = vmul.f32 %v9507_v25, %v328_v36  ;;  %v299_v43 = vadd.f32 3.0, %v9510_v40  ;;  %v246_v44 = vpop.f32.mrb[5].mxu0  ;;  %vm10749_vm4 = vmand %vm381_vm2, %vm383_vm3  ;;  %2074 = vmatprep.mubr.bf16.mxu0 %v10600_v30 }
 0x142   :  { %v357_v45 = vmul.f32 0.16666667, %v341_v38  ;;  %v342_v46 = vmul.f32 %v326_v39, %v233_v28  ;;  %v297_v47 = vadd.f32 3.0, %v246_v44  ;;  %v9511_v48 = vpop.f32.mrb[6].mxu0  ;;  %vm8095_vm5 = vmpackc.low %vm10749_vm4, %vm10749_vm4 }
 0x143   :  { %v360_v49 = vmul.f32 0.16666667, %v344_v42  ;;  %v315_v50 = vmax.f32 %v299_v43, 0.0  ;;  %v300_v51 = vadd.f32 3.0, %v9511_v48  ;;  %v249_v52 = vpop.f32.mrb[7].mxu0 }
 0x144   :  { %v358_v54 = vmul.f32 0.16666667, %v342_v46  ;;  %v313_v55 = vmax.f32 %v297_v47, 0.0  ;;  %v298_v56 = vadd.f32 3.0, %v249_v52 }
 0x145   :  { %v331_v57 = vmin.f32 %v315_v50, 6.0  ;;  %v316_v58 = vmax.f32 %v300_v51, 0.0  ;;  %v389_v59 = vpack.c.bf16 %v360_v49, %v359_v41 }
 0x146   :  { %v329_v60 = vmin.f32 %v313_v55, 6.0  ;;  %v314_v61 = vmax.f32 %v298_v56, 0.0  ;;  %v388_v62 = vpack.c.bf16 %v358_v54, %v357_v45 }
 0x147   :  { %v347_v63 = vmul.f32 %v9510_v40, %v331_v57  ;;  %v332_v0 = vmin.f32 %v316_v58, 6.0 }
 0x148   :  { %v345_v2 = vmul.f32 %v329_v60, %v246_v44  ;;  %v330_v3 = vmin.f32 %v314_v61, 6.0  ;;  %v9514_v4 = vpop.f32.mrb[8].mxu0  ;;  %9521 = vmatpush3.bf16.msra.mxu1 %v388_v62  ;;  %v9651_v62 = vld [vmem:[#allocation6 + $0x4c8] ss:$120 sps:$4 sm:$0xff]  }
 0x149   :  { %v363_v5 = vmul.f32 0.16666667, %v347_v63  ;;  %v348_v6 = vmul.f32 %v9511_v48, %v332_v0  ;;  %v303_v7 = vadd.f32 3.0, %v9514_v4  ;;  %v262_v8 = vpop.f32.mrb[9].mxu0  ;;  %9522 = vmatprep.subr.bf16.mxu1 %v10597_v10 }
 0x14a   :  { %v361_v9 = vmul.f32 0.16666667, %v345_v2  ;;  %v346_v11 = vmul.f32 %v330_v3, %v249_v52  ;;  %v301_v12 = vadd.f32 3.0, %v262_v8  ;;  %v9515_v13 = vpop.f32.mrb[10].mxu0 }
 0x14b   :  { %v364_v14 = vmul.f32 0.16666667, %v348_v6  ;;  %v319_v15 = vmax.f32 %v303_v7, 0.0  ;;  %v304_v16 = vadd.f32 3.0, %v9515_v13  ;;  %v265_v17 = vpop.f32.mrb[11].mxu0 }
 0x14c   :  { %v362_v19 = vmul.f32 0.16666667, %v346_v11  ;;  %v317_v20 = vmax.f32 %v301_v12, 0.0  ;;  %v302_v21 = vadd.f32 3.0, %v265_v17  ;;  %9523 = vmatpush3.bf16.msra.mxu1 %v389_v59  ;;  %v9573_v6 = vld [vmem:[#allocation6 + $0x8] ss:$120 sps:$4 sm:$0xff]  }
 0x14d   :  { %v335_v22 = vmin.f32 %v319_v15, 6.0  ;;  %v320_v23 = vmax.f32 %v304_v16, 0.0  ;;  %9524 = vmatprep.subr.bf16.mxu1 %v10597_v10  ;;  %v391_v24 = vpack.c.bf16 %v364_v14, %v363_v5  ;;  %v9575_v5 = vld [vmem:[#allocation6 + $0xc] ss:$120 sps:$4 sm:$0xff]   ;;  %v9581_v7 = vld [vmem:[#allocation6 + $0xfc] ss:$120 sps:$4 sm:$0xff]  }
 0x14e   :  { %v333_v25 = vmin.f32 %v317_v20, 6.0  ;;  %v318_v26 = vmax.f32 %v302_v21, 0.0  ;;  %v390_v27 = vpack.c.bf16 %v362_v19, %v361_v9  ;;  %v10599_v9 = vmov 1.0|1.0   ;;  %v9587_v11 = vld [vmem:[#allocation6 + $0x1ec] ss:$120 sps:$4 sm:$0xff]  }
 0x14f   :  { %v351_v28 = vmul.f32 %v9514_v4, %v335_v22  ;;  %v336_v29 = vmin.f32 %v320_v23, 6.0  ;;  %v9585_v12 = vld [vmem:[#allocation6 + $0x1e8] ss:$120 sps:$4 sm:$0xff]   ;;  %v9591_v14 = vld [vmem:[#allocation6 + $0x2d8] ss:$120 sps:$4 sm:$0xff]  }
 0x150   :  { %v349_v31 = vmul.f32 %v333_v25, %v262_v8  ;;  %v334_v32 = vmin.f32 %v318_v26, 6.0  ;;  %v9518_v33 = vpop.f32.mrb[12].mxu0  ;;  %9525 = vmatpush3.bf16.msra.mxu1 %v390_v27  ;;  %v9579_v8 = vld [vmem:[#allocation6 + $0xf8] ss:$120 sps:$4 sm:$0xff]   ;;  %v9599_v15 = vld [vmem:[#allocation6 + $0x3cc] ss:$120 sps:$4 sm:$0xff]  }
 0x151   :  { %v367_v34 = vmul.f32 0.16666667, %v351_v28  ;;  %v352_v35 = vmul.f32 %v9515_v13, %v336_v29  ;;  %v307_v36 = vadd.f32 3.0, %v9518_v33  ;;  %v278_v37 = vpop.f32.mrb[13].mxu0  ;;  %9526 = vmatprep.subr.bf16.mxu1 %v10597_v10  ;;  %v9593_v13 = vld [vmem:[#allocation6 + $0x2dc] ss:$120 sps:$4 sm:$0xff]  }
 0x152   :  { %v365_v38 = vmul.f32 0.16666667, %v349_v31  ;;  %v350_v39 = vmul.f32 %v334_v32, %v265_v17  ;;  %v305_v40 = vadd.f32 3.0, %v278_v37  ;;  %v9519_v41 = vpop.f32.mrb[14].mxu0  ;;  %v9597_v16 = vld [vmem:[#allocation6 + $0x3c8] ss:$120 sps:$4 sm:$0xff]  }
 0x153   :  { %v368_v42 = vmul.f32 0.16666667, %v352_v35  ;;  %v323_v43 = vmax.f32 %v307_v36, 0.0  ;;  %v308_v44 = vadd.f32 3.0, %v9519_v41  ;;  %v281_v45 = vpop.f32.mrb[15].mxu0 }
 0x154   :  { %v366_v46 = vmul.f32 0.16666667, %v350_v39  ;;  %v321_v47 = vmax.f32 %v305_v40, 0.0  ;;  %v306_v48 = vadd.f32 3.0, %v281_v45  ;;  %9527 = vmatpush3.bf16.msra.mxu1 %v391_v24  ;;  %v9605_v17 = vld [vmem:[#allocation6 + $0x4bc] ss:$120 sps:$4 sm:$0xff]  }
 0x155   :  { %v339_v49 = vmin.f32 %v323_v43, 6.0  ;;  %v324_v50 = vmax.f32 %v308_v44, 0.0  ;;  %9528 = vmatprep.subr.bf16.mxu1 %v10597_v10  ;;  %v393_v51 = vpack.c.bf16 %v368_v42, %v367_v34  ;;  %v9603_v19 = vld [vmem:[#allocation6 + $0x4b8] ss:$120 sps:$4 sm:$0xff]   ;;  %v9608_v20 = vld [vmem:[#allocation6 + $0x5a4] ss:$120 sps:$4 sm:$0xff]  }
 0x156   :  { %v337_v52 = vmin.f32 %v321_v47, 6.0  ;;  %v322_v54 = vmax.f32 %v306_v48, 0.0  ;;  %v392_v55 = vpack.c.bf16 %v366_v46, %v365_v38  ;;  %v9611_v21 = vld [vmem:[#allocation6 + $0x5ac] ss:$120 sps:$4 sm:$0xff]   ;;  %v9606_v22 = vld [vmem:[#allocation6 + $0x5a0] ss:$120 sps:$4 sm:$0xff]  }
 0x157   :  { %v355_v56 = vmul.f32 %v9518_v33, %v339_v49  ;;  %v340_v57 = vmin.f32 %v324_v50, 6.0  ;;  %v9609_v23 = vld [vmem:[#allocation6 + $0x5a8] ss:$120 sps:$4 sm:$0xff]   ;;  %v9614_v24 = vld [vmem:[#allocation6 + $0x694] ss:$120 sps:$4 sm:$0xff]  }
 0x158   :  { %v353_v58 = vmul.f32 %v337_v52, %v278_v37  ;;  %v338_v59 = vmin.f32 %v322_v54, 6.0  ;;  %9529 = vmatpush3.bf16.msra.mxu1 %v392_v55  ;;  %v9617_v25 = vld [vmem:[#allocation6 + $0x69c] ss:$120 sps:$4 sm:$0xff]   ;;  %v9612_v26 = vld [vmem:[#allocation6 + $0x690] ss:$120 sps:$4 sm:$0xff]  }
 0x159   :  { %v371_v60 = vmul.f32 0.16666667, %v355_v56  ;;  %v356_v61 = vmul.f32 %v9519_v41, %v340_v57  ;;  %9530 = vmatprep.subr.bf16.mxu1 %v10597_v10  ;;  %v9615_v27 = vld [vmem:[#allocation6 + $0x698] ss:$120 sps:$4 sm:$0xff]   ;;  %v9620_v28 = vld [vmem:[#allocation6 + $0x14] ss:$120 sps:$4 sm:$0xff]  }
 0x15a   :  { %v369_v63 = vmul.f32 0.16666667, %v353_v58  ;;  %v354_v0 = vmul.f32 %v338_v59, %v281_v45  ;;  %v9623_v29 = vld [vmem:[#allocation6 + $0x1c] ss:$120 sps:$4 sm:$0xff]   ;;  %v387_v31 = vld [vmem:[#allocation2] sm:$0x3] }
 0x15b   :  { %v372_v1 = vmul.f32 0.16666667, %v356_v61  ;;  %v9618_v39 = vld [vmem:[#allocation6 + $0x10] ss:$120 sps:$4 sm:$0xff]   ;;  %v9626_v42 = vld [vmem:[#allocation6 + $0x104] ss:$120 sps:$4 sm:$0xff]  }
 0x15c   :  { %v370_v2 = vmul.f32 0.16666667, %v354_v0  ;;  %9531 = vmatpush3.bf16.msra.mxu1 %v393_v51  ;;  %v9621_v40 = vld [vmem:[#allocation6 + $0x18] ss:$120 sps:$4 sm:$0xff]   ;;  %v9629_v43 = vld [vmem:[#allocation6 + $0x10c] ss:$120 sps:$4 sm:$0xff]  }
 0x15d   :  { %9532 = vmatprep.subr.bf16.mxu1 %v10597_v10  ;;  %v395_v3 = vpack.c.bf16 %v372_v1, %v371_v60  ;;  %v9624_v44 = vld [vmem:[#allocation6 + $0x100] ss:$120 sps:$4 sm:$0xff]   ;;  %v9632_v46 = vld [vmem:[#allocation6 + $0x1f4] ss:$120 sps:$4 sm:$0xff]   ;;  %v9630_v48 = vld [vmem:[#allocation6 + $0x1f0] ss:$120 sps:$4 sm:$0xff]  }
 0x15e   :  { %v394_v4 = vpack.c.bf16 %v370_v2, %v369_v63  ;;  %v9627_v45 = vld [vmem:[#allocation6 + $0x108] ss:$120 sps:$4 sm:$0xff]   ;;  %v9635_v47 = vld [vmem:[#allocation6 + $0x1fc] ss:$120 sps:$4 sm:$0xff]   ;;  %v9633_v49 = vld [vmem:[#allocation6 + $0x1f8] ss:$120 sps:$4 sm:$0xff]  }
 0x15f   :  { %v9638_v50 = vld [vmem:[#allocation6 + $0x2e4] ss:$120 sps:$4 sm:$0xff]   ;;  %v9636_v52 = vld [vmem:[#allocation6 + $0x2e0] ss:$120 sps:$4 sm:$0xff]   ;;  %v9644_v55 = vld [vmem:[#allocation6 + $0x3d4] ss:$120 sps:$4 sm:$0xff]  }
 0x160   :  { %9533 = vmatpush3.bf16.msra.mxu1 %v394_v4  ;;  %v9641_v51 = vld [vmem:[#allocation6 + $0x2ec] ss:$120 sps:$4 sm:$0xff]   ;;  %v9639_v54 = vld [vmem:[#allocation6 + $0x2e8] ss:$120 sps:$4 sm:$0xff]   ;;  %v9647_v56 = vld [vmem:[#allocation6 + $0x3dc] ss:$120 sps:$4 sm:$0xff]  }
 0x161   :  { %9534 = vmatprep.subr.bf16.mxu1 %v10597_v10  ;;  %v9602_v10 = vld [vmem:[#allocation6 + $0x4b4] ss:$120 sps:$4 sm:$0xff]   ;;  %v9642_v57 = vld [vmem:[#allocation6 + $0x3d0] ss:$120 sps:$4 sm:$0xff]   ;;  %v9650_v59 = vld [vmem:[#allocation6 + $0x4c4] ss:$120 sps:$4 sm:$0xff]  }
 0x162   :  { %2052 = vmatprep.subr.bf16.mxu0 %v9602_v10  ;;  %v9645_v58 = vld [vmem:[#allocation6 + $0x3d8] ss:$120 sps:$4 sm:$0xff]   ;;  %v9653_v60 = vld [vmem:[#allocation6 + $0x4cc] ss:$120 sps:$4 sm:$0xff]   ;;  %v9659_v0 = vld [vmem:[#allocation6 + $0x5bc] ss:$120 sps:$4 sm:$0xff]  }
 0x163   :  { %2053 = vmatpush1.bf16.msra.mxu0 %v9600_v18  ;;  %v9648_v61 = vld [vmem:[#allocation6 + $0x4c0] ss:$120 sps:$4 sm:$0xff]   ;;  %v9656_v63 = vld [vmem:[#allocation6 + $0x5b4] ss:$120 sps:$4 sm:$0xff]   ;;  %v9654_v1 = vld [vmem:[#allocation6 + $0x5b0] ss:$120 sps:$4 sm:$0xff]  }
 0x164   :  { %9535 = vmatpush3.bf16.msra.mxu1 %v395_v3  ;;  %2054 = vmatprep.subr.bf16.mxu0 %v9608_v20  ;;  %v9657_v2 = vld [vmem:[#allocation6 + $0x5b8] ss:$120 sps:$4 sm:$0xff]   ;;  %v9662_v3 = vld [vmem:[#allocation6 + $0x6a4] ss:$120 sps:$4 sm:$0xff]   ;;  %v9681_v18 = vld [vmem:[#allocation6 + $0x208] ss:$120 sps:$4 sm:$0xff]  }
 0x165   :  { %2083 = vmatprep.subr.bf16.mxu1 %v9575_v5  ;;  %v9665_v4 = vld [vmem:[#allocation6 + $0x6ac] ss:$120 sps:$4 sm:$0xff]   ;;  %v9660_v5 = vld [vmem:[#allocation6 + $0x6a0] ss:$120 sps:$4 sm:$0xff]   ;;  %v9689_v20 = vld [vmem:[#allocation6 + $0x2fc] ss:$120 sps:$4 sm:$0xff]  }
 0x166   :  { %v9683_v10 = vld [vmem:[#allocation6 + $0x20c] ss:$120 sps:$4 sm:$0xff]  }
 0x167   :  { %9537 = vmatmul.mubr.msk.bf16.vlgmr.msra.gmra.mrb[0].mxu1 %vm8095_vm5, %v10599_v9  ;;  %2055 = vmatpush1.bf16.msra.mxu0 %v9606_v22  ;;  %v9666_v9 = vld [vmem:[#allocation6 + $0x20] ss:$120 sps:$4 sm:$0xff]  }
 0x168   :  { %2084 = vmatpush1.bf16.msra.mxu1 %v9573_v6  ;;  %2056 = vmatprep.subr.bf16.mxu0 %v9614_v24  ;;  %v9663_v6 = vld [vmem:[#allocation6 + $0x6a8] ss:$120 sps:$4 sm:$0xff]   ;;  %v9687_v22 = vld [vmem:[#allocation6 + $0x2f8] ss:$120 sps:$4 sm:$0xff]   ;;  %v9695_v24 = vld [vmem:[#allocation6 + $0x3ec] ss:$120 sps:$4 sm:$0xff]  }
 0x169   :  { %2085 = vmatprep.subr.bf16.mxu1 %v9581_v7  ;;  %2115 = vmatprep.mubr.bf16.mxu1 %v10600_v30  ;;  %v9668_v7 = vld [vmem:[#allocation6 + $0x24] ss:$120 sps:$4 sm:$0xff]  }
 0x16b   :  { %2057 = vmatpush1.bf16.msra.mxu0 %v9612_v26  ;;  %v9693_v26 = vld [vmem:[#allocation6 + $0x3e8] ss:$120 sps:$4 sm:$0xff]  }
 0x16c   :  { %2086 = vmatpush1.bf16.msra.mxu1 %v9579_v8  ;;  %2124 = vmatprep.subr.bf16.mxu0 %v9620_v28  ;;  %v9671_v8 = vld [vmem:[#allocation6 + $0x2c] ss:$120 sps:$4 sm:$0xff]   ;;  %v9701_v28 = vld [vmem:[#allocation6 + $0x4dc] ss:$120 sps:$4 sm:$0xff]  }
 0x16d   :  { %2087 = vmatprep.subr.bf16.mxu1 %v9587_v11  ;;  %v9669_v11 = vld [vmem:[#allocation6 + $0x28] ss:$120 sps:$4 sm:$0xff]  }
 0x170   :  { %2088 = vmatpush1.bf16.msra.mxu1 %v9585_v12  ;;  %v9674_v12 = vld [vmem:[#allocation6 + $0x114] ss:$120 sps:$4 sm:$0xff]  }
 0x171   :  { %2089 = vmatprep.subr.bf16.mxu1 %v9593_v13  ;;  %v9677_v13 = vld [vmem:[#allocation6 + $0x11c] ss:$120 sps:$4 sm:$0xff]  }
 0x174   :  { %2090 = vmatpush1.bf16.msra.mxu1 %v9591_v14  ;;  %v9672_v14 = vld [vmem:[#allocation6 + $0x110] ss:$120 sps:$4 sm:$0xff]  }
 0x175   :  { %2091 = vmatprep.subr.bf16.mxu1 %v9599_v15  ;;  %v9675_v15 = vld [vmem:[#allocation6 + $0x118] ss:$120 sps:$4 sm:$0xff]  }
 0x178   :  { %2092 = vmatpush1.bf16.msra.mxu1 %v9597_v16  ;;  %v9680_v16 = vld [vmem:[#allocation6 + $0x204] ss:$120 sps:$4 sm:$0xff]  }
 0x179   :  { %2093 = vmatprep.subr.bf16.mxu1 %v9605_v17  ;;  %v9678_v17 = vld [vmem:[#allocation6 + $0x200] ss:$120 sps:$4 sm:$0xff]  }
 0x17c   :  { %2094 = vmatpush1.bf16.msra.mxu1 %v9603_v19  ;;  %v9686_v19 = vld [vmem:[#allocation6 + $0x2f4] ss:$120 sps:$4 sm:$0xff]  }
 0x17d   :  { %2095 = vmatprep.subr.bf16.mxu1 %v9611_v21  ;;  %v9684_v21 = vld [vmem:[#allocation6 + $0x2f0] ss:$120 sps:$4 sm:$0xff]  }
 0x180   :  { %2096 = vmatpush1.bf16.msra.mxu1 %v9609_v23  ;;  %v9692_v23 = vld [vmem:[#allocation6 + $0x3e4] ss:$120 sps:$4 sm:$0xff]  }
 0x181   :  { %2097 = vmatprep.subr.bf16.mxu1 %v9617_v25  ;;  %v9690_v25 = vld [vmem:[#allocation6 + $0x3e0] ss:$120 sps:$4 sm:$0xff]  }
 0x184   :  { %2098 = vmatpush1.bf16.msra.mxu1 %v9615_v27  ;;  %v9698_v27 = vld [vmem:[#allocation6 + $0x4d4] ss:$120 sps:$4 sm:$0xff]  }
 0x185   :  { %2165 = vmatprep.subr.bf16.mxu1 %v9623_v29  ;;  %v9696_v29 = vld [vmem:[#allocation6 + $0x4d0] ss:$120 sps:$4 sm:$0xff]  }
 0x23a   :  { %v430_v32 = vpop.f32.mrb[0].mxu1 }
 0x23b   :  { %v436_v33 = vadd.f32 %v430_v32, %v387_v31  ;;  %v9538_v34 = vpop.f32.mrb[1].mxu1  ;;  %v9699_v31 = vld [vmem:[#allocation6 + $0x4d8] ss:$120 sps:$4 sm:$0xff]   ;;  %v9704_v32 = vld [vmem:[#allocation6 + $0x5c4] ss:$120 sps:$4 sm:$0xff]  }
 0x23c   :  { %v433_v35 = vpop.f32.mrb[2].mxu1  ;;  %v9702_v34 = vld [vmem:[#allocation6 + $0x5c0] ss:$120 sps:$4 sm:$0xff]  }
 0x23d   :  { %437 = vst [vmem:[#allocation2] sm:$0x3] %v436_v33  ;;  %v9539_v36 = vpop.f32.mrb[3].mxu1  ;;  %v9707_v33 = vld [vmem:[#allocation6 + $0x5cc] ss:$120 sps:$4 sm:$0xff]  }
 0x23e   :  { %v9705_v35 = vld [vmem:[#allocation6 + $0x5c8] ss:$120 sps:$4 sm:$0xff]   ;;  %v9710_v36 = vld [vmem:[#allocation6 + $0x6b4] ss:$120 sps:$4 sm:$0xff]  }
 0x244   :  { %v441_v37 = vld [vmem:[#allocation2] sm:$0x3] }
 0x245   :  { %v442_v38 = vmul.f32 0.015625, %v441_v37  ;;  %v9713_v37 = vld [vmem:[#allocation6 + $0x6bc] ss:$120 sps:$4 sm:$0xff]  }
 0x247   :  { %v10760_v41 = vpack.c.bf16 %v442_v38, %v442_v38  ;;  %v9708_v38 = vld [vmem:[#allocation6 + $0x6b0] ss:$120 sps:$4 sm:$0xff]  }
 0x249   :  { %2075 = vmatmul.mubr.bf16.vlgmr.msra.gmra.mrb[16].mxu0 %v10760_v41  ;;  %2116 = vmatmul.mubr.bf16.vlgmr.msra.gmra.mrb[4].mxu1 %v10760_v41 }
 0x24a   :  { %2125 = vmatpush1.bf16.msra.mxu0 %v9618_v39  ;;  %2166 = vmatpush1.bf16.msra.mxu1 %v9621_v40  ;;  %v9711_v39 = vld [vmem:[#allocation6 + $0x6b8] ss:$120 sps:$4 sm:$0xff]   ;;  %v9716_v40 = vld [vmem:[#allocation6 + $0x34] ss:$120 sps:$4 sm:$0xff]  }
 0x24b   :  { %2126 = vmatprep.subr.bf16.mxu0 %v9626_v42  ;;  %2167 = vmatprep.subr.bf16.mxu1 %v9629_v43  ;;  %v9719_v42 = vld [vmem:[#allocation6 + $0x3c] ss:$120 sps:$4 sm:$0xff]   ;;  %v9714_v43 = vld [vmem:[#allocation6 + $0x30] ss:$120 sps:$4 sm:$0xff]  }
 0x24c   :  { %2156 = vmatprep.mubr.bf16.mxu0 %v10600_v30  ;;  %2197 = vmatprep.mubr.bf16.mxu1 %v10600_v30 }
 0x24e   :  { %2127 = vmatpush1.bf16.msra.mxu0 %v9624_v44  ;;  %2168 = vmatpush1.bf16.msra.mxu1 %v9627_v45  ;;  %v9717_v44 = vld [vmem:[#allocation6 + $0x38] ss:$120 sps:$4 sm:$0xff]   ;;  %v9722_v45 = vld [vmem:[#allocation6 + $0x124] ss:$120 sps:$4 sm:$0xff]  }
 0x24f   :  { %2128 = vmatprep.subr.bf16.mxu0 %v9632_v46  ;;  %2169 = vmatprep.subr.bf16.mxu1 %v9635_v47  ;;  %v9725_v46 = vld [vmem:[#allocation6 + $0x12c] ss:$120 sps:$4 sm:$0xff]   ;;  %v9720_v47 = vld [vmem:[#allocation6 + $0x120] ss:$120 sps:$4 sm:$0xff]  }
 0x252   :  { %2129 = vmatpush1.bf16.msra.mxu0 %v9630_v48  ;;  %2170 = vmatpush1.bf16.msra.mxu1 %v9633_v49  ;;  %v9723_v48 = vld [vmem:[#allocation6 + $0x128] ss:$120 sps:$4 sm:$0xff]   ;;  %v9728_v49 = vld [vmem:[#allocation6 + $0x214] ss:$120 sps:$4 sm:$0xff]  }
 0x253   :  { %2130 = vmatprep.subr.bf16.mxu0 %v9638_v50  ;;  %2171 = vmatprep.subr.bf16.mxu1 %v9641_v51  ;;  %v9731_v50 = vld [vmem:[#allocation6 + $0x21c] ss:$120 sps:$4 sm:$0xff]   ;;  %v9726_v51 = vld [vmem:[#allocation6 + $0x210] ss:$120 sps:$4 sm:$0xff]  }
 0x256   :  { %2131 = vmatpush1.bf16.msra.mxu0 %v9636_v52  ;;  %2172 = vmatpush1.bf16.msra.mxu1 %v9639_v54  ;;  %v9729_v52 = vld [vmem:[#allocation6 + $0x218] ss:$120 sps:$4 sm:$0xff]   ;;  %v9734_v54 = vld [vmem:[#allocation6 + $0x304] ss:$120 sps:$4 sm:$0xff]  }
 0x257   :  { %2132 = vmatprep.subr.bf16.mxu0 %v9644_v55  ;;  %2173 = vmatprep.subr.bf16.mxu1 %v9647_v56  ;;  %v9737_v55 = vld [vmem:[#allocation6 + $0x30c] ss:$120 sps:$4 sm:$0xff]   ;;  %v9732_v56 = vld [vmem:[#allocation6 + $0x300] ss:$120 sps:$4 sm:$0xff]  }
 0x25a   :  { %2133 = vmatpush1.bf16.msra.mxu0 %v9642_v57  ;;  %2174 = vmatpush1.bf16.msra.mxu1 %v9645_v58  ;;  %v9735_v57 = vld [vmem:[#allocation6 + $0x308] ss:$120 sps:$4 sm:$0xff]   ;;  %v9740_v58 = vld [vmem:[#allocation6 + $0x3f4] ss:$120 sps:$4 sm:$0xff]  }
 0x25b   :  { %2134 = vmatprep.subr.bf16.mxu0 %v9650_v59  ;;  %2175 = vmatprep.subr.bf16.mxu1 %v9653_v60  ;;  %v9743_v59 = vld [vmem:[#allocation6 + $0x3fc] ss:$120 sps:$4 sm:$0xff]   ;;  %v9738_v60 = vld [vmem:[#allocation6 + $0x3f0] ss:$120 sps:$4 sm:$0xff]  }
 0x25e   :  { %2135 = vmatpush1.bf16.msra.mxu0 %v9648_v61  ;;  %2176 = vmatpush1.bf16.msra.mxu1 %v9651_v62  ;;  %v9741_v61 = vld [vmem:[#allocation6 + $0x3f8] ss:$120 sps:$4 sm:$0xff]   ;;  %v9746_v62 = vld [vmem:[#allocation6 + $0x4e4] ss:$120 sps:$4 sm:$0xff]  }
 0x25f   :  { %2136 = vmatprep.subr.bf16.mxu0 %v9656_v63  ;;  %2177 = vmatprep.subr.bf16.mxu1 %v9659_v0  ;;  %v9749_v63 = vld [vmem:[#allocation6 + $0x4ec] ss:$120 sps:$4 sm:$0xff]   ;;  %v9744_v0 = vld [vmem:[#allocation6 + $0x4e0] ss:$120 sps:$4 sm:$0xff]  }
 0x262   :  { %2137 = vmatpush1.bf16.msra.mxu0 %v9654_v1  ;;  %2178 = vmatpush1.bf16.msra.mxu1 %v9657_v2  ;;  %v9747_v1 = vld [vmem:[#allocation6 + $0x4e8] ss:$120 sps:$4 sm:$0xff]   ;;  %v9752_v2 = vld [vmem:[#allocation6 + $0x5d4] ss:$120 sps:$4 sm:$0xff]  }
 0x263   :  { %2138 = vmatprep.subr.bf16.mxu0 %v9662_v3  ;;  %2179 = vmatprep.subr.bf16.mxu1 %v9665_v4  ;;  %v9755_v3 = vld [vmem:[#allocation6 + $0x5dc] ss:$120 sps:$4 sm:$0xff]   ;;  %v9750_v4 = vld [vmem:[#allocation6 + $0x5d0] ss:$120 sps:$4 sm:$0xff]  }
 0x266   :  { %2139 = vmatpush1.bf16.msra.mxu0 %v9660_v5  ;;  %2180 = vmatpush1.bf16.msra.mxu1 %v9663_v6  ;;  %v9753_v5 = vld [vmem:[#allocation6 + $0x5d8] ss:$120 sps:$4 sm:$0xff]   ;;  %v9758_v6 = vld [vmem:[#allocation6 + $0x6c4] ss:$120 sps:$4 sm:$0xff]  }
 0x267   :  { %2206 = vmatprep.subr.bf16.mxu0 %v9668_v7  ;;  %2247 = vmatprep.subr.bf16.mxu1 %v9671_v8  ;;  %v9761_v7 = vld [vmem:[#allocation6 + $0x6cc] ss:$120 sps:$4 sm:$0xff]   ;;  %v9756_v8 = vld [vmem:[#allocation6 + $0x6c0] ss:$120 sps:$4 sm:$0xff]  }
 0x269   :  { %2157 = vmatmul.mubr.bf16.vlgmr.msra.gmra.mrb[20].mxu0 %v10760_v41  ;;  %2198 = vmatmul.mubr.bf16.vlgmr.msra.gmra.mrb[8].mxu1 %v10760_v41 }
 0x26a   :  { %2207 = vmatpush1.bf16.msra.mxu0 %v9666_v9  ;;  %2248 = vmatpush1.bf16.msra.mxu1 %v9669_v11  ;;  %v9759_v9 = vld [vmem:[#allocation6 + $0x6c8] ss:$120 sps:$4 sm:$0xff]   ;;  %v9764_v11 = vld [vmem:[#allocation6 + $0x44] ss:$120 sps:$4 sm:$0xff]  }
 0x26b   :  { %2208 = vmatprep.subr.bf16.mxu0 %v9674_v12  ;;  %2249 = vmatprep.subr.bf16.mxu1 %v9677_v13  ;;  %v9767_v12 = vld [vmem:[#allocation6 + $0x4c] ss:$120 sps:$4 sm:$0xff]   ;;  %v9762_v13 = vld [vmem:[#allocation6 + $0x40] ss:$120 sps:$4 sm:$0xff]  }
 0x26c   :  { %2238 = vmatprep.mubr.bf16.mxu0 %v10600_v30  ;;  %2279 = vmatprep.mubr.bf16.mxu1 %v10600_v30 }
 0x26e   :  { %2209 = vmatpush1.bf16.msra.mxu0 %v9672_v14  ;;  %2250 = vmatpush1.bf16.msra.mxu1 %v9675_v15  ;;  %v9765_v14 = vld [vmem:[#allocation6 + $0x48] ss:$120 sps:$4 sm:$0xff]   ;;  %v9770_v15 = vld [vmem:[#allocation6 + $0x134] ss:$120 sps:$4 sm:$0xff]  }
 0x26f   :  { %2210 = vmatprep.subr.bf16.mxu0 %v9680_v16  ;;  %2251 = vmatprep.subr.bf16.mxu1 %v9683_v10  ;;  %v9773_v16 = vld [vmem:[#allocation6 + $0x13c] ss:$120 sps:$4 sm:$0xff]   ;;  %v9768_v10 = vld [vmem:[#allocation6 + $0x130] ss:$120 sps:$4 sm:$0xff]  }
 0x272   :  { %2211 = vmatpush1.bf16.msra.mxu0 %v9678_v17  ;;  %2252 = vmatpush1.bf16.msra.mxu1 %v9681_v18  ;;  %v9771_v17 = vld [vmem:[#allocation6 + $0x138] ss:$120 sps:$4 sm:$0xff]   ;;  %v9776_v18 = vld [vmem:[#allocation6 + $0x224] ss:$120 sps:$4 sm:$0xff]  }
 0x273   :  { %2212 = vmatprep.subr.bf16.mxu0 %v9686_v19  ;;  %2253 = vmatprep.subr.bf16.mxu1 %v9689_v20  ;;  %v9779_v19 = vld [vmem:[#allocation6 + $0x22c] ss:$120 sps:$4 sm:$0xff]   ;;  %v9774_v20 = vld [vmem:[#allocation6 + $0x220] ss:$120 sps:$4 sm:$0xff]  }
 0x276   :  { %2213 = vmatpush1.bf16.msra.mxu0 %v9684_v21  ;;  %2254 = vmatpush1.bf16.msra.mxu1 %v9687_v22  ;;  %v9777_v21 = vld [vmem:[#allocation6 + $0x228] ss:$120 sps:$4 sm:$0xff]   ;;  %v9782_v22 = vld [vmem:[#allocation6 + $0x314] ss:$120 sps:$4 sm:$0xff]  }
 0x277   :  { %2214 = vmatprep.subr.bf16.mxu0 %v9692_v23  ;;  %2255 = vmatprep.subr.bf16.mxu1 %v9695_v24  ;;  %v9785_v23 = vld [vmem:[#allocation6 + $0x31c] ss:$120 sps:$4 sm:$0xff]   ;;  %v9780_v24 = vld [vmem:[#allocation6 + $0x310] ss:$120 sps:$4 sm:$0xff]  }
 0x27a   :  { %2215 = vmatpush1.bf16.msra.mxu0 %v9690_v25  ;;  %2256 = vmatpush1.bf16.msra.mxu1 %v9693_v26  ;;  %v9783_v25 = vld [vmem:[#allocation6 + $0x318] ss:$120 sps:$4 sm:$0xff]   ;;  %v9788_v26 = vld [vmem:[#allocation6 + $0x404] ss:$120 sps:$4 sm:$0xff]  }
 0x27b   :  { %2216 = vmatprep.subr.bf16.mxu0 %v9698_v27  ;;  %2257 = vmatprep.subr.bf16.mxu1 %v9701_v28  ;;  %v9791_v27 = vld [vmem:[#allocation6 + $0x40c] ss:$120 sps:$4 sm:$0xff]   ;;  %v9786_v28 = vld [vmem:[#allocation6 + $0x400] ss:$120 sps:$4 sm:$0xff]  }
 0x27e   :  { %2217 = vmatpush1.bf16.msra.mxu0 %v9696_v29  ;;  %2258 = vmatpush1.bf16.msra.mxu1 %v9699_v31  ;;  %v9789_v29 = vld [vmem:[#allocation6 + $0x408] ss:$120 sps:$4 sm:$0xff]   ;;  %v9794_v31 = vld [vmem:[#allocation6 + $0x4f4] ss:$120 sps:$4 sm:$0xff]  }
 0x27f   :  { %2218 = vmatprep.subr.bf16.mxu0 %v9704_v32  ;;  %2259 = vmatprep.subr.bf16.mxu1 %v9707_v33  ;;  %v9797_v32 = vld [vmem:[#allocation6 + $0x4fc] ss:$120 sps:$4 sm:$0xff]   ;;  %v9792_v33 = vld [vmem:[#allocation6 + $0x4f0] ss:$120 sps:$4 sm:$0xff]  }
 0x282   :  { %2219 = vmatpush1.bf16.msra.mxu0 %v9702_v34  ;;  %2260 = vmatpush1.bf16.msra.mxu1 %v9705_v35  ;;  %v9795_v34 = vld [vmem:[#allocation6 + $0x4f8] ss:$120 sps:$4 sm:$0xff]   ;;  %v9800_v35 = vld [vmem:[#allocation6 + $0x5e4] ss:$120 sps:$4 sm:$0xff]  }
 0x283   :  { %2220 = vmatprep.subr.bf16.mxu0 %v9710_v36  ;;  %2261 = vmatprep.subr.bf16.mxu1 %v9713_v37  ;;  %v9803_v36 = vld [vmem:[#allocation6 + $0x5ec] ss:$120 sps:$4 sm:$0xff]   ;;  %v9798_v37 = vld [vmem:[#allocation6 + $0x5e0] ss:$120 sps:$4 sm:$0xff]  }
 0x286   :  { %2221 = vmatpush1.bf16.msra.mxu0 %v9708_v38  ;;  %2262 = vmatpush1.bf16.msra.mxu1 %v9711_v39  ;;  %v9801_v38 = vld [vmem:[#allocation6 + $0x5e8] ss:$120 sps:$4 sm:$0xff]   ;;  %v9806_v39 = vld [vmem:[#allocation6 + $0x6d4] ss:$120 sps:$4 sm:$0xff]  }
 0x287   :  { %2288 = vmatprep.subr.bf16.mxu0 %v9716_v40  ;;  %2329 = vmatprep.subr.bf16.mxu1 %v9719_v42  ;;  %v9809_v40 = vld [vmem:[#allocation6 + $0x6dc] ss:$120 sps:$4 sm:$0xff]   ;;  %v9804_v42 = vld [vmem:[#allocation6 + $0x6d0] ss:$120 sps:$4 sm:$0xff]  }
 0x289   :  { %2239 = vmatmul.mubr.bf16.vlgmr.msra.gmra.mrb[24].mxu0 %v10760_v41  ;;  %2280 = vmatmul.mubr.bf16.vlgmr.msra.gmra.mrb[12].mxu1 %v10760_v41 }
 0x28a   :  { %2289 = vmatpush1.bf16.msra.mxu0 %v9714_v43  ;;  %2330 = vmatpush1.bf16.msra.mxu1 %v9717_v44  ;;  %v9807_v43 = vld [vmem:[#allocation6 + $0x6d8] ss:$120 sps:$4 sm:$0xff]   ;;  %v9812_v44 = vld [vmem:[#allocation6 + $0x54] ss:$120 sps:$4 sm:$0xff]  }
 0x28b   :  { %2290 = vmatprep.subr.bf16.mxu0 %v9722_v45  ;;  %2331 = vmatprep.subr.bf16.mxu1 %v9725_v46  ;;  %v9815_v45 = vld [vmem:[#allocation6 + $0x5c] ss:$120 sps:$4 sm:$0xff]   ;;  %v9810_v46 = vld [vmem:[#allocation6 + $0x50] ss:$120 sps:$4 sm:$0xff]  }
 0x28c   :  { %2320 = vmatprep.mubr.bf16.mxu0 %v10600_v30  ;;  %2361 = vmatprep.mubr.bf16.mxu1 %v10600_v30 }
 0x28e   :  { %2291 = vmatpush1.bf16.msra.mxu0 %v9720_v47  ;;  %2332 = vmatpush1.bf16.msra.mxu1 %v9723_v48  ;;  %v9813_v47 = vld [vmem:[#allocation6 + $0x58] ss:$120 sps:$4 sm:$0xff]   ;;  %v9818_v48 = vld [vmem:[#allocation6 + $0x144] ss:$120 sps:$4 sm:$0xff]  }
 0x28f   :  { %2292 = vmatprep.subr.bf16.mxu0 %v9728_v49  ;;  %2333 = vmatprep.subr.bf16.mxu1 %v9731_v50  ;;  %v9821_v49 = vld [vmem:[#allocation6 + $0x14c] ss:$120 sps:$4 sm:$0xff]   ;;  %v9816_v50 = vld [vmem:[#allocation6 + $0x140] ss:$120 sps:$4 sm:$0xff]  }
 0x292   :  { %2293 = vmatpush1.bf16.msra.mxu0 %v9726_v51  ;;  %2334 = vmatpush1.bf16.msra.mxu1 %v9729_v52  ;;  %v9819_v51 = vld [vmem:[#allocation6 + $0x148] ss:$120 sps:$4 sm:$0xff]   ;;  %v9824_v52 = vld [vmem:[#allocation6 + $0x234] ss:$120 sps:$4 sm:$0xff]  }
 0x293   :  { %2294 = vmatprep.subr.bf16.mxu0 %v9734_v54  ;;  %2335 = vmatprep.subr.bf16.mxu1 %v9737_v55  ;;  %v9827_v54 = vld [vmem:[#allocation6 + $0x23c] ss:$120 sps:$4 sm:$0xff]   ;;  %v9822_v55 = vld [vmem:[#allocation6 + $0x230] ss:$120 sps:$4 sm:$0xff]  }
 0x296   :  { %2295 = vmatpush1.bf16.msra.mxu0 %v9732_v56  ;;  %2336 = vmatpush1.bf16.msra.mxu1 %v9735_v57  ;;  %v9825_v56 = vld [vmem:[#allocation6 + $0x238] ss:$120 sps:$4 sm:$0xff]   ;;  %v9830_v57 = vld [vmem:[#allocation6 + $0x324] ss:$120 sps:$4 sm:$0xff]  }
 0x297   :  { %2296 = vmatprep.subr.bf16.mxu0 %v9740_v58  ;;  %2337 = vmatprep.subr.bf16.mxu1 %v9743_v59  ;;  %v9833_v58 = vld [vmem:[#allocation6 + $0x32c] ss:$120 sps:$4 sm:$0xff]   ;;  %v9828_v59 = vld [vmem:[#allocation6 + $0x320] ss:$120 sps:$4 sm:$0xff]  }
 0x29a   :  { %2297 = vmatpush1.bf16.msra.mxu0 %v9738_v60  ;;  %2338 = vmatpush1.bf16.msra.mxu1 %v9741_v61  ;;  %v9831_v60 = vld [vmem:[#allocation6 + $0x328] ss:$120 sps:$4 sm:$0xff]   ;;  %v9836_v61 = vld [vmem:[#allocation6 + $0x414] ss:$120 sps:$4 sm:$0xff]  }
 0x29b   :  { %2298 = vmatprep.subr.bf16.mxu0 %v9746_v62  ;;  %2339 = vmatprep.subr.bf16.mxu1 %v9749_v63  ;;  %v9839_v62 = vld [vmem:[#allocation6 + $0x41c] ss:$120 sps:$4 sm:$0xff]   ;;  %v9834_v63 = vld [vmem:[#allocation6 + $0x410] ss:$120 sps:$4 sm:$0xff]  }
 0x29e   :  { %2299 = vmatpush1.bf16.msra.mxu0 %v9744_v0  ;;  %2340 = vmatpush1.bf16.msra.mxu1 %v9747_v1  ;;  %v9837_v0 = vld [vmem:[#allocation6 + $0x418] ss:$120 sps:$4 sm:$0xff]   ;;  %v9842_v1 = vld [vmem:[#allocation6 + $0x504] ss:$120 sps:$4 sm:$0xff]  }
 0x29f   :  { %2300 = vmatprep.subr.bf16.mxu0 %v9752_v2  ;;  %2341 = vmatprep.subr.bf16.mxu1 %v9755_v3  ;;  %v9845_v2 = vld [vmem:[#allocation6 + $0x50c] ss:$120 sps:$4 sm:$0xff]   ;;  %v9840_v3 = vld [vmem:[#allocation6 + $0x500] ss:$120 sps:$4 sm:$0xff]  }
 0x2a2   :  { %2301 = vmatpush1.bf16.msra.mxu0 %v9750_v4  ;;  %2342 = vmatpush1.bf16.msra.mxu1 %v9753_v5  ;;  %v9843_v4 = vld [vmem:[#allocation6 + $0x508] ss:$120 sps:$4 sm:$0xff]   ;;  %v9848_v5 = vld [vmem:[#allocation6 + $0x5f4] ss:$120 sps:$4 sm:$0xff]  }
 0x2a3   :  { %2302 = vmatprep.subr.bf16.mxu0 %v9758_v6  ;;  %2343 = vmatprep.subr.bf16.mxu1 %v9761_v7  ;;  %v9851_v6 = vld [vmem:[#allocation6 + $0x5fc] ss:$120 sps:$4 sm:$0xff]   ;;  %v9846_v7 = vld [vmem:[#allocation6 + $0x5f0] ss:$120 sps:$4 sm:$0xff]  }
 0x2a6   :  { %2303 = vmatpush1.bf16.msra.mxu0 %v9756_v8  ;;  %2344 = vmatpush1.bf16.msra.mxu1 %v9759_v9  ;;  %v9849_v8 = vld [vmem:[#allocation6 + $0x5f8] ss:$120 sps:$4 sm:$0xff]   ;;  %v9854_v9 = vld [vmem:[#allocation6 + $0x6e4] ss:$120 sps:$4 sm:$0xff]  }
 0x2a7   :  { %2370 = vmatprep.subr.bf16.mxu0 %v9764_v11  ;;  %2411 = vmatprep.subr.bf16.mxu1 %v9767_v12  ;;  %v9857_v11 = vld [vmem:[#allocation6 + $0x6ec] ss:$120 sps:$4 sm:$0xff]   ;;  %v9852_v12 = vld [vmem:[#allocation6 + $0x6e0] ss:$120 sps:$4 sm:$0xff]  }
 0x2a9   :  { %2321 = vmatmul.mubr.bf16.vlgmr.msra.gmra.mrb[28].mxu0 %v10760_v41  ;;  %2362 = vmatmul.mubr.bf16.vlgmr.msra.gmra.mrb[16].mxu1 %v10760_v41 }
 0x2aa   :  { %2371 = vmatpush1.bf16.msra.mxu0 %v9762_v13  ;;  %2412 = vmatpush1.bf16.msra.mxu1 %v9765_v14  ;;  %v9855_v13 = vld [vmem:[#allocation6 + $0x6e8] ss:$120 sps:$4 sm:$0xff]   ;;  %v9860_v14 = vld [vmem:[#allocation6 + $0x64] ss:$120 sps:$4 sm:$0xff]  }
 0x2ab   :  { %2372 = vmatprep.subr.bf16.mxu0 %v9770_v15  ;;  %2413 = vmatprep.subr.bf16.mxu1 %v9773_v16  ;;  %v9863_v15 = vld [vmem:[#allocation6 + $0x6c] ss:$120 sps:$4 sm:$0xff]   ;;  %v9858_v16 = vld [vmem:[#allocation6 + $0x60] ss:$120 sps:$4 sm:$0xff]  }
 0x2ac   :  { %2402 = vmatprep.mubr.bf16.mxu0 %v10600_v30  ;;  %2443 = vmatprep.mubr.bf16.mxu1 %v10600_v30 }
 0x2ae   :  { %2373 = vmatpush1.bf16.msra.mxu0 %v9768_v10  ;;  %2414 = vmatpush1.bf16.msra.mxu1 %v9771_v17  ;;  %v9861_v10 = vld [vmem:[#allocation6 + $0x68] ss:$120 sps:$4 sm:$0xff]   ;;  %v9866_v17 = vld [vmem:[#allocation6 + $0x154] ss:$120 sps:$4 sm:$0xff]  }
 0x2af   :  { %2374 = vmatprep.subr.bf16.mxu0 %v9776_v18  ;;  %2415 = vmatprep.subr.bf16.mxu1 %v9779_v19  ;;  %v9869_v18 = vld [vmem:[#allocation6 + $0x15c] ss:$120 sps:$4 sm:$0xff]   ;;  %v9864_v19 = vld [vmem:[#allocation6 + $0x150] ss:$120 sps:$4 sm:$0xff]  }
 0x2b2   :  { %2375 = vmatpush1.bf16.msra.mxu0 %v9774_v20  ;;  %2416 = vmatpush1.bf16.msra.mxu1 %v9777_v21  ;;  %v9867_v20 = vld [vmem:[#allocation6 + $0x158] ss:$120 sps:$4 sm:$0xff]   ;;  %v9872_v21 = vld [vmem:[#allocation6 + $0x244] ss:$120 sps:$4 sm:$0xff]  }
 0x2b3   :  { %2376 = vmatprep.subr.bf16.mxu0 %v9782_v22  ;;  %2417 = vmatprep.subr.bf16.mxu1 %v9785_v23  ;;  %v9875_v22 = vld [vmem:[#allocation6 + $0x24c] ss:$120 sps:$4 sm:$0xff]   ;;  %v9870_v23 = vld [vmem:[#allocation6 + $0x240] ss:$120 sps:$4 sm:$0xff]  }
 0x2b6   :  { %2377 = vmatpush1.bf16.msra.mxu0 %v9780_v24  ;;  %2418 = vmatpush1.bf16.msra.mxu1 %v9783_v25  ;;  %v9873_v24 = vld [vmem:[#allocation6 + $0x248] ss:$120 sps:$4 sm:$0xff]   ;;  %v9878_v25 = vld [vmem:[#allocation6 + $0x334] ss:$120 sps:$4 sm:$0xff]  }
 0x2b7   :  { %2378 = vmatprep.subr.bf16.mxu0 %v9788_v26  ;;  %2419 = vmatprep.subr.bf16.mxu1 %v9791_v27  ;;  %v9881_v26 = vld [vmem:[#allocation6 + $0x33c] ss:$120 sps:$4 sm:$0xff]   ;;  %v9876_v27 = vld [vmem:[#allocation6 + $0x330] ss:$120 sps:$4 sm:$0xff]  }
 0x2ba   :  { %2379 = vmatpush1.bf16.msra.mxu0 %v9786_v28  ;;  %2420 = vmatpush1.bf16.msra.mxu1 %v9789_v29  ;;  %v9879_v28 = vld [vmem:[#allocation6 + $0x338] ss:$120 sps:$4 sm:$0xff]   ;;  %v9884_v29 = vld [vmem:[#allocation6 + $0x424] ss:$120 sps:$4 sm:$0xff]  }
 0x2bb   :  { %2380 = vmatprep.subr.bf16.mxu0 %v9794_v31  ;;  %2421 = vmatprep.subr.bf16.mxu1 %v9797_v32  ;;  %v9887_v31 = vld [vmem:[#allocation6 + $0x42c] ss:$120 sps:$4 sm:$0xff]   ;;  %v9882_v32 = vld [vmem:[#allocation6 + $0x420] ss:$120 sps:$4 sm:$0xff]  }
 0x2be   :  { %2381 = vmatpush1.bf16.msra.mxu0 %v9792_v33  ;;  %2422 = vmatpush1.bf16.msra.mxu1 %v9795_v34  ;;  %v9885_v33 = vld [vmem:[#allocation6 + $0x428] ss:$120 sps:$4 sm:$0xff]   ;;  %v9890_v34 = vld [vmem:[#allocation6 + $0x514] ss:$120 sps:$4 sm:$0xff]  }
 0x2bf   :  { %2382 = vmatprep.subr.bf16.mxu0 %v9800_v35  ;;  %2423 = vmatprep.subr.bf16.mxu1 %v9803_v36  ;;  %v9893_v35 = vld [vmem:[#allocation6 + $0x51c] ss:$120 sps:$4 sm:$0xff]   ;;  %v9888_v36 = vld [vmem:[#allocation6 + $0x510] ss:$120 sps:$4 sm:$0xff]  }
 0x2c2   :  { %2383 = vmatpush1.bf16.msra.mxu0 %v9798_v37  ;;  %2424 = vmatpush1.bf16.msra.mxu1 %v9801_v38  ;;  %v9891_v37 = vld [vmem:[#allocation6 + $0x518] ss:$120 sps:$4 sm:$0xff]   ;;  %v9896_v38 = vld [vmem:[#allocation6 + $0x604] ss:$120 sps:$4 sm:$0xff]  }
 0x2c3   :  { %2384 = vmatprep.subr.bf16.mxu0 %v9806_v39  ;;  %2425 = vmatprep.subr.bf16.mxu1 %v9809_v40  ;;  %v9899_v39 = vld [vmem:[#allocation6 + $0x60c] ss:$120 sps:$4 sm:$0xff]   ;;  %v9894_v40 = vld [vmem:[#allocation6 + $0x600] ss:$120 sps:$4 sm:$0xff]  }
 0x2c6   :  { %2385 = vmatpush1.bf16.msra.mxu0 %v9804_v42  ;;  %2426 = vmatpush1.bf16.msra.mxu1 %v9807_v43  ;;  %v9897_v42 = vld [vmem:[#allocation6 + $0x608] ss:$120 sps:$4 sm:$0xff]   ;;  %v9902_v43 = vld [vmem:[#allocation6 + $0x6f4] ss:$120 sps:$4 sm:$0xff]  }
 0x2c7   :  { %2452 = vmatprep.subr.bf16.mxu0 %v9812_v44  ;;  %2493 = vmatprep.subr.bf16.mxu1 %v9815_v45  ;;  %v9905_v44 = vld [vmem:[#allocation6 + $0x6fc] ss:$120 sps:$4 sm:$0xff]   ;;  %v9900_v45 = vld [vmem:[#allocation6 + $0x6f0] ss:$120 sps:$4 sm:$0xff]  }
 0x2c9   :  { %2403 = vmatmul.mubr.bf16.vlgmr.msra.gmra.mrb[32].mxu0 %v10760_v41  ;;  %2444 = vmatmul.mubr.bf16.vlgmr.msra.gmra.mrb[20].mxu1 %v10760_v41 }
 0x2ca   :  { %2453 = vmatpush1.bf16.msra.mxu0 %v9810_v46  ;;  %2494 = vmatpush1.bf16.msra.mxu1 %v9813_v47  ;;  %v9903_v46 = vld [vmem:[#allocation6 + $0x6f8] ss:$120 sps:$4 sm:$0xff]   ;;  %v9908_v47 = vld [vmem:[#allocation6 + $0x74] ss:$120 sps:$4 sm:$0xff]  }
 0x2cb   :  { %2454 = vmatprep.subr.bf16.mxu0 %v9818_v48  ;;  %2495 = vmatprep.subr.bf16.mxu1 %v9821_v49  ;;  %v9912_v48 = vld [vmem:[#allocation9 + $0x40] sm:$0xff]   ;;  %v9906_v49 = vld [vmem:[#allocation6 + $0x70] ss:$120 sps:$4 sm:$0xff]  }
 0x2cc   :  { %2484 = vmatprep.mubr.bf16.mxu0 %v10600_v30  ;;  %2525 = vmatprep.mubr.bf16.mxu1 %v10600_v30 }
 0x2ce   :  { %2455 = vmatpush1.bf16.msra.mxu0 %v9816_v50  ;;  %2496 = vmatpush1.bf16.msra.mxu1 %v9819_v51  ;;  %v9913_v50 = vld [vmem:[#allocation9] sm:$0xff]  }
 0x2cf   :  { %2456 = vmatprep.subr.bf16.mxu0 %v9824_v52  ;;  %2497 = vmatprep.subr.bf16.mxu1 %v9827_v54  ;;  %v9911_v51 = vld [vmem:[#allocation6 + $0x164] ss:$120 sps:$4 sm:$0xff]   ;;  %v9909_v54 = vld [vmem:[#allocation6 + $0x160] ss:$120 sps:$4 sm:$0xff]  }
 0x2d0   :  { %v9917_v52 = vld [vmem:[#allocation9 + $0x48] sm:$0xff]  }
 0x2d2   :  { %2457 = vmatpush1.bf16.msra.mxu0 %v9822_v55  ;;  %2498 = vmatpush1.bf16.msra.mxu1 %v9825_v56  ;;  %v9918_v55 = vld [vmem:[#allocation9 + $0x8] sm:$0xff]  }
 0x2d3   :  { %2458 = vmatprep.subr.bf16.mxu0 %v9830_v57  ;;  %2499 = vmatprep.subr.bf16.mxu1 %v9833_v58  ;;  %v9916_v56 = vld [vmem:[#allocation6 + $0x254] ss:$120 sps:$4 sm:$0xff]   ;;  %v9914_v58 = vld [vmem:[#allocation6 + $0x250] ss:$120 sps:$4 sm:$0xff]  }
 0x2d4   :  { %v9922_v57 = vld [vmem:[#allocation9 + $0x50] sm:$0xff]  }
 0x2d6   :  { %2459 = vmatpush1.bf16.msra.mxu0 %v9828_v59  ;;  %2500 = vmatpush1.bf16.msra.mxu1 %v9831_v60  ;;  %v9923_v59 = vld [vmem:[#allocation9 + $0x10] sm:$0xff]   ;;  %v9921_v60 = vld [vmem:[#allocation6 + $0x344] ss:$120 sps:$4 sm:$0xff]  }
 0x2d7   :  { %2460 = vmatprep.subr.bf16.mxu0 %v9836_v61  ;;  %2501 = vmatprep.subr.bf16.mxu1 %v9839_v62  ;;  %v9927_v61 = vld [vmem:[#allocation9 + $0x58] sm:$0xff]  }
 0x2d8   :  { %v9919_v62 = vld [vmem:[#allocation6 + $0x340] ss:$120 sps:$4 sm:$0xff]  }
 0x2da   :  { %2461 = vmatpush1.bf16.msra.mxu0 %v9834_v63  ;;  %2502 = vmatpush1.bf16.msra.mxu1 %v9837_v0  ;;  %v9928_v63 = vld [vmem:[#allocation9 + $0x18] sm:$0xff]  }
 0x2db   :  { %2462 = vmatprep.subr.bf16.mxu0 %v9842_v1  ;;  %2503 = vmatprep.subr.bf16.mxu1 %v9845_v2  ;;  %v9926_v0 = vld [vmem:[#allocation6 + $0x434] ss:$120 sps:$4 sm:$0xff]   ;;  %v9932_v1 = vld [vmem:[#allocation9 + $0x60] sm:$0xff]   ;;  %v10790_v2 = vsub.s32 0, %v10741_v53 }
 0x2de   :  { %2463 = vmatpush1.bf16.msra.mxu0 %v9840_v3  ;;  %2504 = vmatpush1.bf16.msra.mxu1 %v9843_v4  ;;  %v10792_v3 = vld [vmem:[#allocation8] sm:$0xff]  ;;  %v10795_v4 = vsub.s32 1, %v10741_v53 }
 0x2df   :  { %2464 = vmatprep.subr.bf16.mxu0 %v9848_v5  ;;  %2505 = vmatprep.subr.bf16.mxu1 %v9851_v6  ;;  %v10798_v5 = vsub.s32 3, %v10741_v53  ;;  %v9933_v6 = vld [vmem:[#allocation9 + $0x20] sm:$0xff]  }
 0x2e2   :  { %2465 = vmatpush1.bf16.msra.mxu0 %v9846_v7  ;;  %2506 = vmatpush1.bf16.msra.mxu1 %v9849_v8  ;;  %v9931_v7 = vld [vmem:[#allocation6 + $0x524] ss:$120 sps:$4 sm:$0xff]  }
 0x2e3   :  { %2466 = vmatprep.subr.bf16.mxu0 %v9854_v9  ;;  %2507 = vmatprep.subr.bf16.mxu1 %v9857_v11  ;;  %v9937_v8 = vld [vmem:[#allocation9 + $0x68] sm:$0xff]   ;;  %v695_v9 = vrot.slane %v10792_v3, %v10790_v2  ;;  %v9929_v11 = vld [vmem:[#allocation6 + $0x520] ss:$120 sps:$4 sm:$0xff]  }
 0x2e6   :  { %2467 = vmatpush1.bf16.msra.mxu0 %v9852_v12  ;;  %2508 = vmatpush1.bf16.msra.mxu1 %v9855_v13  ;;  %v699_v12 = vrot.slane %v10792_v3, %v10795_v4  ;;  %v707_v13 = vrot.slane %v10792_v3, %v10798_v5 }
 0x2e7   :  { %2534 = vmatprep.subr.bf16.mxu0 %v9860_v14  ;;  %2575 = vmatprep.subr.bf16.mxu1 %v9863_v15  ;;  %v9938_v14 = vld [vmem:[#allocation9 + $0x28] sm:$0xff]  }
 0x2e8   :  { %v9936_v15 = vld [vmem:[#allocation6 + $0x614] ss:$120 sps:$4 sm:$0xff]  }
 0x2e9   :  { %2485 = vmatmul.mubr.bf16.vlgmr.msra.gmra.mrb[36].mxu0 %v10760_v41  ;;  %2526 = vmatmul.mubr.bf16.vlgmr.msra.gmra.mrb[24].mxu1 %v10760_v41 }
 0x2ea   :  { %2535 = vmatpush1.bf16.msra.mxu0 %v9858_v16  ;;  %2576 = vmatpush1.bf16.msra.mxu1 %v9861_v10  ;;  %v9942_v16 = vld [vmem:[#allocation9 + $0x70] sm:$0xff]  }
 0x2eb   :  { %2536 = vmatprep.subr.bf16.mxu0 %v9866_v17  ;;  %2577 = vmatprep.subr.bf16.mxu1 %v9869_v18 }
 0x2ec   :  { %2566 = vmatprep.mubr.bf16.mxu0 %v10600_v30  ;;  %2607 = vmatprep.mubr.bf16.mxu1 %v10600_v30 }
 0x2ee   :  { %2537 = vmatpush1.bf16.msra.mxu0 %v9864_v19  ;;  %2578 = vmatpush1.bf16.msra.mxu1 %v9867_v20 }
 0x2ef   :  { %2538 = vmatprep.subr.bf16.mxu0 %v9872_v21  ;;  %2579 = vmatprep.subr.bf16.mxu1 %v9875_v22 }
 0x2f2   :  { %2539 = vmatpush1.bf16.msra.mxu0 %v9870_v23  ;;  %2580 = vmatpush1.bf16.msra.mxu1 %v9873_v24 }
 0x2f3   :  { %2540 = vmatprep.subr.bf16.mxu0 %v9878_v25  ;;  %2581 = vmatprep.subr.bf16.mxu1 %v9881_v26  ;;  %v9934_v25 = vld [vmem:[#allocation6 + $0x610] ss:$120 sps:$4 sm:$0xff]  }
 0x2f4   :  { %v9943_v26 = vld [vmem:[#allocation9 + $0x30] sm:$0xff]  }
 0x2f6   :  { %2541 = vmatpush1.bf16.msra.mxu0 %v9876_v27  ;;  %2582 = vmatpush1.bf16.msra.mxu1 %v9879_v28 }
 0x2f7   :  { %2542 = vmatprep.subr.bf16.mxu0 %v9884_v29  ;;  %2583 = vmatprep.subr.bf16.mxu1 %v9887_v31  ;;  %v9941_v31 = vld [vmem:[#allocation6 + $0x704] ss:$120 sps:$4 sm:$0xff]  }
 0x2fa   :  { %2543 = vmatpush1.bf16.msra.mxu0 %v9882_v32  ;;  %2584 = vmatpush1.bf16.msra.mxu1 %v9885_v33  ;;  %v9944_v32 = vld [vmem:[#allocation9 + $0x78] sm:$0xff]  }
 0x2fb   :  { %2544 = vmatprep.subr.bf16.mxu0 %v9890_v34  ;;  %2585 = vmatprep.subr.bf16.mxu1 %v9893_v35 }
 0x2fe   :  { %2545 = vmatpush1.bf16.msra.mxu0 %v9888_v36  ;;  %2586 = vmatpush1.bf16.msra.mxu1 %v9891_v37 }
 0x2ff   :  { %2546 = vmatprep.subr.bf16.mxu0 %v9896_v38  ;;  %2587 = vmatprep.subr.bf16.mxu1 %v9899_v39  ;;  %v9939_v38 = vld [vmem:[#allocation6 + $0x700] ss:$120 sps:$4 sm:$0xff]  }
 0x300   :  { %v9946_v39 = vld [vmem:[#allocation9 + $0x38] sm:$0xff]  }
 0x302   :  { %2547 = vmatpush1.bf16.msra.mxu0 %v9894_v40  ;;  %2588 = vmatpush1.bf16.msra.mxu1 %v9897_v42  ;;  %v9945_v42 = vld [vmem:[#allocation9 + $0xc0] sm:$0xff]  }
 0x303   :  { %2548 = vmatprep.subr.bf16.mxu0 %v9902_v43  ;;  %2589 = vmatprep.subr.bf16.mxu1 %v9905_v44  ;;  %v9949_v43 = vld [vmem:[#allocation9 + $0x140] sm:$0xff]  }
 0x306   :  { %2549 = vmatpush1.bf16.msra.mxu0 %v9900_v45  ;;  %2590 = vmatpush1.bf16.msra.mxu1 %v9903_v46 }
 0x307   :  { %2616 = vmatprep.subr.bf16.mxu0 %v9908_v47  ;;  %8840 = vmatprep.subr.bf16.mxu1 %v9912_v48 }
 0x309   :  { %2567 = vmatmul.mubr.bf16.vlgmr.msra.gmra.mrb[40].mxu0 %v10760_v41  ;;  %2608 = vmatmul.mubr.bf16.vlgmr.msra.gmra.mrb[28].mxu1 %v10760_v41 }
 0x30a   :  { %2617 = vmatpush1.bf16.msra.mxu0 %v9906_v49  ;;  %8841 = vmatpush3.bf16.msra.mxu1 %v9913_v50  ;;  %v9947_v49 = vld [vmem:[#allocation9 + $0x80] sm:$0xff]  }
 0x30b   :  { %2618 = vmatprep.subr.bf16.mxu0 %v9911_v51  ;;  %8842 = vmatprep.subr.bf16.mxu1 %v9917_v52  ;;  %v10811_v51 = vsub.s32 2, %v10741_v53  ;;  %v9948_v52 = vld [vmem:[#allocation9 + $0xc8] sm:$0xff]  }
 0x30c   :  { %2648 = vmatprep.mubr.bf16.mxu0 %v10600_v30  ;;  %v9924_v30 = vld [vmem:[#allocation6 + $0x430] ss:$120 sps:$4 sm:$0xff]  }
 0x30e   :  { %2619 = vmatpush1.bf16.msra.mxu0 %v9909_v54  ;;  %8843 = vmatpush3.bf16.msra.mxu1 %v9918_v55 }
 0x30f   :  { %2620 = vmatprep.subr.bf16.mxu0 %v9916_v56  ;;  %8844 = vmatprep.subr.bf16.mxu1 %v9922_v57 }
 0x312   :  { %2621 = vmatpush1.bf16.msra.mxu0 %v9914_v58  ;;  %8845 = vmatpush3.bf16.msra.mxu1 %v9923_v59  ;;  %v9950_v58 = vld [vmem:[#allocation9 + $0x88] sm:$0xff]   ;;  %v9951_v59 = vld [vmem:[#allocation9 + $0x100] sm:$0xff]  }
 0x313   :  { %2622 = vmatprep.subr.bf16.mxu0 %v9921_v60  ;;  %8846 = vmatprep.subr.bf16.mxu1 %v9927_v61  ;;  %v703_v61 = vrot.slane %v10792_v3, %v10811_v51 }
 0x316   :  { %2623 = vmatpush1.bf16.msra.mxu0 %v9919_v62  ;;  %8847 = vmatpush3.bf16.msra.mxu1 %v9928_v63  ;;  %v9953_v62 = vld [vmem:[#allocation9 + $0x148] sm:$0xff]   ;;  %v9954_v63 = vld [vmem:[#allocation9 + $0x90] sm:$0xff]  }
 0x317   :  { %2624 = vmatprep.subr.bf16.mxu0 %v9926_v0  ;;  %8848 = vmatprep.subr.bf16.mxu1 %v9932_v1  ;;  %v9955_v0 = vld [vmem:[#allocation9 + $0x108] sm:$0xff]  }
 0x31a   :  { %2625 = vmatpush1.bf16.msra.mxu0 %v9924_v30  ;;  %8849 = vmatpush3.bf16.msra.mxu1 %v9933_v6  ;;  %v9956_v30 = vld [vmem:[#allocation9 + $0xd8] sm:$0xff]   ;;  %v9957_v6 = vld [vmem:[#allocation9 + $0x150] sm:$0xff]  }
 0x31b   :  { %2626 = vmatprep.subr.bf16.mxu0 %v9931_v7  ;;  %8850 = vmatprep.subr.bf16.mxu1 %v9937_v8  ;;  %v9958_v7 = vld [vmem:[#allocation9 + $0x98] sm:$0xff]   ;;  %v9959_v8 = vld [vmem:[#allocation9 + $0x110] sm:$0xff]  }
 0x31c   :  { %v2076_v10 = vpop.f32.mrb[16].mxu0  ;;  %v10806_v17 = vpop.f32.mrb[4].mxu1 }
 0x31d   :  { %v2077_v18 = vadd.f32 %v2076_v10, %v695_v9  ;;  %v2078_v19 = vpop.f32.mrb[17].mxu0  ;;  %v2119_v20 = vpop.f32.mrb[5].mxu1  ;;  %v2118_v1 = vadd.f32 %v10806_v17, %v703_v61  ;;  %v10843_v10 = vsub.s32 7, %v10741_v53  ;;  %v9975_v61 = vld [vmem:[#allocation9 + $0x130] sm:$0xff]  }
 0x31e   :  { %v2079_v21 = vadd.f32 %v2078_v19, %v699_v12  ;;  %v2120_v22 = vadd.f32 %v2119_v20, %v707_v13  ;;  %2627 = vmatpush1.bf16.msra.mxu0 %v9929_v11  ;;  %v2080_v23 = vpop.f32.mrb[18].mxu0  ;;  %v2121_v24 = vpop.f32.mrb[6].mxu1  ;;  %8851 = vmatpush3.bf16.msra.mxu1 %v9938_v14  ;;  %v9960_v11 = vld [vmem:[#allocation9 + $0xe0] sm:$0xff]   ;;  %v9961_v12 = vld [vmem:[#allocation9 + $0x158] sm:$0xff]   ;;  %v10837_v13 = vsub.s32 4, %v10741_v53 }
 0x31f   :  { %v2657_v27 = vadd.f32 3.0, %v2077_v18  ;;  %v2081_v28 = vpop.f32.mrb[19].mxu0  ;;  %v2122_v29 = vpop.f32.mrb[7].mxu1  ;;  %2628 = vmatprep.subr.bf16.mxu0 %v9936_v15  ;;  %8852 = vmatprep.subr.bf16.mxu1 %v9942_v16  ;;  %v2659_v9 = vadd.f32 3.0, %v2118_v1  ;;  %v9962_v14 = vld [vmem:[#allocation9 + $0xa0] sm:$0xff]   ;;  %v9963_v15 = vld [vmem:[#allocation9 + $0x118] sm:$0xff]  }
 0x320   :  { %v2658_v33 = vadd.f32 3.0, %v2079_v21  ;;  %v2660_v34 = vadd.f32 3.0, %v2120_v22  ;;  %v10840_v16 = vsub.s32 5, %v10741_v53  ;;  %v9965_v19 = vld [vmem:[#allocation9 + $0x160] sm:$0xff]   ;;  %v711_v20 = vrot.slane %v10792_v3, %v10837_v13  ;;  %v9966_v23 = vld [vmem:[#allocation9 + $0xa8] sm:$0xff]  }
 0x321   :  { %v2687_v35 = vmax.f32 %v2657_v27, 0.0  ;;  %v2689_v17 = vmax.f32 %v2659_v9, 0.0  ;;  %v9967_v24 = vld [vmem:[#allocation9 + $0x120] sm:$0xff]   ;;  %v9969_v27 = vld [vmem:[#allocation9 + $0x168] sm:$0xff]   ;;  %v9978_v9 = vld [vmem:[#allocation9 + $0x138] sm:$0xff]  }
 0x322   :  { %v2688_v36 = vmax.f32 %v2658_v33, 0.0  ;;  %v2690_v37 = vmax.f32 %v2660_v34, 0.0  ;;  %2629 = vmatpush1.bf16.msra.mxu0 %v9934_v25  ;;  %8853 = vmatpush3.bf16.msra.mxu1 %v9943_v26  ;;  %v9968_v26 = vld [vmem:[#allocation9 + $0xf0] sm:$0xff]  }
 0x323   :  { %v2717_v40 = vmin.f32 %v2687_v35, 6.0  ;;  %2630 = vmatprep.subr.bf16.mxu0 %v9941_v31  ;;  %8854 = vmatprep.subr.bf16.mxu1 %v9944_v32  ;;  %v2719_v25 = vmin.f32 %v2689_v17, 6.0  ;;  %v9980_v17 = vld [vmem:[#allocation9 + $0x1c8] sm:$0xff]  }
 0x324   :  { %v2718_v44 = vmin.f32 %v2688_v36, 6.0  ;;  %v2720_v45 = vmin.f32 %v2690_v37, 6.0 }
 0x325   :  { %v2747_v46 = vmul.f32 %v2717_v40, %v2077_v18  ;;  %v9964_v18 = vld [vmem:[#allocation9 + $0xe8] sm:$0xff]   ;;  %v2749_v40 = vmul.f32 %v2719_v25, %v2118_v1 }
 0x326   :  { %v2748_v47 = vmul.f32 %v2718_v44, %v2079_v21  ;;  %v2750_v48 = vmul.f32 %v2720_v45, %v2120_v22  ;;  %2631 = vmatpush1.bf16.msra.mxu0 %v9939_v38  ;;  %8855 = vmatpush3.bf16.msra.mxu1 %v9946_v39  ;;  %v715_v21 = vrot.slane %v10792_v3, %v10840_v16  ;;  %v9970_v38 = vld [vmem:[#allocation9 + $0xb0] sm:$0xff]   ;;  %v9971_v39 = vld [vmem:[#allocation9 + $0x128] sm:$0xff]   ;;  %v9972_v45 = vld [vmem:[#allocation9 + $0xf8] sm:$0xff]  }
 0x327   :  { %v10808_v50 = vmul.f32 0.16666667, %v2747_v46  ;;  %8862 = vmatprep.subr.bf16.mxu0 %v9945_v42  ;;  %8884 = vmatprep.subr.bf16.mxu1 %v9949_v43  ;;  %v723_v22 = vrot.slane %v10792_v3, %v10843_v10  ;;  %v9973_v46 = vld [vmem:[#allocation9 + $0x170] sm:$0xff]  }
 0x328   :  { %v10813_v54 = vmul.f32 0.16666667, %v2748_v47  ;;  %v10815_v55 = vmul.f32 0.16666667, %v2750_v48 }
 0x329   :  { %2649 = vmatmul.mubr.bf16.vlgmr.msra.gmra.mrb[44].mxu0 %v10760_v41  ;;  %v10828_v60 = vpack.c.bf16 %v10808_v50, %v10808_v50  ;;  %v9952_v41 = vld [vmem:[#allocation9 + $0xd0] sm:$0xff]  }
 0x32a   :  { %8863 = vmatpush3.bf16.msra.mxu0 %v9947_v49  ;;  %v10820_v56 = vpack.c.bf16 %v10813_v54, %v10813_v54  ;;  %v10824_v57 = vpack.c.bf16 %v10815_v55, %v10815_v55 }
 0x32b   :  { %8864 = vmatprep.subr.bf16.mxu0 %v9948_v52 }
 0x32c   :  { %3604 = vmatprep.mubr.bf16.mxu1 %v10820_v56  ;;  %3644 = vmatprep.mubr.bf16.mxu0 %v10824_v57 }
 0x32d   :  { %3605 = vmatmul.mubr.bf16.vlgmr.msra.gmra.mrb[32].mxu1 %v10828_v60 }
 0x32e   :  { %8865 = vmatpush3.bf16.msra.mxu0 %v9950_v58  ;;  %8885 = vmatpush3.bf16.msra.mxu1 %v9951_v59  ;;  %v9974_v59 = vld [vmem:[#allocation9 + $0xb8] sm:$0xff]  }
 0x32f   :  { %8866 = vmatprep.subr.bf16.mxu0 %v9952_v41  ;;  %8886 = vmatprep.subr.bf16.mxu1 %v9953_v62  ;;  %v10853_v41 = vmul.f32 0.16666667, %v2749_v40  ;;  %v9994_v40 = vld [vmem:[#allocation9 + $0x1a0] sm:$0xff]  }
 0x332   :  { %8867 = vmatpush3.bf16.msra.mxu0 %v9954_v63  ;;  %8887 = vmatpush3.bf16.msra.mxu1 %v9955_v0  ;;  %v9976_v63 = vld [vmem:[#allocation9 + $0x178] sm:$0xff]   ;;  %v9977_v0 = vld [vmem:[#allocation9 + $0x1c0] sm:$0xff]  }
 0x333   :  { %8868 = vmatprep.subr.bf16.mxu0 %v9956_v30  ;;  %8888 = vmatprep.subr.bf16.mxu1 %v9957_v6 }
 0x336   :  { %8869 = vmatpush3.bf16.msra.mxu0 %v9958_v7  ;;  %8889 = vmatpush3.bf16.msra.mxu1 %v9959_v8 }
 0x337   :  { %8870 = vmatprep.subr.bf16.mxu0 %v9960_v11  ;;  %8890 = vmatprep.subr.bf16.mxu1 %v9961_v12  ;;  %v9979_v11 = vld [vmem:[#allocation9 + $0x180] sm:$0xff]   ;;  %v10857_v12 = vpack.c.bf16 %v10853_v41, %v10853_v41 }
 0x33a   :  { %8871 = vmatpush3.bf16.msra.mxu0 %v9962_v14  ;;  %8891 = vmatpush3.bf16.msra.mxu1 %v9963_v15  ;;  %v10862_v15 = vsub.s32 6, %v10741_v53 }
 0x33b   :  { %8872 = vmatprep.subr.bf16.mxu0 %v9964_v18  ;;  %8892 = vmatprep.subr.bf16.mxu1 %v9965_v19  ;;  %v9981_v18 = vld [vmem:[#allocation9 + $0x240] sm:$0xff]  }
 0x33c   :  { %v2158_v28 = vpop.f32.mrb[20].mxu0  ;;  %v10851_v29 = vpop.f32.mrb[8].mxu1 }
 0x33d   :  { %v2159_v31 = vadd.f32 %v2158_v28, %v711_v20  ;;  %v2160_v32 = vpop.f32.mrb[21].mxu0  ;;  %v2201_v33 = vpop.f32.mrb[9].mxu1  ;;  %v9985_v28 = vld [vmem:[#allocation9 + $0x248] sm:$0xff]  }
 0x33e   :  { %v2161_v34 = vadd.f32 %v2160_v32, %v715_v21  ;;  %v2202_v35 = vadd.f32 %v2201_v33, %v723_v22  ;;  %v2162_v36 = vpop.f32.mrb[22].mxu0  ;;  %v2203_v37 = vpop.f32.mrb[10].mxu1  ;;  %8873 = vmatpush3.bf16.msra.mxu0 %v9966_v23  ;;  %8893 = vmatpush3.bf16.msra.mxu1 %v9967_v24  ;;  %v9982_v23 = vld [vmem:[#allocation9 + $0x188] sm:$0xff]   ;;  %v9983_v24 = vld [vmem:[#allocation9 + $0x200] sm:$0xff]  }
 0x33f   :  { %v2661_v42 = vadd.f32 3.0, %v2159_v31  ;;  %v2163_v43 = vpop.f32.mrb[23].mxu0  ;;  %v2204_v44 = vpop.f32.mrb[11].mxu1  ;;  %8874 = vmatprep.subr.bf16.mxu0 %v9968_v26  ;;  %8894 = vmatprep.subr.bf16.mxu1 %v9969_v27  ;;  %v719_v26 = vrot.slane %v10792_v3, %v10862_v15  ;;  %v9984_v27 = vld [vmem:[#allocation9 + $0x1d0] sm:$0xff]   ;;  %v9987_v32 = vld [vmem:[#allocation9 + $0x208] sm:$0xff]  }
 0x340   :  { %v2662_v47 = vadd.f32 3.0, %v2161_v34  ;;  %v2664_v48 = vadd.f32 3.0, %v2202_v35  ;;  %v9989_v3 = vld [vmem:[#allocation9 + $0x250] sm:$0xff]   ;;  %v9996_v44 = vld [vmem:[#allocation9 + $0x1e8] sm:$0xff]  }
 0x341   :  { %v2691_v49 = vmax.f32 %v2661_v42, 0.0  ;;  %v2200_v33 = vadd.f32 %v10851_v29, %v719_v26  ;;  %v9991_v36 = vld [vmem:[#allocation9 + $0x210] sm:$0xff]   ;;  %v9995_v42 = vld [vmem:[#allocation9 + $0x218] sm:$0xff]  }
 0x342   :  { %v2692_v52 = vmax.f32 %v2662_v47, 0.0  ;;  %v2694_v58 = vmax.f32 %v2664_v48, 0.0  ;;  %8875 = vmatpush3.bf16.msra.mxu0 %v9970_v38  ;;  %8895 = vmatpush3.bf16.msra.mxu1 %v9971_v39  ;;  %v9992_v38 = vld [vmem:[#allocation9 + $0x1e0] sm:$0xff]   ;;  %v9993_v39 = vld [vmem:[#allocation9 + $0x258] sm:$0xff]   ;;  %v10887_v43 = vld [vmem:[#allocation8 + $0x8] sm:$0xff] }
 0x343   :  { %v2721_v62 = vmin.f32 %v2691_v49, 6.0  ;;  %8876 = vmatprep.subr.bf16.mxu0 %v9972_v45  ;;  %8896 = vmatprep.subr.bf16.mxu1 %v9973_v46  ;;  %v2663_v37 = vadd.f32 3.0, %v2200_v33  ;;  %v9997_v45 = vld [vmem:[#allocation9 + $0x260] sm:$0xff]   ;;  %v727_v46 = vrot.slane %v10887_v43, %v10790_v2  ;;  %v735_v47 = vrot.slane %v10887_v43, %v10811_v51 }
 0x344   :  { %v2722_v1 = vmin.f32 %v2692_v52, 6.0  ;;  %v2724_v30 = vmin.f32 %v2694_v58, 6.0  ;;  %v731_v48 = vrot.slane %v10887_v43, %v10795_v4  ;;  %v739_v49 = vrot.slane %v10887_v43, %v10798_v5  ;;  %v9998_v52 = vld [vmem:[#allocation9 + $0x1a8] sm:$0xff]   ;;  %v9999_v58 = vld [vmem:[#allocation9 + $0x220] sm:$0xff]  }
 0x345   :  { %v2751_v6 = vmul.f32 %v2721_v62, %v2159_v31  ;;  %v9986_v31 = vld [vmem:[#allocation9 + $0x190] sm:$0xff]   ;;  %v2693_v29 = vmax.f32 %v2663_v37, 0.0  ;;  %v10001_v62 = vld [vmem:[#allocation9 + $0x268] sm:$0xff]  }
 0x346   :  { %v2752_v7 = vmul.f32 %v2722_v1, %v2161_v34  ;;  %v2754_v8 = vmul.f32 %v2724_v30, %v2202_v35  ;;  %8877 = vmatpush3.bf16.msra.mxu0 %v9974_v59  ;;  %8897 = vmatpush3.bf16.msra.mxu1 %v9975_v61  ;;  %v9988_v34 = vld [vmem:[#allocation9 + $0x1d8] sm:$0xff]   ;;  %v10000_v61 = vld [vmem:[#allocation9 + $0x1f0] sm:$0xff]  }
 0x347   :  { %v10859_v14 = vmul.f32 0.16666667, %v2751_v6  ;;  %8898 = vmatprep.subr.bf16.mxu1 %v9976_v63  ;;  %8906 = vmatprep.subr.bf16.mxu0 %v9977_v0  ;;  %v9990_v35 = vld [vmem:[#allocation9 + $0x198] sm:$0xff]   ;;  %v2723_v59 = vmin.f32 %v2693_v29, 6.0 }
 0x348   :  { %v10864_v19 = vmul.f32 0.16666667, %v2752_v7  ;;  %v10866_v20 = vmul.f32 0.16666667, %v2754_v8 }
 0x349   :  { %3645 = vmatmul.mubr.bf16.vlgmr.msra.gmra.mrb[48].mxu0 %v10857_v12  ;;  %v10879_v25 = vpack.c.bf16 %v10859_v14, %v10859_v14 }
 0x34a   :  { %8899 = vmatpush3.bf16.msra.mxu1 %v9978_v9  ;;  %8907 = vmatpush3.bf16.msra.mxu0 %v9979_v11  ;;  %v10871_v21 = vpack.c.bf16 %v10864_v19, %v10864_v19  ;;  %v10875_v22 = vpack.c.bf16 %v10866_v20, %v10866_v20 }
 0x34b   :  { %8908 = vmatprep.subr.bf16.mxu0 %v9980_v17  ;;  %8928 = vmatprep.subr.bf16.mxu1 %v9981_v18  ;;  %v10002_v18 = vld [vmem:[#allocation9 + $0x1b0] sm:$0xff]  }
 0x34c   :  { %3684 = vmatprep.mubr.bf16.mxu1 %v10871_v21  ;;  %3724 = vmatprep.mubr.bf16.mxu0 %v10875_v22 }
 0x34d   :  { %3685 = vmatmul.mubr.bf16.vlgmr.msra.gmra.mrb[36].mxu1 %v10879_v25 }
 0x34e   :  { %8909 = vmatpush3.bf16.msra.mxu0 %v9982_v23  ;;  %8929 = vmatpush3.bf16.msra.mxu1 %v9983_v24  ;;  %v10003_v23 = vld [vmem:[#allocation9 + $0x228] sm:$0xff]   ;;  %v2753_v24 = vmul.f32 %v2723_v59, %v2200_v33 }
 0x34f   :  { %8910 = vmatprep.subr.bf16.mxu0 %v9984_v27  ;;  %8930 = vmatprep.subr.bf16.mxu1 %v9985_v28 }
 0x350   :  { %v10897_v29 = vmul.f32 0.16666667, %v2753_v24  ;;  %v10015_v24 = vld [vmem:[#allocation9 + $0x300] sm:$0xff]  }
 0x352   :  { %8911 = vmatpush3.bf16.msra.mxu0 %v9986_v31  ;;  %8931 = vmatpush3.bf16.msra.mxu1 %v9987_v32  ;;  %v10004_v32 = vld [vmem:[#allocation9 + $0x1f8] sm:$0xff]  }
 0x353   :  { %8912 = vmatprep.subr.bf16.mxu0 %v9988_v34  ;;  %8932 = vmatprep.subr.bf16.mxu1 %v9989_v3  ;;  %v10005_v34 = vld [vmem:[#allocation9 + $0x270] sm:$0xff]  }
 0x356   :  { %8913 = vmatpush3.bf16.msra.mxu0 %v9990_v35  ;;  %8933 = vmatpush3.bf16.msra.mxu1 %v9991_v36 }
 0x357   :  { %8914 = vmatprep.subr.bf16.mxu0 %v9992_v38  ;;  %8934 = vmatprep.subr.bf16.mxu1 %v9993_v39 }
 0x35a   :  { %8915 = vmatpush3.bf16.msra.mxu0 %v9994_v40  ;;  %8935 = vmatpush3.bf16.msra.mxu1 %v9995_v42  ;;  %v10006_v40 = vld [vmem:[#allocation9 + $0x1b8] sm:$0xff]   ;;  %v10007_v42 = vld [vmem:[#allocation9 + $0x230] sm:$0xff]  }
 0x35b   :  { %8916 = vmatprep.subr.bf16.mxu0 %v9996_v44  ;;  %8936 = vmatprep.subr.bf16.mxu1 %v9997_v45  ;;  %v10008_v45 = vld [vmem:[#allocation9 + $0x278] sm:$0xff]  }
 0x35c   :  { %v2240_v63 = vpop.f32.mrb[24].mxu0  ;;  %v2281_v0 = vpop.f32.mrb[12].mxu1 }
 0x35d   :  { %v2241_v1 = vadd.f32 %v2240_v63, %v727_v46  ;;  %v2282_v30 = vadd.f32 %v2281_v0, %v735_v47  ;;  %v2242_v6 = vpop.f32.mrb[25].mxu0  ;;  %v2283_v7 = vpop.f32.mrb[13].mxu1  ;;  %v10009_v46 = vld [vmem:[#allocation9 + $0x2c0] sm:$0xff]   ;;  %v10901_v63 = vpack.c.bf16 %v10897_v29, %v10897_v29 }
 0x35e   :  { %v2243_v8 = vadd.f32 %v2242_v6, %v731_v48  ;;  %v2284_v9 = vadd.f32 %v2283_v7, %v739_v49  ;;  %v2244_v11 = vpop.f32.mrb[26].mxu0  ;;  %v2285_v17 = vpop.f32.mrb[14].mxu1  ;;  %8917 = vmatpush3.bf16.msra.mxu0 %v9998_v52  ;;  %8937 = vmatpush3.bf16.msra.mxu1 %v9999_v58  ;;  %v10012_v7 = vld [vmem:[#allocation9 + $0x2c8] sm:$0xff]  }
 0x35f   :  { %v2665_v26 = vadd.f32 3.0, %v2241_v1  ;;  %v2667_v27 = vadd.f32 3.0, %v2282_v30  ;;  %v2245_v28 = vpop.f32.mrb[27].mxu0  ;;  %v2286_v31 = vpop.f32.mrb[15].mxu1  ;;  %8918 = vmatprep.subr.bf16.mxu0 %v10000_v61  ;;  %8938 = vmatprep.subr.bf16.mxu1 %v10001_v62  ;;  %v10010_v61 = vld [vmem:[#allocation9 + $0x238] sm:$0xff]   ;;  %v10011_v62 = vld [vmem:[#allocation9 + $0x280] sm:$0xff]  }
 0x360   :  { %v2666_v3 = vadd.f32 3.0, %v2243_v8  ;;  %v2668_v35 = vadd.f32 3.0, %v2284_v9  ;;  %v10013_v11 = vld [vmem:[#allocation9 + $0x340] sm:$0xff]   ;;  %v10019_v28 = vld [vmem:[#allocation9 + $0x308] sm:$0xff]   ;;  %v10020_v31 = vld [vmem:[#allocation9 + $0x2d8] sm:$0xff]  }
 0x361   :  { %v2695_v36 = vmax.f32 %v2665_v26, 0.0  ;;  %v2697_v37 = vmax.f32 %v2667_v27, 0.0  ;;  %v10017_v27 = vld [vmem:[#allocation9 + $0x348] sm:$0xff]  }
 0x362   :  { %v2696_v38 = vmax.f32 %v2666_v3, 0.0  ;;  %v2698_v39 = vmax.f32 %v2668_v35, 0.0  ;;  %8919 = vmatpush3.bf16.msra.mxu0 %v10002_v18  ;;  %8939 = vmatpush3.bf16.msra.mxu1 %v10003_v23  ;;  %v10014_v23 = vld [vmem:[#allocation9 + $0x288] sm:$0xff]   ;;  %v10023_v3 = vld [vmem:[#allocation9 + $0x310] sm:$0xff]   ;;  %v10024_v35 = vld [vmem:[#allocation9 + $0x2e0] sm:$0xff]  }
 0x363   :  { %v2725_v33 = vmin.f32 %v2695_v36, 6.0  ;;  %v2727_v44 = vmin.f32 %v2697_v37, 6.0  ;;  %8920 = vmatprep.subr.bf16.mxu0 %v10004_v32  ;;  %8940 = vmatprep.subr.bf16.mxu1 %v10005_v34  ;;  %v10021_v32 = vld [vmem:[#allocation9 + $0x350] sm:$0xff]   ;;  %v10022_v34 = vld [vmem:[#allocation9 + $0x298] sm:$0xff]   ;;  %v10026_v37 = vld [vmem:[#allocation9 + $0x2a0] sm:$0xff]  }
 0x364   :  { %v2726_v47 = vmin.f32 %v2696_v38, 6.0  ;;  %v2728_v48 = vmin.f32 %v2698_v39, 6.0  ;;  %v10025_v36 = vld [vmem:[#allocation9 + $0x358] sm:$0xff]   ;;  %v10028_v39 = vld [vmem:[#allocation9 + $0x2e8] sm:$0xff]  }
 0x365   :  { %v2755_v49 = vmul.f32 %v2725_v33, %v2241_v1  ;;  %v2757_v52 = vmul.f32 %v2727_v44, %v2282_v30  ;;  %v10027_v38 = vld [vmem:[#allocation9 + $0x318] sm:$0xff]   ;;  %v751_v33 = vrot.slane %v10887_v43, %v10862_v15  ;;  %v747_v44 = vrot.slane %v10887_v43, %v10840_v16 }
 0x366   :  { %v2756_v58 = vmul.f32 %v2726_v47, %v2243_v8  ;;  %v2758_v59 = vmul.f32 %v2728_v48, %v2284_v9  ;;  %8921 = vmatpush3.bf16.msra.mxu0 %v10006_v40  ;;  %8941 = vmatpush3.bf16.msra.mxu1 %v10007_v42  ;;  %v10029_v40 = vld [vmem:[#allocation9 + $0x360] sm:$0xff]   ;;  %v743_v42 = vrot.slane %v10887_v43, %v10837_v13  ;;  %v10032_v48 = vld [vmem:[#allocation9 + $0x2f0] sm:$0xff]  }
 0x367   :  { %v10903_v0 = vmul.f32 0.16666667, %v2755_v49  ;;  %v10905_v6 = vmul.f32 0.16666667, %v2757_v52  ;;  %8942 = vmatprep.subr.bf16.mxu1 %v10008_v45  ;;  %8950 = vmatprep.subr.bf16.mxu0 %v10009_v46  ;;  %v755_v45 = vrot.slane %v10887_v43, %v10843_v10  ;;  %v10030_v46 = vld [vmem:[#allocation9 + $0x2a8] sm:$0xff]   ;;  %v10031_v47 = vld [vmem:[#allocation9 + $0x320] sm:$0xff]  }
 0x368   :  { %v10907_v1 = vmul.f32 0.16666667, %v2756_v58  ;;  %v2788_v30 = vmul.f32 0.16666667, %v2758_v59  ;;  %v10033_v49 = vld [vmem:[#allocation9 + $0x368] sm:$0xff]  }
 0x369   :  { %v10911_v8 = vadd.f32 %v10905_v6, %v10808_v50  ;;  %3725 = vmatmul.mubr.bf16.vlgmr.msra.gmra.mrb[52].mxu0 %v10901_v63  ;;  %v10925_v26 = vpack.c.bf16 %v10903_v0, %v10903_v0  ;;  %v10016_v50 = vld [vmem:[#allocation9 + $0x2d0] sm:$0xff]   ;;  %v10035_v43 = vld [vmem:[#allocation9 + $0x328] sm:$0xff]  }
 0x36a   :  { %v10915_v9 = vadd.f32 %v2788_v30, %v10813_v54  ;;  %8943 = vmatpush3.bf16.msra.mxu1 %v10010_v61  ;;  %8951 = vmatpush3.bf16.msra.mxu0 %v10011_v62  ;;  %v10919_v17 = vpack.c.bf16 %v10907_v1, %v10907_v1  ;;  %v10921_v18 = vpack.c.bf16 %v2788_v30, %v2788_v30  ;;  %v10018_v54 = vld [vmem:[#allocation9 + $0x290] sm:$0xff]  }
 0x36b   :  { %8952 = vmatprep.subr.bf16.mxu0 %v10012_v7  ;;  %8972 = vmatprep.subr.bf16.mxu1 %v10013_v11 }
 0x36c   :  { %3764 = vmatprep.mubr.bf16.mxu1 %v10919_v17  ;;  %4464 = vmatprep.mubr.bf16.mxu0 %v10921_v18 }
 0x36d   :  { %3765 = vmatmul.mubr.bf16.vlgmr.msra.gmra.mrb[40].mxu1 %v10925_v26 }
 0x36e   :  { %8953 = vmatpush3.bf16.msra.mxu0 %v10014_v23  ;;  %8973 = vmatpush3.bf16.msra.mxu1 %v10015_v24 }
 0x36f   :  { %8954 = vmatprep.subr.bf16.mxu0 %v10016_v50  ;;  %8974 = vmatprep.subr.bf16.mxu1 %v10017_v27  ;;  %v10034_v50 = vld [vmem:[#allocation9 + $0x2b0] sm:$0xff]  }
 0x372   :  { %8955 = vmatpush3.bf16.msra.mxu0 %v10018_v54  ;;  %8975 = vmatpush3.bf16.msra.mxu1 %v10019_v28 }
 0x373   :  { %8956 = vmatprep.subr.bf16.mxu0 %v10020_v31  ;;  %8976 = vmatprep.subr.bf16.mxu1 %v10021_v32  ;;  %v10036_v32 = vld [vmem:[#allocation9 + $0x2f8] sm:$0xff]  }
 0x376   :  { %8957 = vmatpush3.bf16.msra.mxu0 %v10022_v34  ;;  %8977 = vmatpush3.bf16.msra.mxu1 %v10023_v3  ;;  %v10037_v34 = vld [vmem:[#allocation9 + $0x370] sm:$0xff]  }
 0x377   :  { %8958 = vmatprep.subr.bf16.mxu0 %v10024_v35  ;;  %8978 = vmatprep.subr.bf16.mxu1 %v10025_v36 }
 0x37a   :  { %8959 = vmatpush3.bf16.msra.mxu0 %v10026_v37  ;;  %8979 = vmatpush3.bf16.msra.mxu1 %v10027_v38 }
 0x37b   :  { %8960 = vmatprep.subr.bf16.mxu0 %v10028_v39  ;;  %8980 = vmatprep.subr.bf16.mxu1 %v10029_v40  ;;  %v10038_v40 = vld [vmem:[#allocation9 + $0x2b8] sm:$0xff]  }
 0x37c   :  { %v2322_v52 = vpop.f32.mrb[28].mxu0  ;;  %v2363_v58 = vpop.f32.mrb[16].mxu1 }
 0x37d   :  { %v2323_v59 = vadd.f32 %v2322_v52, %v743_v42  ;;  %v2364_v61 = vadd.f32 %v2363_v58, %v751_v33  ;;  %v2324_v62 = vpop.f32.mrb[29].mxu0  ;;  %v2365_v7 = vpop.f32.mrb[17].mxu1  ;;  %v10039_v42 = vld [vmem:[#allocation9 + $0x330] sm:$0xff]  }
 0x37e   :  { %v2325_v11 = vadd.f32 %v2324_v62, %v747_v44  ;;  %v2366_v30 = vadd.f32 %v2365_v7, %v755_v45  ;;  %v2326_v23 = vpop.f32.mrb[30].mxu0  ;;  %v2367_v24 = vpop.f32.mrb[18].mxu1  ;;  %8961 = vmatpush3.bf16.msra.mxu0 %v10030_v46  ;;  %8981 = vmatpush3.bf16.msra.mxu1 %v10031_v47  ;;  %v10040_v45 = vld [vmem:[#allocation9 + $0x378] sm:$0xff]   ;;  %v10041_v46 = vld [vmem:[#allocation9 + $0x3c0] sm:$0xff]  }
 0x37f   :  { %v2669_v27 = vadd.f32 3.0, %v2323_v59  ;;  %v2671_v54 = vadd.f32 3.0, %v2364_v61  ;;  %v2327_v28 = vpop.f32.mrb[31].mxu0  ;;  %v2368_v31 = vpop.f32.mrb[19].mxu1  ;;  %8962 = vmatprep.subr.bf16.mxu0 %v10032_v48  ;;  %8982 = vmatprep.subr.bf16.mxu1 %v10033_v49  ;;  %v10042_v7 = vld [vmem:[#allocation9 + $0x338] sm:$0xff]   ;;  %v10043_v23 = vld [vmem:[#allocation9 + $0x380] sm:$0xff]   ;;  %v10940_v24 = vpack.c.bf16 %v10905_v6, %v10905_v6 }
 0x380   :  { %v2670_v3 = vadd.f32 3.0, %v2325_v11  ;;  %v2672_v35 = vadd.f32 3.0, %v2366_v30  ;;  %v10046_v28 = vld [vmem:[#allocation9 + $0x388] sm:$0xff]   ;;  %v10047_v31 = vld [vmem:[#allocation9 + $0x400] sm:$0xff]  }
 0x381   :  { %v2699_v36 = vmax.f32 %v2669_v27, 0.0  ;;  %v2701_v37 = vmax.f32 %v2671_v54, 0.0  ;;  %v10044_v27 = vld [vmem:[#allocation9 + $0x3c8] sm:$0xff]   ;;  %v10045_v54 = vld [vmem:[#allocation9 + $0x440] sm:$0xff]  }
 0x382   :  { %v2700_v38 = vmax.f32 %v2670_v3, 0.0  ;;  %v2702_v39 = vmax.f32 %v2672_v35, 0.0  ;;  %8963 = vmatpush3.bf16.msra.mxu0 %v10034_v50  ;;  %8983 = vmatpush3.bf16.msra.mxu1 %v10035_v43  ;;  %v10049_v3 = vld [vmem:[#allocation9 + $0x448] sm:$0xff]  }
 0x383   :  { %v2729_v33 = vmin.f32 %v2699_v36, 6.0  ;;  %v2731_v44 = vmin.f32 %v2701_v37, 6.0  ;;  %8964 = vmatprep.subr.bf16.mxu0 %v10036_v32  ;;  %8984 = vmatprep.subr.bf16.mxu1 %v10037_v34  ;;  %v10051_v35 = vld [vmem:[#allocation9 + $0x408] sm:$0xff]   ;;  %v10052_v36 = vld [vmem:[#allocation9 + $0x3d8] sm:$0xff]   ;;  %v10053_v37 = vld [vmem:[#allocation9 + $0x450] sm:$0xff]  }
 0x384   :  { %v2730_v47 = vmin.f32 %v2700_v38, 6.0  ;;  %v2732_v48 = vmin.f32 %v2702_v39, 6.0  ;;  %v10054_v38 = vld [vmem:[#allocation9 + $0x398] sm:$0xff]   ;;  %v10055_v39 = vld [vmem:[#allocation9 + $0x410] sm:$0xff]  }
 0x385   :  { %v2759_v49 = vmul.f32 %v2729_v33, %v2323_v59  ;;  %v2761_v52 = vmul.f32 %v2731_v44, %v2364_v61  ;;  %v10058_v33 = vld [vmem:[#allocation9 + $0x3a0] sm:$0xff]   ;;  %v10059_v44 = vld [vmem:[#allocation9 + $0x418] sm:$0xff]  }
 0x386   :  { %v2760_v58 = vmul.f32 %v2730_v47, %v2325_v11  ;;  %v2762_v62 = vmul.f32 %v2732_v48, %v2366_v30  ;;  %8965 = vmatpush3.bf16.msra.mxu0 %v10038_v40  ;;  %8985 = vmatpush3.bf16.msra.mxu1 %v10039_v42  ;;  %v10056_v40 = vld [vmem:[#allocation9 + $0x3e0] sm:$0xff]   ;;  %v10057_v42 = vld [vmem:[#allocation9 + $0x458] sm:$0xff]  }
 0x387   :  { %v10942_v50 = vmul.f32 0.16666667, %v2759_v49  ;;  %v10944_v43 = vmul.f32 0.16666667, %v2761_v52  ;;  %8986 = vmatprep.subr.bf16.mxu1 %v10040_v45  ;;  %8994 = vmatprep.subr.bf16.mxu0 %v10041_v46  ;;  %v10969_v45 = vld [vmem:[#allocation8 + $0x10] sm:$0xff]  ;;  %v10060_v46 = vld [vmem:[#allocation9 + $0x3e8] sm:$0xff]  }
 0x388   :  { %v10946_v59 = vmul.f32 0.16666667, %v2760_v58  ;;  %v2792_v61 = vmul.f32 0.16666667, %v2762_v62  ;;  %v10061_v47 = vld [vmem:[#allocation9 + $0x460] sm:$0xff]   ;;  %v759_v48 = vrot.slane %v10969_v45, %v10790_v2  ;;  %v767_v49 = vrot.slane %v10969_v45, %v10811_v51  ;;  %v10062_v62 = vld [vmem:[#allocation9 + $0x3a8] sm:$0xff]  }
 0x389   :  { %v10950_v11 = vadd.f32 %v10944_v43, %v10859_v14  ;;  %4465 = vmatmul.mubr.bf16.vlgmr.msra.gmra.mrb[56].mxu0 %v10940_v24  ;;  %v10962_v32 = vpack.c.bf16 %v10942_v50, %v10942_v50  ;;  %v10048_v14 = vld [vmem:[#allocation9 + $0x3d0] sm:$0xff]   ;;  %v763_v52 = vrot.slane %v10969_v45, %v10795_v4  ;;  %v771_v58 = vrot.slane %v10969_v45, %v10798_v5 }
 0x38a   :  { %v10954_v6 = vadd.f32 %v2792_v61, %v10864_v19  ;;  %8987 = vmatpush3.bf16.msra.mxu1 %v10042_v7  ;;  %8995 = vmatpush3.bf16.msra.mxu0 %v10043_v23  ;;  %v10958_v30 = vpack.c.bf16 %v10946_v59, %v10946_v59  ;;  %v10964_v34 = vpack.c.bf16 %v2792_v61, %v2792_v61  ;;  %v10050_v19 = vld [vmem:[#allocation9 + $0x390] sm:$0xff]   ;;  %v10063_v7 = vld [vmem:[#allocation9 + $0x420] sm:$0xff]  }
 0x38b   :  { %11216 = vst [vmem:[#allocation20_spill] sm:$0xff] %v10962_v32  ;;  %8996 = vmatprep.subr.bf16.mxu0 %v10044_v27  ;;  %9016 = vmatprep.subr.bf16.mxu1 %v10045_v54  ;;  %v10064_v23 = vld [vmem:[#allocation9 + $0x3f0] sm:$0xff]   ;;  %v10065_v27 = vld [vmem:[#allocation9 + $0x468] sm:$0xff]  }
 0x38c   :  { %11217 = vst [vmem:[#allocation21_spill] sm:$0xff] %v10964_v34  ;;  %4504 = vmatprep.mubr.bf16.mxu1 %v10958_v30  ;;  %4544 = vmatprep.mubr.bf16.mxu0 %v10964_v34 }
 0x38d   :  { %4505 = vmatmul.mubr.bf16.vlgmr.msra.gmra.mrb[44].mxu1 %v10962_v32 }
 0x38e   :  { %8997 = vmatpush3.bf16.msra.mxu0 %v10046_v28  ;;  %9017 = vmatpush3.bf16.msra.mxu1 %v10047_v31 }
 0x38f   :  { %8998 = vmatprep.subr.bf16.mxu0 %v10048_v14  ;;  %9018 = vmatprep.subr.bf16.mxu1 %v10049_v3 }
 0x392   :  { %8999 = vmatpush3.bf16.msra.mxu0 %v10050_v19  ;;  %9019 = vmatpush3.bf16.msra.mxu1 %v10051_v35 }
 0x393   :  { %9000 = vmatprep.subr.bf16.mxu0 %v10052_v36  ;;  %9020 = vmatprep.subr.bf16.mxu1 %v10053_v37 }
 0x396   :  { %9001 = vmatpush3.bf16.msra.mxu0 %v10054_v38  ;;  %9021 = vmatpush3.bf16.msra.mxu1 %v10055_v39  ;;  %v10066_v38 = vld [vmem:[#allocation9 + $0x3b0] sm:$0xff]   ;;  %v10067_v39 = vld [vmem:[#allocation9 + $0x428] sm:$0xff]  }
 0x397   :  { %9002 = vmatprep.subr.bf16.mxu0 %v10056_v40  ;;  %9022 = vmatprep.subr.bf16.mxu1 %v10057_v42 }
 0x39a   :  { %9003 = vmatpush3.bf16.msra.mxu0 %v10058_v33  ;;  %9023 = vmatpush3.bf16.msra.mxu1 %v10059_v44 }
 0x39b   :  { %9004 = vmatprep.subr.bf16.mxu0 %v10060_v46  ;;  %9024 = vmatprep.subr.bf16.mxu1 %v10061_v47  ;;  %v10068_v46 = vld [vmem:[#allocation9 + $0x3f8] sm:$0xff]   ;;  %v10069_v47 = vld [vmem:[#allocation9 + $0x470] sm:$0xff]  }
 0x39c   :  { %v2404_v54 = vpop.f32.mrb[32].mxu0  ;;  %v2445_v61 = vpop.f32.mrb[20].mxu1 }
 0x39d   :  { %v2405_v28 = vadd.f32 %v2404_v54, %v759_v48  ;;  %v2446_v31 = vadd.f32 %v2445_v61, %v767_v49  ;;  %v2406_v14 = vpop.f32.mrb[33].mxu0  ;;  %v2447_v3 = vpop.f32.mrb[21].mxu1 }
 0x39e   :  { %v2407_v19 = vadd.f32 %v2406_v14, %v763_v52  ;;  %v2448_v35 = vadd.f32 %v2447_v3, %v771_v58  ;;  %v2408_v36 = vpop.f32.mrb[34].mxu0  ;;  %v2449_v37 = vpop.f32.mrb[22].mxu1  ;;  %9005 = vmatpush3.bf16.msra.mxu0 %v10062_v62  ;;  %9025 = vmatpush3.bf16.msra.mxu1 %v10063_v7  ;;  %v10070_v62 = vld [vmem:[#allocation9 + $0x3b8] sm:$0xff]   ;;  %v10071_v7 = vld [vmem:[#allocation9 + $0x430] sm:$0xff]  }
 0x39f   :  { %v2673_v40 = vadd.f32 3.0, %v2405_v28  ;;  %v2675_v42 = vadd.f32 3.0, %v2446_v31  ;;  %v2409_v33 = vpop.f32.mrb[35].mxu0  ;;  %v2450_v44 = vpop.f32.mrb[23].mxu1  ;;  %9006 = vmatprep.subr.bf16.mxu0 %v10064_v23  ;;  %9026 = vmatprep.subr.bf16.mxu1 %v10065_v27  ;;  %v10072_v36 = vld [vmem:[#allocation9 + $0x478] sm:$0xff]   ;;  %v10073_v37 = vld [vmem:[#allocation9 + $0x4c0] sm:$0xff]  }
 0x3a0   :  { %v2674_v48 = vadd.f32 3.0, %v2407_v19  ;;  %v2676_v49 = vadd.f32 3.0, %v2448_v35 }
 0x3a1   :  { %v2703_v54 = vmax.f32 %v2673_v40, 0.0  ;;  %v2705_v61 = vmax.f32 %v2675_v42, 0.0  ;;  %v10074_v40 = vld [vmem:[#allocation9 + $0x438] sm:$0xff]   ;;  %v10075_v42 = vld [vmem:[#allocation9 + $0x480] sm:$0xff]  }
 0x3a2   :  { %v2704_v52 = vmax.f32 %v2674_v48, 0.0  ;;  %v2706_v58 = vmax.f32 %v2676_v49, 0.0  ;;  %9007 = vmatpush3.bf16.msra.mxu0 %v10066_v38  ;;  %9027 = vmatpush3.bf16.msra.mxu1 %v10067_v39  ;;  %v10981_v38 = vpack.c.bf16 %v10944_v43, %v10944_v43  ;;  %v10077_v48 = vld [vmem:[#allocation9 + $0x540] sm:$0xff]   ;;  %v10078_v49 = vld [vmem:[#allocation9 + $0x488] sm:$0xff]  }
 0x3a3   :  { %v2733_v14 = vmin.f32 %v2703_v54, 6.0  ;;  %v2735_v3 = vmin.f32 %v2705_v61, 6.0  ;;  %9008 = vmatprep.subr.bf16.mxu0 %v10068_v46  ;;  %9028 = vmatprep.subr.bf16.mxu1 %v10069_v47  ;;  %v10076_v47 = vld [vmem:[#allocation9 + $0x4c8] sm:$0xff]   ;;  %v10079_v54 = vld [vmem:[#allocation9 + $0x500] sm:$0xff]  }
 0x3a4   :  { %v2734_v23 = vmin.f32 %v2704_v52, 6.0  ;;  %v2736_v27 = vmin.f32 %v2706_v58, 6.0  ;;  %11218 = vst [vmem:[#allocation22_spill] sm:$0xff] %v10981_v38  ;;  %v10081_v61 = vld [vmem:[#allocation9 + $0x548] sm:$0xff]   ;;  %v10084_v58 = vld [vmem:[#allocation9 + $0x4d8] sm:$0xff]  }
 0x3a5   :  { %v2763_v33 = vmul.f32 %v2733_v14, %v2405_v28  ;;  %v2765_v44 = vmul.f32 %v2735_v3, %v2446_v31  ;;  %v10083_v52 = vld [vmem:[#allocation9 + $0x508] sm:$0xff]   ;;  %v10087_v14 = vld [vmem:[#allocation9 + $0x510] sm:$0xff]   ;;  %v10088_v3 = vld [vmem:[#allocation9 + $0x4e0] sm:$0xff]  }
 0x3a6   :  { %v2764_v32 = vmul.f32 %v2734_v23, %v2407_v19  ;;  %v2766_v34 = vmul.f32 %v2736_v27, %v2448_v35  ;;  %9009 = vmatpush3.bf16.msra.mxu0 %v10070_v62  ;;  %9029 = vmatpush3.bf16.msra.mxu1 %v10071_v7  ;;  %v10085_v62 = vld [vmem:[#allocation9 + $0x550] sm:$0xff]   ;;  %v10086_v7 = vld [vmem:[#allocation9 + $0x498] sm:$0xff]   ;;  %v10092_v27 = vld [vmem:[#allocation9 + $0x4e8] sm:$0xff]  }
 0x3a7   :  { %v10983_v39 = vmul.f32 0.16666667, %v2763_v33  ;;  %v10985_v46 = vmul.f32 0.16666667, %v2765_v44  ;;  %9030 = vmatprep.subr.bf16.mxu1 %v10072_v36  ;;  %9038 = vmatprep.subr.bf16.mxu0 %v10073_v37  ;;  %v10089_v36 = vld [vmem:[#allocation9 + $0x558] sm:$0xff]   ;;  %v10090_v37 = vld [vmem:[#allocation9 + $0x4a0] sm:$0xff]   ;;  %v775_v44 = vrot.slane %v10969_v45, %v10837_v13 }
 0x3a8   :  { %v10987_v28 = vmul.f32 0.16666667, %v2764_v32  ;;  %v2796_v31 = vmul.f32 0.16666667, %v2766_v34  ;;  %v10091_v23 = vld [vmem:[#allocation9 + $0x518] sm:$0xff]   ;;  %v10093_v33 = vld [vmem:[#allocation9 + $0x560] sm:$0xff]  }
 0x3a9   :  { %v10991_v19 = vadd.f32 %v10985_v46, %v10903_v0  ;;  %4545 = vmatmul.mubr.bf16.vlgmr.msra.gmra.mrb[60].mxu0 %v10981_v38  ;;  %v11003_v32 = vpack.c.bf16 %v10983_v39, %v10983_v39  ;;  %v10080_v0 = vld [vmem:[#allocation9 + $0x4d0] sm:$0xff]  }
 0x3aa   :  { %v10995_v43 = vadd.f32 %v2796_v31, %v10907_v1  ;;  %9031 = vmatpush3.bf16.msra.mxu1 %v10074_v40  ;;  %9039 = vmatpush3.bf16.msra.mxu0 %v10075_v42  ;;  %v10999_v35 = vpack.c.bf16 %v10987_v28, %v10987_v28  ;;  %v11005_v34 = vpack.c.bf16 %v2796_v31, %v2796_v31  ;;  %v10082_v1 = vld [vmem:[#allocation9 + $0x490] sm:$0xff]   ;;  %v10095_v31 = vld [vmem:[#allocation9 + $0x520] sm:$0xff]  }
 0x3ab   :  { %11219 = vst [vmem:[#allocation23_spill] sm:$0xff] %v11003_v32  ;;  %9040 = vmatprep.subr.bf16.mxu0 %v10076_v47  ;;  %9060 = vmatprep.subr.bf16.mxu1 %v10077_v48  ;;  %v783_v40 = vrot.slane %v10969_v45, %v10862_v15  ;;  %v779_v42 = vrot.slane %v10969_v45, %v10840_v16  ;;  %v10094_v48 = vld [vmem:[#allocation9 + $0x4a8] sm:$0xff]  }
 0x3ac   :  { %11220 = vst [vmem:[#allocation24_spill] sm:$0xff] %v11005_v34  ;;  %4584 = vmatprep.mubr.bf16.mxu1 %v10999_v35  ;;  %4624 = vmatprep.mubr.bf16.mxu0 %v11005_v34  ;;  %v787_v47 = vrot.slane %v10969_v45, %v10843_v10  ;;  %v10099_v10 = vld [vmem:[#allocation9 + $0x528] sm:$0xff]  }
 0x3ad   :  { %4585 = vmatmul.mubr.bf16.vlgmr.msra.gmra.mrb[48].mxu1 %v11003_v32  ;;  %v10101_v32 = vld [vmem:[#allocation9 + $0x570] sm:$0xff]  }
 0x3ae   :  { %9041 = vmatpush3.bf16.msra.mxu0 %v10078_v49  ;;  %9061 = vmatpush3.bf16.msra.mxu1 %v10079_v54  ;;  %v10096_v49 = vld [vmem:[#allocation9 + $0x4f0] sm:$0xff]   ;;  %v10097_v54 = vld [vmem:[#allocation9 + $0x568] sm:$0xff]  }
 0x3af   :  { %9042 = vmatprep.subr.bf16.mxu0 %v10080_v0  ;;  %9062 = vmatprep.subr.bf16.mxu1 %v10081_v61 }
 0x3b2   :  { %9043 = vmatpush3.bf16.msra.mxu0 %v10082_v1  ;;  %9063 = vmatpush3.bf16.msra.mxu1 %v10083_v52 }
 0x3b3   :  { %9044 = vmatprep.subr.bf16.mxu0 %v10084_v58  ;;  %9064 = vmatprep.subr.bf16.mxu1 %v10085_v62 }
 0x3b6   :  { %9045 = vmatpush3.bf16.msra.mxu0 %v10086_v7  ;;  %9065 = vmatpush3.bf16.msra.mxu1 %v10087_v14 }
 0x3b7   :  { %9046 = vmatprep.subr.bf16.mxu0 %v10088_v3  ;;  %9066 = vmatprep.subr.bf16.mxu1 %v10089_v36  ;;  %v10098_v36 = vld [vmem:[#allocation9 + $0x4b0] sm:$0xff]  }
 0x3ba   :  { %9047 = vmatpush3.bf16.msra.mxu0 %v10090_v37  ;;  %9067 = vmatpush3.bf16.msra.mxu1 %v10091_v23 }
 0x3bb   :  { %9048 = vmatprep.subr.bf16.mxu0 %v10092_v27  ;;  %9068 = vmatprep.subr.bf16.mxu1 %v10093_v33  ;;  %v10100_v33 = vld [vmem:[#allocation9 + $0x4f8] sm:$0xff]  }
 0x3bc   :  { %v2486_v0 = vpop.f32.mrb[36].mxu0  ;;  %v2527_v61 = vpop.f32.mrb[24].mxu1 }
 0x3bd   :  { %v2487_v1 = vadd.f32 %v2486_v0, %v775_v44  ;;  %v2528_v52 = vadd.f32 %v2527_v61, %v783_v40  ;;  %v2488_v58 = vpop.f32.mrb[37].mxu0  ;;  %v2529_v15 = vpop.f32.mrb[25].mxu1 }
 0x3be   :  { %v2489_v62 = vadd.f32 %v2488_v58, %v779_v42  ;;  %v2530_v7 = vadd.f32 %v2529_v15, %v787_v47  ;;  %v2490_v14 = vpop.f32.mrb[38].mxu0  ;;  %v2531_v3 = vpop.f32.mrb[26].mxu1  ;;  %9049 = vmatpush3.bf16.msra.mxu0 %v10094_v48  ;;  %9069 = vmatpush3.bf16.msra.mxu1 %v10095_v31  ;;  %v10102_v48 = vld [vmem:[#allocation9 + $0x4b8] sm:$0xff]   ;;  %v10103_v31 = vld [vmem:[#allocation9 + $0x530] sm:$0xff]  }
 0x3bf   :  { %v2677_v45 = vadd.f32 3.0, %v2487_v1  ;;  %v2679_v37 = vadd.f32 3.0, %v2528_v52  ;;  %v2491_v23 = vpop.f32.mrb[39].mxu0  ;;  %v2532_v27 = vpop.f32.mrb[27].mxu1  ;;  %9050 = vmatprep.subr.bf16.mxu0 %v10096_v49  ;;  %9070 = vmatprep.subr.bf16.mxu1 %v10097_v54  ;;  %v10104_v14 = vld [vmem:[#allocation9 + $0x578] sm:$0xff]   ;;  %v10105_v3 = vld [vmem:[#allocation9 + $0x5c0] sm:$0xff]  }
 0x3c0   :  { %v2678_v44 = vadd.f32 3.0, %v2489_v62  ;;  %v2680_v40 = vadd.f32 3.0, %v2530_v7  ;;  %v10601_v54 = vmov 1983009808  }
 0x3c1   :  { %v2707_v0 = vmax.f32 %v2677_v45, 0.0  ;;  %v2709_v61 = vmax.f32 %v2679_v37, 0.0  ;;  %v2850_v23 = vunpack.c.l.s4 %v10601_v54  ;;  %v10114_v54 = vld [vmem:[#allocation9 + $0x590] sm:$0xff]  }
 0x3c2   :  { %v2708_v42 = vmax.f32 %v2678_v44, 0.0  ;;  %v2710_v47 = vmax.f32 %v2680_v40, 0.0  ;;  %9051 = vmatpush3.bf16.msra.mxu0 %v10098_v36  ;;  %9071 = vmatpush3.bf16.msra.mxu1 %v10099_v10  ;;  %v10106_v36 = vld [vmem:[#allocation9 + $0x538] sm:$0xff]   ;;  %v10107_v10 = vld [vmem:[#allocation9 + $0x580] sm:$0xff]   ;;  %v2809_v44 = vadd.f32 %v10942_v50, %v10853_v41 }
 0x3c3   :  { %v2737_v58 = vmin.f32 %v2707_v0, 6.0  ;;  %v2739_v15 = vmin.f32 %v2709_v61, 6.0  ;;  %9052 = vmatprep.subr.bf16.mxu0 %v10100_v33  ;;  %9072 = vmatprep.subr.bf16.mxu1 %v10101_v32  ;;  %v11022_v32 = vpack.c.bf16 %v10985_v46, %v10985_v46  ;;  %v2851_v0 = vunpack.c.0.s8 %v2850_v23  ;;  %v10115_v23 = vld [vmem:[#allocation9 + $0x608] sm:$0xff]  }
 0x3c4   :  { %v2738_v49 = vmin.f32 %v2708_v42, 6.0  ;;  %v2740_v27 = vmin.f32 %v2710_v47, 6.0  ;;  %v10111_v47 = vld [vmem:[#allocation9 + $0x600] sm:$0xff]  }
 0x3c5   :  { %v2767_v34 = vmul.f32 %v2737_v58, %v2487_v1  ;;  %v2769_v38 = vmul.f32 %v2739_v15, %v2528_v52  ;;  %v10108_v1 = vld [vmem:[#allocation9 + $0x5c8] sm:$0xff]   ;;  %v10109_v52 = vld [vmem:[#allocation9 + $0x640] sm:$0xff]  }
 0x3c6   :  { %v2768_v45 = vmul.f32 %v2738_v49, %v2489_v62  ;;  %v2770_v37 = vmul.f32 %v2740_v27, %v2530_v7  ;;  %9053 = vmatpush3.bf16.msra.mxu0 %v10102_v48  ;;  %9073 = vmatpush3.bf16.msra.mxu1 %v10103_v31  ;;  %v2810_v62 = vadd.f32 %v10946_v59, %v10815_v55  ;;  %v10113_v58 = vld [vmem:[#allocation9 + $0x648] sm:$0xff]   ;;  %v10116_v27 = vld [vmem:[#allocation9 + $0x5d8] sm:$0xff]  }
 0x3c7   :  { %v2797_v33 = vmul.f32 0.16666667, %v2767_v34  ;;  %v11024_v40 = vmul.f32 0.16666667, %v2769_v38  ;;  %9074 = vmatprep.subr.bf16.mxu1 %v10104_v14  ;;  %9082 = vmatprep.subr.bf16.mxu0 %v10105_v3  ;;  %v10110_v34 = vld [vmem:[#allocation9 + $0x588] sm:$0xff]  }
 0x3c8   :  { %v2798_v7 = vmul.f32 0.16666667, %v2768_v45  ;;  %v2800_v61 = vmul.f32 0.16666667, %v2770_v37  ;;  %v10117_v45 = vld [vmem:[#allocation9 + $0x650] sm:$0xff]  }
 0x3c9   :  { %v2817_v42 = vadd.f32 %v10911_v8, %v2797_v33  ;;  %v2819_v41 = vadd.f32 %v2809_v44, %v11024_v40  ;;  %4625 = vmatmul.mubr.bf16.vlgmr.msra.gmra.mrb[64].mxu0 %v11022_v32  ;;  %v11034_v55 = vpack.c.bf16 %v2797_v33, %v2797_v33  ;;  %v10112_v8 = vld [vmem:[#allocation9 + $0x5d0] sm:$0xff]   ;;  %v10120_v33 = vld [vmem:[#allocation9 + $0x5e0] sm:$0xff]  }
 0x3ca   :  { %v2818_v50 = vadd.f32 %v10915_v9, %v2798_v7  ;;  %v2820_v38 = vadd.f32 %v2810_v62, %v2800_v61  ;;  %9075 = vmatpush3.bf16.msra.mxu1 %v10106_v36  ;;  %9083 = vmatpush3.bf16.msra.mxu0 %v10107_v10  ;;  %v11032_v46 = vpack.c.bf16 %v2798_v7, %v2798_v7  ;;  %v10118_v36 = vld [vmem:[#allocation9 + $0x598] sm:$0xff]   ;;  %v10119_v10 = vld [vmem:[#allocation9 + $0x610] sm:$0xff]  }
 0x3cb   :  { %v2827_v48 = vmul.f32 0.33333334, %v2817_v42  ;;  %v2829_v59 = vmul.f32 0.33333334, %v2819_v41  ;;  %v11036_v31 = vpack.c.bf16 %v2800_v61, %v2800_v61  ;;  %9084 = vmatprep.subr.bf16.mxu0 %v10108_v1  ;;  %9104 = vmatprep.subr.bf16.mxu1 %v10109_v52  ;;  %v11039_v9 = vsub.s32 %v2851_v0, %v10741_v53  ;;  %v10121_v1 = vld [vmem:[#allocation9 + $0x658] sm:$0xff]   ;;  %v10122_v52 = vld [vmem:[#allocation9 + $0x5a0] sm:$0xff]  }
 0x3cc   :  { %v2828_v15 = vmul.f32 0.33333334, %v2818_v50  ;;  %v2830_v14 = vmul.f32 0.33333334, %v2820_v38  ;;  %5324 = vmatprep.mubr.bf16.mxu1 %v11032_v46  ;;  %v10123_v62 = vld [vmem:[#allocation9 + $0x618] sm:$0xff]   ;;  %v10124_v0 = vld [vmem:[#allocation9 + $0x5e8] sm:$0xff]  }
 0x3cd   :  { %5364 = vmatprep.mubr.bf16.mxu0 %v11036_v31  ;;  %5325 = vmatmul.mubr.bf16.vlgmr.msra.gmra.mrb[52].mxu1 %v11034_v55  ;;  %v11046_v7 = vld [vmem:[#allocation8 + $0x18] sm:$0x3f]  ;;  %v10125_v61 = vld [vmem:[#allocation9 + $0x660] sm:$0xff]  }
 0x3ce   :  { %v2847_v3 = vcombine.low %v2827_v48, %v2828_v15  ;;  %v2848_v49 = vcombine.low %v2829_v59, %v2830_v14  ;;  %9085 = vmatpush3.bf16.msra.mxu0 %v10110_v34  ;;  %9105 = vmatpush3.bf16.msra.mxu1 %v10111_v47  ;;  %v791_v42 = vrot.slane %v11046_v7, %v10790_v2  ;;  %v10126_v34 = vld [vmem:[#allocation9 + $0x5a8] sm:$0xff]   ;;  %v10127_v47 = vld [vmem:[#allocation9 + $0x620] sm:$0xff]   ;;  %v10128_v48 = vld [vmem:[#allocation9 + $0x5f0] sm:$0xff]  }
 0x3cf   :  { %9086 = vmatprep.subr.bf16.mxu0 %v10112_v8  ;;  %9106 = vmatprep.subr.bf16.mxu1 %v10113_v58  ;;  %v799_v41 = vrot.slane %v11046_v7, %v10811_v51  ;;  %v795_v50 = vrot.slane %v11046_v7, %v10795_v4  ;;  %v803_v38 = vrot.slane %v11046_v7, %v10798_v5  ;;  %v10129_v59 = vld [vmem:[#allocation9 + $0x668] sm:$0xff]   ;;  %v10130_v4 = vld [vmem:[#allocation9 + $0x5b0] sm:$0xff]  }
 0x3d0   :  { %v2855_v53 = vrot.slane %v2847_v3, %v11039_v9  ;;  %v2862_v37 = vrot.slane %v2848_v49, %v11039_v9  ;;  %v10131_v5 = vld [vmem:[#allocation9 + $0x628] sm:$0xff]  }
 0x3d2   :  { %9087 = vmatpush3.bf16.msra.mxu0 %v10114_v54  ;;  %9107 = vmatpush3.bf16.msra.mxu1 %v10115_v23  ;;  %v2863_v44 = vcombine.low %v2855_v53, %v2862_v37 }
 0x3d3   :  { %9088 = vmatprep.subr.bf16.mxu0 %v10116_v27  ;;  %9108 = vmatprep.subr.bf16.mxu1 %v10117_v45 }
 0x3d4   :  { %2892 = vst [vmem:[#allocation13] sm:$0xff] %v2863_v44  ;;  %v10133_v44 = vld [vmem:[#allocation9 + $0x670] sm:$0xff]  }
 0x3d6   :  { %9089 = vmatpush3.bf16.msra.mxu0 %v10118_v36  ;;  %9109 = vmatpush3.bf16.msra.mxu1 %v10119_v10  ;;  %v10132_v10 = vld [vmem:[#allocation9 + $0x5f8] sm:$0xff]  }
 0x3d7   :  { %9090 = vmatprep.subr.bf16.mxu0 %v10120_v33  ;;  %9110 = vmatprep.subr.bf16.mxu1 %v10121_v1 }
 0x3da   :  { %9091 = vmatpush3.bf16.msra.mxu0 %v10122_v52  ;;  %9111 = vmatpush3.bf16.msra.mxu1 %v10123_v62 }
 0x3db   :  { %9092 = vmatprep.subr.bf16.mxu0 %v10124_v0  ;;  %9112 = vmatprep.subr.bf16.mxu1 %v10125_v61 }
 0x3dc   :  { %v2568_v8 = vpop.f32.mrb[40].mxu0  ;;  %v2609_v58 = vpop.f32.mrb[28].mxu1 }
 0x3dd   :  { %v2569_v15 = vadd.f32 %v2568_v8, %v791_v42  ;;  %v2610_v14 = vadd.f32 %v2609_v58, %v799_v41  ;;  %v2570_v3 = vpop.f32.mrb[41].mxu0  ;;  %v2611_v51 = vpop.f32.mrb[29].mxu1  ;;  %v10134_v42 = vld [vmem:[#allocation9 + $0x5b8] sm:$0xff]   ;;  %v10135_v41 = vld [vmem:[#allocation9 + $0x630] sm:$0xff]  }
 0x3de   :  { %v2571_v49 = vadd.f32 %v2570_v3, %v795_v50  ;;  %v2612_v54 = vadd.f32 %v2611_v51, %v803_v38  ;;  %v2572_v23 = vpop.f32.mrb[42].mxu0  ;;  %v2613_v27 = vpop.f32.mrb[30].mxu1  ;;  %9093 = vmatpush3.bf16.msra.mxu0 %v10126_v34  ;;  %9113 = vmatpush3.bf16.msra.mxu1 %v10127_v47  ;;  %v10136_v34 = vld [vmem:[#allocation9 + $0x678] sm:$0xff]   ;;  %v10137_v47 = vld [vmem:[#allocation9 + $0x6c0] sm:$0xff]  }
 0x3df   :  { %v2681_v45 = vadd.f32 3.0, %v2569_v15  ;;  %v2683_v53 = vadd.f32 3.0, %v2610_v14  ;;  %v2573_v37 = vpop.f32.mrb[43].mxu0  ;;  %v2614_v36 = vpop.f32.mrb[31].mxu1  ;;  %9094 = vmatprep.subr.bf16.mxu0 %v10128_v48  ;;  %9114 = vmatprep.subr.bf16.mxu1 %v10129_v59  ;;  %v10138_v23 = vld [vmem:[#allocation9 + $0x638] sm:$0xff]   ;;  %v10139_v27 = vld [vmem:[#allocation9 + $0x680] sm:$0xff]  }
 0x3e0   :  { %v2682_v33 = vadd.f32 3.0, %v2571_v49  ;;  %v2684_v1 = vadd.f32 3.0, %v2612_v54 }
 0x3e1   :  { %v2711_v52 = vmax.f32 %v2681_v45, 0.0  ;;  %v2713_v62 = vmax.f32 %v2683_v53, 0.0 }
 0x3e2   :  { %v2712_v0 = vmax.f32 %v2682_v33, 0.0  ;;  %v2714_v61 = vmax.f32 %v2684_v1, 0.0  ;;  %9095 = vmatpush3.bf16.msra.mxu0 %v10130_v4  ;;  %9115 = vmatpush3.bf16.msra.mxu1 %v10131_v5  ;;  %v2813_v4 = vadd.f32 %v10983_v39, %v10897_v29  ;;  %v11060_v5 = vpack.c.bf16 %v11024_v40, %v11024_v40  ;;  %v10143_v33 = vld [vmem:[#allocation9 + $0x700] sm:$0xff]  }
 0x3e3   :  { %v2741_v50 = vmin.f32 %v2711_v52, 6.0  ;;  %v2743_v38 = vmin.f32 %v2713_v62, 6.0  ;;  %9096 = vmatprep.subr.bf16.mxu0 %v10132_v10  ;;  %9116 = vmatprep.subr.bf16.mxu1 %v10133_v44  ;;  %v10142_v44 = vld [vmem:[#allocation9 + $0x688] sm:$0xff]  }
 0x3e4   :  { %v2742_v48 = vmin.f32 %v2712_v0, 6.0  ;;  %v2744_v59 = vmin.f32 %v2714_v61, 6.0  ;;  %v10145_v62 = vld [vmem:[#allocation9 + $0x748] sm:$0xff]  }
 0x3e5   :  { %v2771_v8 = vmul.f32 %v2741_v50, %v2569_v15  ;;  %v2773_v58 = vmul.f32 %v2743_v38, %v2610_v14  ;;  %v10140_v15 = vld [vmem:[#allocation9 + $0x6c8] sm:$0xff]   ;;  %v10141_v14 = vld [vmem:[#allocation9 + $0x740] sm:$0xff]   ;;  %v10148_v38 = vld [vmem:[#allocation9 + $0x6d8] sm:$0xff]  }
 0x3e6   :  { %v2772_v3 = vmul.f32 %v2742_v48, %v2571_v49  ;;  %v2774_v51 = vmul.f32 %v2744_v59, %v2612_v54  ;;  %9097 = vmatpush3.bf16.msra.mxu0 %v10134_v42  ;;  %9117 = vmatpush3.bf16.msra.mxu1 %v10135_v41  ;;  %v2814_v49 = vadd.f32 %v10987_v28, %v10866_v20  ;;  %v10146_v41 = vld [vmem:[#allocation9 + $0x690] sm:$0xff]   ;;  %v10147_v50 = vld [vmem:[#allocation9 + $0x708] sm:$0xff]   ;;  %v10150_v59 = vld [vmem:[#allocation9 + $0x698] sm:$0xff]  }
 0x3e7   :  { %v2801_v45 = vmul.f32 0.16666667, %v2771_v8  ;;  %v11062_v53 = vmul.f32 0.16666667, %v2773_v58  ;;  %9118 = vmatprep.subr.bf16.mxu1 %v10136_v34  ;;  %9126 = vmatprep.subr.bf16.mxu0 %v10137_v47  ;;  %v10149_v34 = vld [vmem:[#allocation9 + $0x750] sm:$0xff]  }
 0x3e8   :  { %v2802_v54 = vmul.f32 0.16666667, %v2772_v3  ;;  %v2804_v37 = vmul.f32 0.16666667, %v2774_v51  ;;  %v10151_v8 = vld [vmem:[#allocation9 + $0x710] sm:$0xff]   ;;  %v10152_v3 = vld [vmem:[#allocation9 + $0x6e0] sm:$0xff]  }
 0x3e9   :  { %v2821_v36 = vadd.f32 %v10950_v11, %v2801_v45  ;;  %v2823_v29 = vadd.f32 %v2813_v4, %v11062_v53  ;;  %5365 = vmatmul.mubr.bf16.vlgmr.msra.gmra.mrb[68].mxu0 %v11060_v5  ;;  %v11072_v52 = vpack.c.bf16 %v2801_v45, %v2801_v45  ;;  %v10144_v11 = vld [vmem:[#allocation9 + $0x6d0] sm:$0xff]   ;;  %v10153_v51 = vld [vmem:[#allocation9 + $0x758] sm:$0xff]   ;;  %v10156_v4 = vld [vmem:[#allocation9 + $0x6e8] sm:$0xff]  }
 0x3ea   :  { %v2822_v39 = vadd.f32 %v10954_v6, %v2802_v54  ;;  %v2824_v40 = vadd.f32 %v2814_v49, %v2804_v37  ;;  %9119 = vmatpush3.bf16.msra.mxu1 %v10138_v23  ;;  %9127 = vmatpush3.bf16.msra.mxu0 %v10139_v27  ;;  %v11070_v10 = vpack.c.bf16 %v2802_v54, %v2802_v54  ;;  %v10154_v23 = vld [vmem:[#allocation9 + $0x6a0] sm:$0xff]   ;;  %v10155_v27 = vld [vmem:[#allocation9 + $0x718] sm:$0xff]   ;;  %v10160_v54 = vld [vmem:[#allocation9 + $0x6f0] sm:$0xff]  }
 0x3eb   :  { %v2831_v1 = vmul.f32 0.33333334, %v2821_v36  ;;  %v2833_v20 = vmul.f32 0.33333334, %v2823_v29  ;;  %v11074_v28 = vpack.c.bf16 %v2804_v37, %v2804_v37  ;;  %9128 = vmatprep.subr.bf16.mxu0 %v10140_v15  ;;  %9148 = vmatprep.subr.bf16.mxu1 %v10141_v14  ;;  %v10157_v45 = vld [vmem:[#allocation9 + $0x760] sm:$0xff]   ;;  %v811_v15 = vrot.slane %v11046_v7, %v10840_v16  ;;  %v10158_v14 = vld [vmem:[#allocation9 + $0x6a8] sm:$0xff]  }
 0x3ec   :  { %v2832_v0 = vmul.f32 0.33333334, %v2822_v39  ;;  %v2834_v61 = vmul.f32 0.33333334, %v2824_v40  ;;  %5404 = vmatprep.mubr.bf16.mxu1 %v11070_v10  ;;  %v10159_v49 = vld [vmem:[#allocation9 + $0x720] sm:$0xff]   ;;  %v10161_v37 = vld [vmem:[#allocation9 + $0x768] sm:$0xff]  }
 0x3ed   :  { %5444 = vmatprep.mubr.bf16.mxu0 %v11074_v28  ;;  %5405 = vmatmul.mubr.bf16.vlgmr.msra.gmra.mrb[56].mxu1 %v11072_v52  ;;  %v10164_v16 = vld [vmem:[#allocation9 + $0x6f8] sm:$0xff]  }
 0x3ee   :  { %v2864_v6 = vcombine.low %v2831_v1, %v2832_v0  ;;  %v2865_v42 = vcombine.low %v2833_v20, %v2834_v61  ;;  %9129 = vmatpush3.bf16.msra.mxu0 %v10142_v44  ;;  %9149 = vmatpush3.bf16.msra.mxu1 %v10143_v33  ;;  %v10162_v33 = vld [vmem:[#allocation9 + $0x6b0] sm:$0xff]  }
 0x3ef   :  { %9130 = vmatprep.subr.bf16.mxu0 %v10144_v11  ;;  %9150 = vmatprep.subr.bf16.mxu1 %v10145_v62 }
 0x3f0   :  { %v2872_v47 = vrot.slane %v2864_v6, %v11039_v9  ;;  %v2879_v48 = vrot.slane %v2865_v42, %v11039_v9  ;;  %v807_v9 = vrot.slane %v11046_v7, %v10837_v13  ;;  %v10163_v13 = vld [vmem:[#allocation9 + $0x728] sm:$0xff]   ;;  %v10165_v7 = vld [vmem:[#allocation9 + $0x770] sm:$0xff]  }
 0x3f2   :  { %9131 = vmatpush3.bf16.msra.mxu0 %v10146_v41  ;;  %9151 = vmatpush3.bf16.msra.mxu1 %v10147_v50  ;;  %v2880_v58 = vcombine.low %v2872_v47, %v2879_v48  ;;  %v10166_v50 = vld [vmem:[#allocation9 + $0x6b8] sm:$0xff]  }
 0x3f3   :  { %9132 = vmatprep.subr.bf16.mxu0 %v10148_v38  ;;  %9152 = vmatprep.subr.bf16.mxu1 %v10149_v34  ;;  %v10167_v38 = vld [vmem:[#allocation9 + $0x730] sm:$0xff]   ;;  %v10168_v48 = vld [vmem:[#allocation9 + $0x778] sm:$0xff]  }
 0x3f4   :  { %2893 = vst [vmem:[#allocation13 + $0x8] sm:$0xff] %v2880_v58 }
 0x3f6   :  { %9133 = vmatpush3.bf16.msra.mxu0 %v10150_v59  ;;  %9153 = vmatpush3.bf16.msra.mxu1 %v10151_v8  ;;  %v10169_v59 = vld [vmem:[#allocation9 + $0x7c0] sm:$0xff]  }
 0x3f7   :  { %9134 = vmatprep.subr.bf16.mxu0 %v10152_v3  ;;  %9154 = vmatprep.subr.bf16.mxu1 %v10153_v51  ;;  %v10170_v51 = vld [vmem:[#allocation9 + $0x738] sm:$0xff]  }
 0x3fa   :  { %9135 = vmatpush3.bf16.msra.mxu0 %v10154_v23  ;;  %9155 = vmatpush3.bf16.msra.mxu1 %v10155_v27  ;;  %v10171_v23 = vld [vmem:[#allocation9 + $0x780] sm:$0xff]   ;;  %v11089_v27 = vpack.c.bf16 %v11062_v53, %v11062_v53 }
 0x3fb   :  { %9136 = vmatprep.subr.bf16.mxu0 %v10156_v4  ;;  %9156 = vmatprep.subr.bf16.mxu1 %v10157_v45  ;;  %v10172_v45 = vld [vmem:[#allocation9 + $0x7c8] sm:$0xff]  }
 0x3fc   :  { %v2650_v36 = vpop.f32.mrb[44].mxu0 }
 0x3fd   :  { %v2651_v29 = vadd.f32 %v2650_v36, %v807_v9  ;;  %v2652_v39 = vpop.f32.mrb[45].mxu0  ;;  %v10175_v36 = vld [vmem:[#allocation9 + $0x800] sm:$0xff]  }
 0x3fe   :  { %v2653_v40 = vadd.f32 %v2652_v39, %v811_v15  ;;  %v2654_v44 = vpop.f32.mrb[46].mxu0  ;;  %9137 = vmatpush3.bf16.msra.mxu0 %v10158_v14  ;;  %9157 = vmatpush3.bf16.msra.mxu1 %v10159_v49  ;;  %v10173_v15 = vld [vmem:[#allocation9 + $0x840] sm:$0xff]   ;;  %v10176_v39 = vld [vmem:[#allocation9 + $0x7d0] sm:$0xff]  }
 0x3ff   :  { %v2685_v1 = vadd.f32 3.0, %v2651_v29  ;;  %v2655_v20 = vpop.f32.mrb[47].mxu0  ;;  %9138 = vmatprep.subr.bf16.mxu0 %v10160_v54  ;;  %9158 = vmatprep.subr.bf16.mxu1 %v10161_v37  ;;  %v10174_v37 = vld [vmem:[#allocation9 + $0x788] sm:$0xff]   ;;  %v10178_v44 = vld [vmem:[#allocation9 + $0x790] sm:$0xff]  }
 0x400   :  { %v2686_v11 = vadd.f32 3.0, %v2653_v40  ;;  %v8856_v62 = vpop.f32.mrb[32].mxu1  ;;  %v10183_v20 = vld [vmem:[#allocation9 + $0x810] sm:$0xff]  }
 0x401   :  { %v2715_v0 = vmax.f32 %v2685_v1, 0.0  ;;  %v8857_v61 = vpop.f32.mrb[33].mxu1  ;;  %v10181_v1 = vld [vmem:[#allocation9 + $0x850] sm:$0xff]  }
 0x402   :  { %v2716_v6 = vmax.f32 %v2686_v11, 0.0  ;;  %v11085_v42 = vadd.f32 %v8857_v61, %v8856_v62  ;;  %9139 = vmatpush3.bf16.msra.mxu0 %v10162_v33  ;;  %9159 = vmatpush3.bf16.msra.mxu1 %v10163_v13  ;;  %v8859_v41 = vpop.f32.mrb[34].mxu1  ;;  %v10179_v33 = vld [vmem:[#allocation9 + $0x808] sm:$0xff]   ;;  %v10180_v13 = vld [vmem:[#allocation9 + $0x7d8] sm:$0xff]   ;;  %v10186_v11 = vld [vmem:[#allocation9 + $0x7a0] sm:$0xff]  }
 0x403   :  { %v2745_v34 = vmin.f32 %v2715_v0, 6.0  ;;  %v8860_v47 = vpop.f32.mrb[35].mxu1  ;;  %9140 = vmatprep.subr.bf16.mxu0 %v10164_v16  ;;  %9160 = vmatprep.subr.bf16.mxu1 %v10165_v7  ;;  %v10184_v16 = vld [vmem:[#allocation9 + $0x7e0] sm:$0xff]   ;;  %v10185_v7 = vld [vmem:[#allocation9 + $0x858] sm:$0xff]   ;;  %v10190_v61 = vld [vmem:[#allocation9 + $0x7a8] sm:$0xff]  }
 0x404   :  { %v2746_v8 = vmin.f32 %v2716_v6, 6.0  ;;  %v10187_v62 = vld [vmem:[#allocation9 + $0x818] sm:$0xff]   ;;  %v10189_v0 = vld [vmem:[#allocation9 + $0x860] sm:$0xff]  }
 0x405   :  { %v2775_v58 = vmul.f32 %v2745_v34, %v2651_v29  ;;  %v10191_v6 = vld [vmem:[#allocation9 + $0x820] sm:$0xff]  }
 0x406   :  { %v2776_v3 = vmul.f32 %v2746_v8, %v2653_v40  ;;  %9141 = vmatpush3.bf16.msra.mxu0 %v10166_v50  ;;  %9161 = vmatpush3.bf16.msra.mxu1 %v10167_v38  ;;  %v8338_v41 = vld [vmem:[#allocation11] ss:$0 sm:$0xff]  ;;  %v10192_v50 = vld [vmem:[#allocation9 + $0x7f0] sm:$0xff]   ;;  %v10193_v38 = vld [vmem:[#allocation9 + $0x868] sm:$0xff]  }
 0x407   :  { %v2805_v4 = vmul.f32 0.16666667, %v2775_v58  ;;  %9162 = vmatprep.subr.bf16.mxu1 %v10168_v48  ;;  %9170 = vmatprep.subr.bf16.mxu0 %v10169_v59  ;;  %v3607_v48 = vadd.f32 %v11085_v42, %v8338_v41  ;;  %v10194_v58 = vld [vmem:[#allocation9 + $0x7b0] sm:$0xff]   ;;  %v10222_v41 = vld [vmem:[#allocation9 + $0x8a8] sm:$0xff]  }
 0x408   :  { %v2806_v9 = vmul.f32 0.16666667, %v2776_v3  ;;  %v10195_v3 = vld [vmem:[#allocation9 + $0x828] sm:$0xff]   ;;  %v10199_v42 = vld [vmem:[#allocation9 + $0x830] sm:$0xff]  }
 0x409   :  { %v2825_v14 = vadd.f32 %v10991_v19, %v2805_v4  ;;  %5445 = vmatmul.mubr.bf16.vlgmr.msra.gmra.mrb[72].mxu0 %v11089_v27  ;;  %v11096_v29 = vpack.c.bf16 %v2805_v4, %v2805_v4  ;;  %v10177_v19 = vld [vmem:[#allocation9 + $0x848] sm:$0xff]   ;;  %v10197_v4 = vld [vmem:[#allocation9 + $0x870] sm:$0xff]  }
 0x40a   :  { %v2826_v49 = vadd.f32 %v10995_v43, %v2806_v9  ;;  %9163 = vmatpush3.bf16.msra.mxu1 %v10170_v51  ;;  %9171 = vmatpush3.bf16.msra.mxu0 %v10171_v23  ;;  %v11094_v54 = vpack.c.bf16 %v2806_v9, %v2806_v9  ;;  %v10196_v23 = vld [vmem:[#allocation9 + $0x7f8] sm:$0xff]  }
 0x40b   :  { %v2835_v53 = vmul.f32 0.33333334, %v2825_v14  ;;  %7473 = vmatprep.mubr.bf16.mxu0 %v10820_v56  ;;  %9172 = vmatprep.subr.bf16.mxu0 %v10172_v45  ;;  %v10182_v56 = vld [vmem:[#allocation9 + $0x798] sm:$0xff]  }
 0x40c   :  { %v2836_v40 = vmul.f32 0.33333334, %v2826_v49  ;;  %5484 = vmatprep.mubr.bf16.mxu1 %v11094_v54  ;;  %9192 = vmatprep.subr.bf16.mxu1 %v10173_v15 }
 0x40d   :  { %5485 = vmatmul.mubr.bf16.vlgmr.msra.gmra.mrb[60].mxu1 %v11096_v29 }
 0x40e   :  { %v2881_v43 = vcombine.low %v2835_v53, %v2836_v40  ;;  %9173 = vmatpush3.bf16.msra.mxu0 %v10174_v37  ;;  %9193 = vmatpush3.bf16.msra.mxu1 %v10175_v36  ;;  %v10198_v37 = vld [vmem:[#allocation9 + $0x7b8] sm:$0xff]  }
 0x40f   :  { %7513 = vmatprep.mubr.bf16.mxu1 %v10824_v57  ;;  %9174 = vmatprep.subr.bf16.mxu0 %v10176_v39  ;;  %v10188_v57 = vld [vmem:[#allocation9 + $0x7e8] sm:$0xff]   ;;  %v10200_v53 = vld [vmem:[#allocation9 + $0x878] sm:$0xff]   ;;  %v10201_v39 = vld [vmem:[#allocation9 + $0x8c0] sm:$0xff]  }
 0x410   :  { %8337 = vst.sshfl [vmem:[#allocation13 + $0x10] sm:$0x33 pattern:$0x76325410] %v2881_v43  ;;  %9194 = vmatprep.subr.bf16.mxu1 %v10177_v19  ;;  %v10202_v19 = vld [vmem:[#allocation9 + $0x838] sm:$0xff]   ;;  %v10203_v43 = vld [vmem:[#allocation9 + $0x880] sm:$0xff]  }
 0x412   :  { %9175 = vmatpush3.bf16.msra.mxu0 %v10178_v44  ;;  %9195 = vmatpush3.bf16.msra.mxu1 %v10179_v33  ;;  %v10204_v44 = vld [vmem:[#allocation9 + $0x8c8] sm:$0xff]   ;;  %v10205_v33 = vld [vmem:[#allocation9 + $0x940] sm:$0xff]  }
 0x413   :  { %9176 = vmatprep.subr.bf16.mxu0 %v10180_v13  ;;  %9196 = vmatprep.subr.bf16.mxu1 %v10181_v1  ;;  %v10206_v13 = vld [vmem:[#allocation9 + $0x888] sm:$0xff]   ;;  %v10207_v1 = vld [vmem:[#allocation9 + $0x900] sm:$0xff]  }
 0x416   :  { %9177 = vmatpush3.bf16.msra.mxu0 %v10182_v56  ;;  %9197 = vmatpush3.bf16.msra.mxu1 %v10183_v20  ;;  %v10208_v56 = vld [vmem:[#allocation9 + $0x8d0] sm:$0xff]   ;;  %v10209_v20 = vld [vmem:[#allocation9 + $0x948] sm:$0xff]  }
 0x417   :  { %9178 = vmatprep.subr.bf16.mxu0 %v10184_v16  ;;  %9198 = vmatprep.subr.bf16.mxu1 %v10185_v7  ;;  %v10210_v16 = vld [vmem:[#allocation9 + $0x890] sm:$0xff]   ;;  %v10211_v7 = vld [vmem:[#allocation9 + $0x908] sm:$0xff]  }
 0x41a   :  { %9179 = vmatpush3.bf16.msra.mxu0 %v10186_v11  ;;  %9199 = vmatpush3.bf16.msra.mxu1 %v10187_v62  ;;  %v10213_v11 = vld [vmem:[#allocation9 + $0x950] sm:$0xff]   ;;  %v10214_v62 = vld [vmem:[#allocation9 + $0x898] sm:$0xff]  }
 0x41b   :  { %9180 = vmatprep.subr.bf16.mxu0 %v10188_v57  ;;  %9200 = vmatprep.subr.bf16.mxu1 %v10189_v0  ;;  %v10216_v57 = vld [vmem:[#allocation9 + $0x8e0] sm:$0xff]   ;;  %v10217_v0 = vld [vmem:[#allocation9 + $0x958] sm:$0xff]  }
 0x41c   :  { %v8878_v34 = vpop.f32.mrb[48].mxu0 }
 0x41d   :  { %v8879_v47 = vpop.f32.mrb[49].mxu0 }
 0x41e   :  { %v8880_v59 = vadd.f32 %v8879_v47, %v8878_v34  ;;  %v8881_v8 = vpop.f32.mrb[50].mxu0  ;;  %9181 = vmatpush3.bf16.msra.mxu0 %v10190_v61  ;;  %9201 = vmatpush3.bf16.msra.mxu1 %v10191_v6  ;;  %v10219_v61 = vld [vmem:[#allocation9 + $0x918] sm:$0xff]   ;;  %v10220_v6 = vld [vmem:[#allocation9 + $0x8e8] sm:$0xff]  }
 0x41f   :  { %v8882_v51 = vpop.f32.mrb[51].mxu0  ;;  %9182 = vmatprep.subr.bf16.mxu0 %v10192_v50  ;;  %9202 = vmatprep.subr.bf16.mxu1 %v10193_v38  ;;  %v10223_v50 = vld [vmem:[#allocation9 + $0x920] sm:$0xff]   ;;  %v10224_v38 = vld [vmem:[#allocation9 + $0x8f0] sm:$0xff]   ;;  %v10225_v34 = vld [vmem:[#allocation9 + $0x968] sm:$0xff]  }
 0x420   :  { %v3647_v45 = vadd.f32 %v8880_v59, %v3607_v48  ;;  %v8900_v9 = vpop.f32.mrb[36].mxu1 }
 0x421   :  { %v8901_v15 = vpop.f32.mrb[37].mxu1 }
 0x422   :  { %v8902_v14 = vadd.f32 %v8901_v15, %v8900_v9  ;;  %v8903_v49 = vpop.f32.mrb[38].mxu1  ;;  %9183 = vmatpush3.bf16.msra.mxu0 %v10194_v58  ;;  %9203 = vmatpush3.bf16.msra.mxu1 %v10195_v3  ;;  %v10226_v58 = vld [vmem:[#allocation9 + $0x8b0] sm:$0xff]   ;;  %v10227_v3 = vld [vmem:[#allocation9 + $0x928] sm:$0xff]  }
 0x423   :  { %v8904_v36 = vpop.f32.mrb[39].mxu1  ;;  %9184 = vmatprep.subr.bf16.mxu0 %v10196_v23  ;;  %9204 = vmatprep.subr.bf16.mxu1 %v10197_v4  ;;  %v10228_v23 = vld [vmem:[#allocation9 + $0x8f8] sm:$0xff]   ;;  %v10229_v4 = vld [vmem:[#allocation9 + $0x970] sm:$0xff]  }
 0x424   :  { %v11103_v40 = vadd.f32 %v8902_v14, %v3647_v45 }
 0x426   :  { %9185 = vmatpush3.bf16.msra.mxu0 %v10198_v37  ;;  %9205 = vmatpush3.bf16.msra.mxu1 %v10199_v42  ;;  %v10230_v37 = vld [vmem:[#allocation9 + $0x8b8] sm:$0xff]   ;;  %v10231_v42 = vld [vmem:[#allocation9 + $0x930] sm:$0xff]  }
 0x427   :  { %9206 = vmatprep.subr.bf16.mxu1 %v10200_v53  ;;  %9214 = vmatprep.subr.bf16.mxu0 %v10201_v39  ;;  %v10232_v53 = vld [vmem:[#allocation9 + $0x978] sm:$0xff]  }
 0x429   :  { %7474 = vmatmul.mubr.bf16.vlgmr.msra.gmra.mrb[76].mxu0 %v10828_v60  ;;  %v10212_v60 = vld [vmem:[#allocation9 + $0x8d8] sm:$0xff]  }
 0x42a   :  { %9207 = vmatpush3.bf16.msra.mxu1 %v10202_v19  ;;  %9215 = vmatpush3.bf16.msra.mxu0 %v10203_v43  ;;  %v10233_v19 = vld [vmem:[#allocation9 + $0x9c0] sm:$0xff]   ;;  %v10234_v43 = vld [vmem:[#allocation9 + $0x938] sm:$0xff]  }
 0x42b   :  { %7553 = vmatprep.mubr.bf16.mxu0 %v10871_v21  ;;  %9216 = vmatprep.subr.bf16.mxu0 %v10204_v44  ;;  %v10215_v21 = vld [vmem:[#allocation9 + $0x910] sm:$0xff]   ;;  %v10235_v44 = vld [vmem:[#allocation9 + $0x980] sm:$0xff]  }
 0x42c   :  { %9236 = vmatprep.subr.bf16.mxu1 %v10205_v33  ;;  %v10236_v33 = vld [vmem:[#allocation9 + $0x9c8] sm:$0xff]  }
 0x42d   :  { %7514 = vmatmul.mubr.bf16.vlgmr.msra.gmra.mrb[64].mxu1 %v10857_v12  ;;  %v10218_v12 = vld [vmem:[#allocation9 + $0x8a0] sm:$0xff]  }
 0x42e   :  { %9217 = vmatpush3.bf16.msra.mxu0 %v10206_v13  ;;  %9237 = vmatpush3.bf16.msra.mxu1 %v10207_v1  ;;  %v10237_v13 = vld [vmem:[#allocation9 + $0xa40] sm:$0xff]   ;;  %v10238_v1 = vld [vmem:[#allocation9 + $0x988] sm:$0xff]  }
 0x42f   :  { %7593 = vmatprep.mubr.bf16.mxu1 %v10875_v22  ;;  %9218 = vmatprep.subr.bf16.mxu0 %v10208_v56  ;;  %v10221_v22 = vld [vmem:[#allocation9 + $0x960] sm:$0xff]  }
 0x430   :  { %9238 = vmatprep.subr.bf16.mxu1 %v10209_v20  ;;  %v10239_v56 = vld [vmem:[#allocation9 + $0xa00] sm:$0xff]   ;;  %v10240_v20 = vld [vmem:[#allocation9 + $0x9d0] sm:$0xff]  }
 0x432   :  { %9219 = vmatpush3.bf16.msra.mxu0 %v10210_v16  ;;  %9239 = vmatpush3.bf16.msra.mxu1 %v10211_v7  ;;  %v10241_v16 = vld [vmem:[#allocation9 + $0xa48] sm:$0xff]   ;;  %v10242_v7 = vld [vmem:[#allocation9 + $0x990] sm:$0xff]  }
 0x433   :  { %9220 = vmatprep.subr.bf16.mxu0 %v10212_v60  ;;  %9240 = vmatprep.subr.bf16.mxu1 %v10213_v11  ;;  %v10243_v60 = vld [vmem:[#allocation9 + $0xa08] sm:$0xff]   ;;  %v10245_v11 = vld [vmem:[#allocation9 + $0xa50] sm:$0xff]  }
 0x436   :  { %9221 = vmatpush3.bf16.msra.mxu0 %v10214_v62  ;;  %9241 = vmatpush3.bf16.msra.mxu1 %v10215_v21  ;;  %v10246_v62 = vld [vmem:[#allocation9 + $0x998] sm:$0xff]   ;;  %v10248_v21 = vld [vmem:[#allocation9 + $0x9e0] sm:$0xff]  }
 0x437   :  { %9222 = vmatprep.subr.bf16.mxu0 %v10216_v57  ;;  %9242 = vmatprep.subr.bf16.mxu1 %v10217_v0  ;;  %v10249_v57 = vld [vmem:[#allocation9 + $0xa58] sm:$0xff]  }
 0x438   :  { %v10251_v0 = vld [vmem:[#allocation9 + $0xa18] sm:$0xff]  }
 0x43a   :  { %9223 = vmatpush3.bf16.msra.mxu0 %v10218_v12  ;;  %9243 = vmatpush3.bf16.msra.mxu1 %v10219_v61  ;;  %v10252_v12 = vld [vmem:[#allocation9 + $0x9e8] sm:$0xff]  }
 0x43b   :  { %9224 = vmatprep.subr.bf16.mxu0 %v10220_v6  ;;  %9244 = vmatprep.subr.bf16.mxu1 %v10221_v22  ;;  %v10254_v61 = vld [vmem:[#allocation9 + $0x9a8] sm:$0xff]   ;;  %v10255_v6 = vld [vmem:[#allocation9 + $0xa20] sm:$0xff]   ;;  %v10256_v22 = vld [vmem:[#allocation9 + $0x9f0] sm:$0xff]  }
 0x43c   :  { %v8922_v47 = vpop.f32.mrb[52].mxu0 }
 0x43d   :  { %v8923_v48 = vpop.f32.mrb[53].mxu0 }
 0x43e   :  { %v8924_v59 = vadd.f32 %v8923_v48, %v8922_v47  ;;  %v8925_v8 = vpop.f32.mrb[54].mxu0  ;;  %9225 = vmatpush3.bf16.msra.mxu0 %v10222_v41  ;;  %9245 = vmatpush3.bf16.msra.mxu1 %v10223_v50  ;;  %v10257_v41 = vld [vmem:[#allocation9 + $0xa68] sm:$0xff]   ;;  %v10258_v48 = vld [vmem:[#allocation9 + $0x9b0] sm:$0xff]  }
 0x43f   :  { %v8926_v51 = vpop.f32.mrb[55].mxu0  ;;  %9226 = vmatprep.subr.bf16.mxu0 %v10224_v38  ;;  %9246 = vmatprep.subr.bf16.mxu1 %v10225_v34  ;;  %v8419_v8 = vld [vmem:[#allocation11 + $0x1] ss:$0 sm:$0xff] }
 0x440   :  { %v3727_v45 = vadd.f32 %v8924_v59, %v11103_v40  ;;  %v8944_v9 = vpop.f32.mrb[40].mxu1  ;;  %v10259_v59 = vld [vmem:[#allocation9 + $0xa28] sm:$0xff]   ;;  %v10261_v51 = vld [vmem:[#allocation9 + $0xa70] sm:$0xff]  }
 0x441   :  { %v8945_v15 = vpop.f32.mrb[41].mxu1 }
 0x442   :  { %v8946_v14 = vadd.f32 %v8945_v15, %v8944_v9  ;;  %v8947_v49 = vpop.f32.mrb[42].mxu1  ;;  %9227 = vmatpush3.bf16.msra.mxu0 %v10226_v58  ;;  %9247 = vmatpush3.bf16.msra.mxu1 %v10227_v3  ;;  %v10260_v3 = vld [vmem:[#allocation9 + $0x9f8] sm:$0xff]  }
 0x443   :  { %v8948_v36 = vpop.f32.mrb[43].mxu1  ;;  %9228 = vmatprep.subr.bf16.mxu0 %v10228_v23  ;;  %9248 = vmatprep.subr.bf16.mxu1 %v10229_v4  ;;  %v10263_v49 = vld [vmem:[#allocation9 + $0xa30] sm:$0xff]  }
 0x444   :  { %v11110_v39 = vadd.f32 %v8946_v14, %v3727_v45  ;;  %v10262_v14 = vld [vmem:[#allocation9 + $0x9b8] sm:$0xff]   ;;  %v10265_v36 = vld [vmem:[#allocation9 + $0xac0] sm:$0xff]  }
 0x446   :  { %9229 = vmatpush3.bf16.msra.mxu0 %v10230_v37  ;;  %9249 = vmatpush3.bf16.msra.mxu1 %v10231_v42  ;;  %v3773_v40 = vsel %vm3772_vm6, %v11110_v39, -inf  ;;  %v10264_v42 = vld [vmem:[#allocation9 + $0xa78] sm:$0xff]  }
 0x447   :  { %3774 = vmax.xlane.f32.xlu0 %v3773_v40  ;;  %9250 = vmatprep.subr.bf16.mxu1 %v10232_v53  ;;  %v10267_v40 = vld [vmem:[#allocation9 + $0xa80] sm:$0xff]  }
 0x448   :  { %9258 = vmatprep.subr.bf16.mxu0 %v10233_v19  ;;  %v10266_v19 = vld [vmem:[#allocation9 + $0xa38] sm:$0xff]  }
 0x449   :  { %7554 = vmatmul.mubr.bf16.vlgmr.msra.gmra.mrb[80].mxu0 %v10879_v25  ;;  %v10244_v25 = vld [vmem:[#allocation9 + $0x9d8] sm:$0xff]  }
 0x44a   :  { %9251 = vmatpush3.bf16.msra.mxu1 %v10234_v43  ;;  %9259 = vmatpush3.bf16.msra.mxu0 %v10235_v44  ;;  %v10268_v43 = vld [vmem:[#allocation9 + $0xac8] sm:$0xff]   ;;  %v10269_v44 = vld [vmem:[#allocation9 + $0xb40] sm:$0xff]  }
 0x44b   :  { %7633 = vmatprep.mubr.bf16.mxu0 %v10919_v17  ;;  %9260 = vmatprep.subr.bf16.mxu0 %v10236_v33  ;;  %v10247_v17 = vld [vmem:[#allocation9 + $0xa10] sm:$0xff]   ;;  %v10270_v33 = vld [vmem:[#allocation9 + $0xa88] sm:$0xff]  }
 0x44c   :  { %9280 = vmatprep.subr.bf16.mxu1 %v10237_v13  ;;  %v10271_v13 = vld [vmem:[#allocation9 + $0xb00] sm:$0xff]  }
 0x44d   :  { %7594 = vmatmul.mubr.bf16.vlgmr.msra.gmra.mrb[68].mxu1 %v10901_v63  ;;  %v10250_v63 = vld [vmem:[#allocation9 + $0x9a0] sm:$0xff]  }
 0x44e   :  { %9261 = vmatpush3.bf16.msra.mxu0 %v10238_v1  ;;  %9281 = vmatpush3.bf16.msra.mxu1 %v10239_v56  ;;  %v10272_v1 = vld [vmem:[#allocation9 + $0xad0] sm:$0xff]   ;;  %v10273_v56 = vld [vmem:[#allocation9 + $0xb48] sm:$0xff]  }
 0x44f   :  { %7673 = vmatprep.mubr.bf16.mxu1 %v10921_v18  ;;  %9262 = vmatprep.subr.bf16.mxu0 %v10240_v20  ;;  %v10253_v18 = vld [vmem:[#allocation9 + $0xa60] sm:$0xff]   ;;  %v10274_v20 = vld [vmem:[#allocation9 + $0xa90] sm:$0xff]  }
 0x450   :  { %9282 = vmatprep.subr.bf16.mxu1 %v10241_v16  ;;  %v10275_v16 = vld [vmem:[#allocation9 + $0xb08] sm:$0xff]  }
 0x452   :  { %9263 = vmatpush3.bf16.msra.mxu0 %v10242_v7  ;;  %9283 = vmatpush3.bf16.msra.mxu1 %v10243_v60  ;;  %v11221_v7 = vld [vmem:[#allocation21_spill] sm:$0xff]  ;;  %v10277_v60 = vld [vmem:[#allocation9 + $0xb50] sm:$0xff]  }
 0x453   :  { %9264 = vmatprep.subr.bf16.mxu0 %v10244_v25  ;;  %9284 = vmatprep.subr.bf16.mxu1 %v10245_v11  ;;  %v10278_v25 = vld [vmem:[#allocation9 + $0xa98] sm:$0xff]   ;;  %v10280_v11 = vld [vmem:[#allocation9 + $0xae0] sm:$0xff]  }
 0x456   :  { %9265 = vmatpush3.bf16.msra.mxu0 %v10246_v62  ;;  %9285 = vmatpush3.bf16.msra.mxu1 %v10247_v17  ;;  %v10281_v62 = vld [vmem:[#allocation9 + $0xb58] sm:$0xff]  }
 0x457   :  { %9266 = vmatprep.subr.bf16.mxu0 %v10248_v21  ;;  %9286 = vmatprep.subr.bf16.mxu1 %v10249_v57  ;;  %v10283_v17 = vld [vmem:[#allocation9 + $0xb18] sm:$0xff]   ;;  %v10284_v21 = vld [vmem:[#allocation9 + $0xae8] sm:$0xff]   ;;  %v10285_v57 = vld [vmem:[#allocation9 + $0xb60] sm:$0xff]  }
 0x45a   :  { %9267 = vmatpush3.bf16.msra.mxu0 %v10250_v63  ;;  %9287 = vmatpush3.bf16.msra.mxu1 %v10251_v0  ;;  %v10286_v63 = vld [vmem:[#allocation9 + $0xaa8] sm:$0xff]   ;;  %v10287_v0 = vld [vmem:[#allocation9 + $0xb20] sm:$0xff]  }
 0x45b   :  { %9268 = vmatprep.subr.bf16.mxu0 %v10252_v12  ;;  %9288 = vmatprep.subr.bf16.mxu1 %v10253_v18  ;;  %v10288_v12 = vld [vmem:[#allocation9 + $0xaf0] sm:$0xff]   ;;  %v10289_v18 = vld [vmem:[#allocation9 + $0xb68] sm:$0xff]  }
 0x45c   :  { %v8966_v50 = vpop.f32.mrb[56].mxu0 }
 0x45d   :  { %v8967_v38 = vpop.f32.mrb[57].mxu0 }
 0x45e   :  { %v8968_v34 = vadd.f32 %v8967_v38, %v8966_v50  ;;  %v8969_v47 = vpop.f32.mrb[58].mxu0  ;;  %9269 = vmatpush3.bf16.msra.mxu0 %v10254_v61  ;;  %9289 = vmatpush3.bf16.msra.mxu1 %v10255_v6  ;;  %v10290_v50 = vld [vmem:[#allocation9 + $0xab0] sm:$0xff]   ;;  %v10291_v38 = vld [vmem:[#allocation9 + $0xb28] sm:$0xff]  }
 0x45f   :  { %v8970_v58 = vpop.f32.mrb[59].mxu0  ;;  %9270 = vmatprep.subr.bf16.mxu0 %v10256_v22  ;;  %9290 = vmatprep.subr.bf16.mxu1 %v10257_v41  ;;  %v10292_v47 = vld [vmem:[#allocation9 + $0xaf8] sm:$0xff]  }
 0x460   :  { %v8988_v23 = vpop.f32.mrb[44].mxu1  ;;  %v4467_v45 = vadd.f32 %v8968_v34, %v8419_v8 }
 0x461   :  { %v8989_v4 = vpop.f32.mrb[45].mxu1 }
 0x462   :  { %v8990_v9 = vadd.f32 %v8989_v4, %v8988_v23  ;;  %v8991_v15 = vpop.f32.mrb[46].mxu1  ;;  %9271 = vmatpush3.bf16.msra.mxu0 %v10258_v48  ;;  %9291 = vmatpush3.bf16.msra.mxu1 %v10259_v59  ;;  %v10293_v48 = vld [vmem:[#allocation9 + $0xb70] sm:$0xff]   ;;  %v10294_v23 = vld [vmem:[#allocation9 + $0xab8] sm:$0xff]  }
 0x463   :  { %v8992_v37 = vpop.f32.mrb[47].mxu1  ;;  %9272 = vmatprep.subr.bf16.mxu0 %v10260_v3  ;;  %9292 = vmatprep.subr.bf16.mxu1 %v10261_v51  ;;  %v10295_v4 = vld [vmem:[#allocation9 + $0xb30] sm:$0xff]   ;;  %v10297_v15 = vld [vmem:[#allocation9 + $0xbc0] sm:$0xff]  }
 0x464   :  { %v11118_v53 = vadd.f32 %v8990_v9, %v4467_v45  ;;  %v10296_v9 = vld [vmem:[#allocation9 + $0xb78] sm:$0xff]   ;;  %v10299_v37 = vld [vmem:[#allocation9 + $0xb80] sm:$0xff]  }
 0x466   :  { %9273 = vmatpush3.bf16.msra.mxu0 %v10262_v14  ;;  %9293 = vmatpush3.bf16.msra.mxu1 %v10263_v49  ;;  %v10298_v49 = vld [vmem:[#allocation9 + $0xb38] sm:$0xff]  }
 0x467   :  { %9294 = vmatprep.subr.bf16.mxu1 %v10264_v42  ;;  %9302 = vmatprep.subr.bf16.mxu0 %v10265_v36  ;;  %v10300_v42 = vld [vmem:[#allocation9 + $0xbc8] sm:$0xff]   ;;  %v10301_v36 = vld [vmem:[#allocation9 + $0xc40] sm:$0xff]  }
 0x469   :  { %7634 = vmatmul.mubr.bf16.vlgmr.msra.gmra.mrb[84].mxu0 %v10925_v26  ;;  %v10276_v26 = vld [vmem:[#allocation9 + $0xad8] sm:$0xff]  }
 0x46a   :  { %9295 = vmatpush3.bf16.msra.mxu1 %v10266_v19  ;;  %9303 = vmatpush3.bf16.msra.mxu0 %v10267_v40  ;;  %v10302_v19 = vld [vmem:[#allocation9 + $0xb88] sm:$0xff]   ;;  %v10303_v40 = vld [vmem:[#allocation9 + $0xc00] sm:$0xff]  }
 0x46b   :  { %7713 = vmatprep.mubr.bf16.mxu0 %v10958_v30  ;;  %9304 = vmatprep.subr.bf16.mxu0 %v10268_v43  ;;  %v10279_v30 = vld [vmem:[#allocation9 + $0xb10] sm:$0xff]  }
 0x46c   :  { %9324 = vmatprep.subr.bf16.mxu1 %v10269_v44  ;;  %v10304_v43 = vld [vmem:[#allocation9 + $0xbd0] sm:$0xff]   ;;  %v10305_v44 = vld [vmem:[#allocation9 + $0xc48] sm:$0xff]  }
 0x46d   :  { %7674 = vmatmul.mubr.bf16.vlgmr.msra.gmra.mrb[72].mxu1 %v10940_v24  ;;  %v10282_v24 = vld [vmem:[#allocation9 + $0xaa0] sm:$0xff]  }
 0x46e   :  { %9305 = vmatpush3.bf16.msra.mxu0 %v10270_v33  ;;  %9325 = vmatpush3.bf16.msra.mxu1 %v10271_v13  ;;  %v11223_v33 = vld [vmem:[#allocation22_spill] sm:$0xff] }
 0x46f   :  { %7753 = vmatprep.mubr.bf16.mxu1 %v11221_v7  ;;  %9306 = vmatprep.subr.bf16.mxu0 %v10272_v1  ;;  %v10306_v13 = vld [vmem:[#allocation9 + $0xb90] sm:$0xff]   ;;  %v10307_v1 = vld [vmem:[#allocation9 + $0xc08] sm:$0xff]   ;;  %v10310_v7 = vld [vmem:[#allocation9 + $0xb98] sm:$0xff]  }
 0x470   :  { %9326 = vmatprep.subr.bf16.mxu1 %v10273_v56  ;;  %v11224_v56 = vld [vmem:[#allocation24_spill] sm:$0xff] }
 0x472   :  { %9307 = vmatpush3.bf16.msra.mxu0 %v10274_v20  ;;  %9327 = vmatpush3.bf16.msra.mxu1 %v10275_v16  ;;  %v10308_v20 = vld [vmem:[#allocation9 + $0xbd8] sm:$0xff]   ;;  %v10309_v16 = vld [vmem:[#allocation9 + $0xc50] sm:$0xff]  }
 0x473   :  { %9308 = vmatprep.subr.bf16.mxu0 %v10276_v26  ;;  %9328 = vmatprep.subr.bf16.mxu1 %v10277_v60  ;;  %v10312_v26 = vld [vmem:[#allocation9 + $0xbe0] sm:$0xff]   ;;  %v10313_v60 = vld [vmem:[#allocation9 + $0xc58] sm:$0xff]  }
 0x476   :  { %9309 = vmatpush3.bf16.msra.mxu0 %v10278_v25  ;;  %9329 = vmatpush3.bf16.msra.mxu1 %v10279_v30  ;;  %v10314_v25 = vld [vmem:[#allocation9 + $0xba0] sm:$0xff]   ;;  %v10315_v30 = vld [vmem:[#allocation9 + $0xc18] sm:$0xff]  }
 0x477   :  { %9310 = vmatprep.subr.bf16.mxu0 %v10280_v11  ;;  %9330 = vmatprep.subr.bf16.mxu1 %v10281_v62  ;;  %v10316_v11 = vld [vmem:[#allocation9 + $0xbe8] sm:$0xff]   ;;  %v10317_v62 = vld [vmem:[#allocation9 + $0xc60] sm:$0xff]  }
 0x47a   :  { %9311 = vmatpush3.bf16.msra.mxu0 %v10282_v24  ;;  %9331 = vmatpush3.bf16.msra.mxu1 %v10283_v17  ;;  %v10318_v24 = vld [vmem:[#allocation9 + $0xba8] sm:$0xff]   ;;  %v10319_v17 = vld [vmem:[#allocation9 + $0xc20] sm:$0xff]  }
 0x47b   :  { %9312 = vmatprep.subr.bf16.mxu0 %v10284_v21  ;;  %9332 = vmatprep.subr.bf16.mxu1 %v10285_v57  ;;  %v10320_v21 = vld [vmem:[#allocation9 + $0xbf0] sm:$0xff]   ;;  %v10321_v57 = vld [vmem:[#allocation9 + $0xc68] sm:$0xff]  }
 0x47c   :  { %v9010_v61 = vpop.f32.mrb[60].mxu0 }
 0x47d   :  { %v9011_v6 = vpop.f32.mrb[61].mxu0 }
 0x47e   :  { %v9012_v22 = vadd.f32 %v9011_v6, %v9010_v61  ;;  %v9013_v41 = vpop.f32.mrb[62].mxu0  ;;  %9313 = vmatpush3.bf16.msra.mxu0 %v10286_v63  ;;  %9333 = vmatpush3.bf16.msra.mxu1 %v10287_v0  ;;  %v10322_v61 = vld [vmem:[#allocation9 + $0xbb0] sm:$0xff]   ;;  %v10323_v6 = vld [vmem:[#allocation9 + $0xc28] sm:$0xff]  }
 0x47f   :  { %v9014_v34 = vpop.f32.mrb[63].mxu0  ;;  %9314 = vmatprep.subr.bf16.mxu0 %v10288_v12  ;;  %9334 = vmatprep.subr.bf16.mxu1 %v10289_v18  ;;  %v10324_v41 = vld [vmem:[#allocation9 + $0xbf8] sm:$0xff]  }
 0x480   :  { %v4547_v59 = vadd.f32 %v9012_v22, %v11118_v53  ;;  %v9032_v8 = vpop.f32.mrb[48].mxu1  ;;  %v11222_v53 = vld [vmem:[#allocation20_spill] sm:$0xff]  ;;  %v10325_v34 = vld [vmem:[#allocation9 + $0xc70] sm:$0xff]  }
 0x481   :  { %v9033_v58 = vpop.f32.mrb[49].mxu1 }
 0x482   :  { %v9034_v3 = vadd.f32 %v9033_v58, %v9032_v8  ;;  %v9035_v51 = vpop.f32.mrb[50].mxu1  ;;  %9315 = vmatpush3.bf16.msra.mxu0 %v10290_v50  ;;  %9335 = vmatpush3.bf16.msra.mxu1 %v10291_v38  ;;  %v10326_v58 = vld [vmem:[#allocation9 + $0xbb8] sm:$0xff]  }
 0x483   :  { %v9036_v45 = vpop.f32.mrb[51].mxu1  ;;  %9316 = vmatprep.subr.bf16.mxu0 %v10292_v47  ;;  %9336 = vmatprep.subr.bf16.mxu1 %v10293_v48 }
 0x484   :  { %v11125_v14 = vadd.f32 %v9034_v3, %v4547_v59  ;;  %v10327_v3 = vld [vmem:[#allocation9 + $0xc30] sm:$0xff]   ;;  %v10330_v45 = vld [vmem:[#allocation9 + $0xc38] sm:$0xff]  }
 0x486   :  { %9317 = vmatpush3.bf16.msra.mxu0 %v10294_v23  ;;  %9337 = vmatpush3.bf16.msra.mxu1 %v10295_v4  ;;  %v10328_v23 = vld [vmem:[#allocation9 + $0xc78] sm:$0xff]   ;;  %v10329_v4 = vld [vmem:[#allocation9 + $0xcc0] sm:$0xff]  }
 0x487   :  { %9338 = vmatprep.subr.bf16.mxu1 %v10296_v9  ;;  %9346 = vmatprep.subr.bf16.mxu0 %v10297_v15  ;;  %v10331_v9 = vld [vmem:[#allocation9 + $0xc80] sm:$0xff]   ;;  %v10332_v15 = vld [vmem:[#allocation9 + $0xcc8] sm:$0xff]  }
 0x489   :  { %7714 = vmatmul.mubr.bf16.vlgmr.msra.gmra.mrb[88].mxu0 %v11222_v53  ;;  %v10337_v53 = vld [vmem:[#allocation9 + $0xd48] sm:$0xff]  }
 0x48a   :  { %9339 = vmatpush3.bf16.msra.mxu1 %v10298_v49  ;;  %9347 = vmatpush3.bf16.msra.mxu0 %v10299_v37  ;;  %v11225_v49 = vld [vmem:[#allocation23_spill] sm:$0xff]  ;;  %v10334_v37 = vld [vmem:[#allocation9 + $0xc88] sm:$0xff]  }
 0x48b   :  { %7793 = vmatprep.mubr.bf16.mxu0 %v10999_v35  ;;  %9348 = vmatprep.subr.bf16.mxu0 %v10300_v42  ;;  %v10311_v35 = vld [vmem:[#allocation9 + $0xc10] sm:$0xff]   ;;  %v10335_v42 = vld [vmem:[#allocation9 + $0xd00] sm:$0xff]  }
 0x48c   :  { %9368 = vmatprep.subr.bf16.mxu1 %v10301_v36  ;;  %v10336_v36 = vld [vmem:[#allocation9 + $0xcd0] sm:$0xff]  }
 0x48d   :  { %7754 = vmatmul.mubr.bf16.vlgmr.msra.gmra.mrb[76].mxu1 %v11223_v33  ;;  %v10342_v33 = vld [vmem:[#allocation9 + $0xc98] sm:$0xff]  }
 0x48e   :  { %9349 = vmatpush3.bf16.msra.mxu0 %v10302_v19  ;;  %9369 = vmatpush3.bf16.msra.mxu1 %v10303_v40  ;;  %v10338_v19 = vld [vmem:[#allocation9 + $0xc90] sm:$0xff]   ;;  %v10339_v40 = vld [vmem:[#allocation9 + $0xd08] sm:$0xff]  }
 0x48f   :  { %7833 = vmatprep.mubr.bf16.mxu1 %v11224_v56  ;;  %9350 = vmatprep.subr.bf16.mxu0 %v10304_v43  ;;  %v10340_v43 = vld [vmem:[#allocation9 + $0xcd8] sm:$0xff]  }
 0x490   :  { %9370 = vmatprep.subr.bf16.mxu1 %v10305_v44  ;;  %v10341_v44 = vld [vmem:[#allocation9 + $0xd50] sm:$0xff]   ;;  %v10347_v56 = vld [vmem:[#allocation9 + $0xd18] sm:$0xff]  }
 0x492   :  { %9351 = vmatpush3.bf16.msra.mxu0 %v10306_v13  ;;  %9371 = vmatpush3.bf16.msra.mxu1 %v10307_v1  ;;  %v10344_v13 = vld [vmem:[#allocation9 + $0xce0] sm:$0xff]   ;;  %v10345_v1 = vld [vmem:[#allocation9 + $0xd58] sm:$0xff]  }
 0x493   :  { %9352 = vmatprep.subr.bf16.mxu0 %v10308_v20  ;;  %9372 = vmatprep.subr.bf16.mxu1 %v10309_v16  ;;  %v10348_v20 = vld [vmem:[#allocation9 + $0xce8] sm:$0xff]  }
 0x494   :  { %v10350_v16 = vld [vmem:[#allocation9 + $0xca8] sm:$0xff]  }
 0x496   :  { %9353 = vmatpush3.bf16.msra.mxu0 %v10310_v7  ;;  %9373 = vmatpush3.bf16.msra.mxu1 %v10311_v35  ;;  %v10351_v7 = vld [vmem:[#allocation9 + $0xd20] sm:$0xff]  }
 0x497   :  { %9354 = vmatprep.subr.bf16.mxu0 %v10312_v26  ;;  %9374 = vmatprep.subr.bf16.mxu1 %v10313_v60  ;;  %v8500_v35 = vld [vmem:[#allocation11 + $0x2] ss:$0 sm:$0xff]  ;;  %v10352_v26 = vld [vmem:[#allocation9 + $0xcf0] sm:$0xff]   ;;  %v10353_v60 = vld [vmem:[#allocation9 + $0xd68] sm:$0xff]  }
 0x49a   :  { %9355 = vmatpush3.bf16.msra.mxu0 %v10314_v25  ;;  %9375 = vmatpush3.bf16.msra.mxu1 %v10315_v30 }
 0x49b   :  { %9356 = vmatprep.subr.bf16.mxu0 %v10316_v11  ;;  %9376 = vmatprep.subr.bf16.mxu1 %v10317_v62 }
 0x49c   :  { %v9054_v63 = vpop.f32.mrb[64].mxu0 }
 0x49d   :  { %v9055_v0 = vpop.f32.mrb[65].mxu0 }
 0x49e   :  { %v9056_v12 = vadd.f32 %v9055_v0, %v9054_v63  ;;  %v9057_v18 = vpop.f32.mrb[66].mxu0  ;;  %9357 = vmatpush3.bf16.msra.mxu0 %v10318_v24  ;;  %9377 = vmatpush3.bf16.msra.mxu1 %v10319_v17  ;;  %v10354_v17 = vld [vmem:[#allocation9 + $0xcb0] sm:$0xff]   ;;  %v10356_v63 = vld [vmem:[#allocation9 + $0xcf8] sm:$0xff]  }
 0x49f   :  { %v9058_v22 = vpop.f32.mrb[67].mxu0  ;;  %9358 = vmatprep.subr.bf16.mxu0 %v10320_v21  ;;  %9378 = vmatprep.subr.bf16.mxu1 %v10321_v57  ;;  %v10355_v21 = vld [vmem:[#allocation9 + $0xd28] sm:$0xff]   ;;  %v10357_v0 = vld [vmem:[#allocation9 + $0xd70] sm:$0xff]  }
 0x4a0   :  { %v9076_v50 = vpop.f32.mrb[52].mxu1  ;;  %v11132_v38 = vadd.f32 %v9056_v12, %v11125_v14  ;;  %v10333_v14 = vld [vmem:[#allocation9 + $0xd40] sm:$0xff]  }
 0x4a1   :  { %v9077_v47 = vpop.f32.mrb[53].mxu1 }
 0x4a2   :  { %v11134_v48 = vadd.f32 %v9077_v47, %v9076_v50  ;;  %v9079_v59 = vpop.f32.mrb[54].mxu1  ;;  %9359 = vmatpush3.bf16.msra.mxu0 %v10322_v61  ;;  %9379 = vmatpush3.bf16.msra.mxu1 %v10323_v6  ;;  %v4632_v8 = vsel %vm3772_vm6, %v11132_v38, -inf  ;;  %v10359_v50 = vld [vmem:[#allocation9 + $0xd30] sm:$0xff]   ;;  %v10360_v47 = vld [vmem:[#allocation9 + $0xd78] sm:$0xff]  }
 0x4a3   :  { %v9080_v51 = vpop.f32.mrb[55].mxu1  ;;  %4633 = vmax.xlane.f32.xlu0 %v4632_v8  ;;  %9360 = vmatprep.subr.bf16.mxu0 %v10324_v41  ;;  %v10358_v41 = vld [vmem:[#allocation9 + $0xcb8] sm:$0xff]  }
 0x4a4   :  { %9380 = vmatprep.subr.bf16.mxu1 %v10325_v34  ;;  %v5327_v11 = vadd.f32 %v11134_v48, %v8500_v35  ;;  %v10361_v48 = vld [vmem:[#allocation9 + $0xdc0] sm:$0xff]   ;;  %v10362_v8 = vld [vmem:[#allocation9 + $0xd38] sm:$0xff]  }
 0x4a5   :  { %v10365_v51 = vld [vmem:[#allocation9 + $0xe40] sm:$0xff]   ;;  %v10388_v35 = vld [vmem:[#allocation9 + $0xdf8] sm:$0xff]  }
 0x4a6   :  { %9361 = vmatpush3.bf16.msra.mxu0 %v10326_v58  ;;  %9381 = vmatpush3.bf16.msra.mxu1 %v10327_v3  ;;  %v10363_v58 = vld [vmem:[#allocation9 + $0xd80] sm:$0xff]   ;;  %v10364_v3 = vld [vmem:[#allocation9 + $0xdc8] sm:$0xff]  }
 0x4a7   :  { %9382 = vmatprep.subr.bf16.mxu1 %v10328_v23  ;;  %9390 = vmatprep.subr.bf16.mxu0 %v10329_v4  ;;  %v10366_v23 = vld [vmem:[#allocation9 + $0xd88] sm:$0xff]   ;;  %v10367_v4 = vld [vmem:[#allocation9 + $0xe00] sm:$0xff]  }
 0x4a9   :  { %7794 = vmatmul.mubr.bf16.vlgmr.msra.gmra.mrb[92].mxu0 %v11225_v49  ;;  %v10373_v49 = vld [vmem:[#allocation9 + $0xe50] sm:$0xff]  }
 0x4aa   :  { %9383 = vmatpush3.bf16.msra.mxu1 %v10330_v45  ;;  %9391 = vmatpush3.bf16.msra.mxu0 %v10331_v9  ;;  %v10368_v45 = vld [vmem:[#allocation9 + $0xdd0] sm:$0xff]   ;;  %v10369_v9 = vld [vmem:[#allocation9 + $0xe48] sm:$0xff]  }
 0x4ab   :  { %7873 = vmatprep.mubr.bf16.mxu0 %v11032_v46  ;;  %9392 = vmatprep.subr.bf16.mxu0 %v10332_v15  ;;  %v10343_v46 = vld [vmem:[#allocation9 + $0xd10] sm:$0xff]  }
 0x4ac   :  { %9412 = vmatprep.subr.bf16.mxu1 %v10333_v14  ;;  %v10370_v15 = vld [vmem:[#allocation9 + $0xd90] sm:$0xff]   ;;  %v10371_v14 = vld [vmem:[#allocation9 + $0xe08] sm:$0xff]  }
 0x4ad   :  { %7834 = vmatmul.mubr.bf16.vlgmr.msra.gmra.mrb[80].mxu1 %v11022_v32  ;;  %v10346_v32 = vld [vmem:[#allocation9 + $0xca0] sm:$0xff]  }
 0x4ae   :  { %9393 = vmatpush3.bf16.msra.mxu0 %v10334_v37  ;;  %9413 = vmatpush3.bf16.msra.mxu1 %v10335_v42  ;;  %v10374_v37 = vld [vmem:[#allocation9 + $0xd98] sm:$0xff]   ;;  %v10376_v42 = vld [vmem:[#allocation9 + $0xde0] sm:$0xff]  }
 0x4af   :  { %7913 = vmatprep.mubr.bf16.mxu1 %v11036_v31  ;;  %9394 = vmatprep.subr.bf16.mxu0 %v10336_v36  ;;  %v10349_v31 = vld [vmem:[#allocation9 + $0xd60] sm:$0xff]   ;;  %v10377_v36 = vld [vmem:[#allocation9 + $0xe58] sm:$0xff]  }
 0x4b0   :  { %9414 = vmatprep.subr.bf16.mxu1 %v10337_v53 }
 0x4b2   :  { %9395 = vmatpush3.bf16.msra.mxu0 %v10338_v19  ;;  %9415 = vmatpush3.bf16.msra.mxu1 %v10339_v40  ;;  %v10378_v19 = vld [vmem:[#allocation9 + $0xda0] sm:$0xff]   ;;  %v10379_v40 = vld [vmem:[#allocation9 + $0xe18] sm:$0xff]  }
 0x4b3   :  { %9396 = vmatprep.subr.bf16.mxu0 %v10340_v43  ;;  %9416 = vmatprep.subr.bf16.mxu1 %v10341_v44  ;;  %v10381_v43 = vld [vmem:[#allocation9 + $0xe60] sm:$0xff]  }
 0x4b6   :  { %9397 = vmatpush3.bf16.msra.mxu0 %v10342_v33  ;;  %9417 = vmatpush3.bf16.msra.mxu1 %v10343_v46  ;;  %v10382_v33 = vld [vmem:[#allocation9 + $0xda8] sm:$0xff]   ;;  %v10383_v46 = vld [vmem:[#allocation9 + $0xe20] sm:$0xff]  }
 0x4b7   :  { %9398 = vmatprep.subr.bf16.mxu0 %v10344_v13  ;;  %9418 = vmatprep.subr.bf16.mxu1 %v10345_v1  ;;  %v10384_v13 = vld [vmem:[#allocation9 + $0xdf0] sm:$0xff]   ;;  %v10385_v1 = vld [vmem:[#allocation9 + $0xe68] sm:$0xff]  }
 0x4ba   :  { %9399 = vmatpush3.bf16.msra.mxu0 %v10346_v32  ;;  %9419 = vmatpush3.bf16.msra.mxu1 %v10347_v56 }
 0x4bb   :  { %9400 = vmatprep.subr.bf16.mxu0 %v10348_v20  ;;  %9420 = vmatprep.subr.bf16.mxu1 %v10349_v31  ;;  %v10386_v31 = vld [vmem:[#allocation9 + $0xdb0] sm:$0xff]  }
 0x4bc   :  { %v9098_v25 = vpop.f32.mrb[68].mxu0 }
 0x4bd   :  { %v9099_v30 = vpop.f32.mrb[69].mxu0 }
 0x4be   :  { %v9100_v62 = vadd.f32 %v9099_v30, %v9098_v25  ;;  %v9101_v24 = vpop.f32.mrb[70].mxu0  ;;  %9401 = vmatpush3.bf16.msra.mxu0 %v10350_v16  ;;  %9421 = vmatpush3.bf16.msra.mxu1 %v10351_v7  ;;  %v10387_v16 = vld [vmem:[#allocation9 + $0xe28] sm:$0xff]  }
 0x4bf   :  { %v9102_v57 = vpop.f32.mrb[71].mxu0  ;;  %9402 = vmatprep.subr.bf16.mxu0 %v10352_v26  ;;  %9422 = vmatprep.subr.bf16.mxu1 %v10353_v60  ;;  %v10389_v26 = vld [vmem:[#allocation9 + $0xe70] sm:$0xff]   ;;  %v10390_v24 = vld [vmem:[#allocation9 + $0xdb8] sm:$0xff]  }
 0x4c0   :  { %v5367_v12 = vadd.f32 %v9100_v62, %v5327_v11  ;;  %v9120_v18 = vpop.f32.mrb[56].mxu1  ;;  %v10392_v57 = vld [vmem:[#allocation9 + $0xe78] sm:$0xff]  }
 0x4c1   :  { %v9121_v61 = vpop.f32.mrb[57].mxu1 }
 0x4c2   :  { %v9122_v6 = vadd.f32 %v9121_v61, %v9120_v18  ;;  %v9123_v22 = vpop.f32.mrb[58].mxu1  ;;  %9403 = vmatpush3.bf16.msra.mxu0 %v10354_v17  ;;  %9423 = vmatpush3.bf16.msra.mxu1 %v10355_v21  ;;  %v10391_v17 = vld [vmem:[#allocation9 + $0xe30] sm:$0xff]   ;;  %v10394_v18 = vld [vmem:[#allocation9 + $0xe38] sm:$0xff]   ;;  %v10395_v61 = vld [vmem:[#allocation9 + $0xe80] sm:$0xff]  }
 0x4c3   :  { %v9124_v34 = vpop.f32.mrb[59].mxu1  ;;  %9404 = vmatprep.subr.bf16.mxu0 %v10356_v63  ;;  %9424 = vmatprep.subr.bf16.mxu1 %v10357_v0  ;;  %v10393_v0 = vld [vmem:[#allocation9 + $0xec0] sm:$0xff]   ;;  %v10396_v22 = vld [vmem:[#allocation9 + $0xec8] sm:$0xff]  }
 0x4c4   :  { %v11143_v59 = vadd.f32 %v9122_v6, %v5367_v12  ;;  %v10398_v34 = vld [vmem:[#allocation9 + $0xed0] sm:$0xff]  }
 0x4c6   :  { %9405 = vmatpush3.bf16.msra.mxu0 %v10358_v41  ;;  %9425 = vmatpush3.bf16.msra.mxu1 %v10359_v50  ;;  %v10397_v50 = vld [vmem:[#allocation9 + $0xe88] sm:$0xff]  }
 0x4c7   :  { %9426 = vmatprep.subr.bf16.mxu1 %v10360_v47  ;;  %9434 = vmatprep.subr.bf16.mxu0 %v10361_v48  ;;  %v10399_v47 = vld [vmem:[#allocation9 + $0xe90] sm:$0xff]   ;;  %v10400_v48 = vld [vmem:[#allocation9 + $0xed8] sm:$0xff]  }
 0x4c9   :  { %7874 = vmatmul.mubr.bf16.vlgmr.msra.gmra.mrb[96].mxu0 %v11034_v55  ;;  %v10372_v55 = vld [vmem:[#allocation9 + $0xdd8] sm:$0xff]  }
 0x4ca   :  { %9427 = vmatpush3.bf16.msra.mxu1 %v10362_v8  ;;  %9435 = vmatpush3.bf16.msra.mxu0 %v10363_v58  ;;  %v5508_v8 = vld [vmem:[#allocation11 + $0x4] sm:$0x1] }
 0x4cb   :  { %7953 = vmatprep.mubr.bf16.mxu0 %v11070_v10  ;;  %9436 = vmatprep.subr.bf16.mxu0 %v10364_v3  ;;  %v10375_v10 = vld [vmem:[#allocation9 + $0xe10] sm:$0xff]   ;;  %v10402_v58 = vld [vmem:[#allocation9 + $0xee0] sm:$0xff]  }
 0x4cc   :  { %9456 = vmatprep.subr.bf16.mxu1 %v10365_v51  ;;  %v5512_v51 = vsel %vm5510_vm7, %v5508_v8, 0.0 }
 0x4cd   :  { %7914 = vmatmul.mubr.bf16.vlgmr.msra.gmra.mrb[84].mxu1 %v11060_v5 }
 0x4ce   :  { %9437 = vmatpush3.bf16.msra.mxu0 %v10366_v23  ;;  %9457 = vmatpush3.bf16.msra.mxu1 %v10367_v4  ;;  %v5509_v23 = vld [vmem:[#allocation11 + $0x5] sm:$0x1] }
 0x4cf   :  { %7993 = vmatprep.mubr.bf16.mxu1 %v11074_v28  ;;  %9438 = vmatprep.subr.bf16.mxu0 %v10368_v45  ;;  %v10380_v28 = vld [vmem:[#allocation9 + $0xde8] sm:$0xff]   ;;  %v5514_v45 = vsel %vm5510_vm7, %v5509_v23, 0.0 }
 0x4d0   :  { %9458 = vmatprep.subr.bf16.mxu1 %v10369_v9 }
 0x4d2   :  { %9439 = vmatpush3.bf16.msra.mxu0 %v10370_v15  ;;  %9459 = vmatpush3.bf16.msra.mxu1 %v10371_v14  ;;  %v10405_v15 = vld [vmem:[#allocation9 + $0xea8] sm:$0xff]   ;;  %v10406_v14 = vld [vmem:[#allocation9 + $0xef0] sm:$0xff]  }
 0x4d3   :  { %9440 = vmatprep.subr.bf16.mxu0 %v10372_v55  ;;  %9460 = vmatprep.subr.bf16.mxu1 %v10373_v49 }
 0x4d4   :  { %v3775_v53 = vpop.xlane.xlu0 %3774 }
 0x4d5   :  { %v3776_v5 = vsub.f32 %v11110_v39, %v3775_v53 }
 0x4d6   :  { %9441 = vmatpush3.bf16.msra.mxu0 %v10374_v37  ;;  %9461 = vmatpush3.bf16.msra.mxu1 %v10375_v10 }
 0x4d7   :  { %9442 = vmatprep.subr.bf16.mxu0 %v10376_v42  ;;  %9462 = vmatprep.subr.bf16.mxu1 %v10377_v36  ;;  %v3777_v44 = vmul.f32 1.442695, %v3776_v5  ;;  %v10407_v36 = vld [vmem:[#allocation9 + $0xeb0] sm:$0xff]   ;;  %v10408_v5 = vld [vmem:[#allocation9 + $0xef8] sm:$0xff]  }
 0x4d9   :  { %10410 = vpow2.f32 %v3777_v44 }
 0x4da   :  { %9443 = vmatpush3.bf16.msra.mxu0 %v10378_v19  ;;  %9463 = vmatpush3.bf16.msra.mxu1 %v10379_v40 }
 0x4db   :  { %9444 = vmatprep.subr.bf16.mxu0 %v10380_v28  ;;  %9464 = vmatprep.subr.bf16.mxu1 %v10381_v43 }
 0x4dc   :  { %v9142_v32 = vpop.f32.mrb[72].mxu0 }
 0x4dd   :  { %v9143_v39 = vpop.f32.mrb[73].mxu0 }
 0x4de   :  { %v9144_v56 = vadd.f32 %v9143_v39, %v9142_v32  ;;  %v9145_v20 = vpop.f32.mrb[74].mxu0  ;;  %9445 = vmatpush3.bf16.msra.mxu0 %v10382_v33  ;;  %9465 = vmatpush3.bf16.msra.mxu1 %v10383_v46  ;;  %v10409_v33 = vld [vmem:[#allocation9 + $0xeb8] sm:$0xff]  }
 0x4df   :  { %v9146_v7 = vpop.f32.mrb[75].mxu0  ;;  %9446 = vmatprep.subr.bf16.mxu0 %v10384_v13  ;;  %9466 = vmatprep.subr.bf16.mxu1 %v10385_v1 }
 0x4e0   :  { %v5447_v60 = vadd.f32 %v9144_v56, %v11143_v59  ;;  %v9164_v25 = vpop.f32.mrb[60].mxu1  ;;  %v5507_v59 = vld [vmem:[#allocation11 + $0x3] sm:$0x1] }
 0x4e1   :  { %v9165_v30 = vpop.f32.mrb[61].mxu1  ;;  %v5511_v3 = vsel %vm5510_vm7, %v5507_v59, 0.0 }
 0x4e2   :  { %v9166_v11 = vadd.f32 %v9165_v30, %v9164_v25  ;;  %v9167_v62 = vpop.f32.mrb[62].mxu1  ;;  %9447 = vmatpush3.bf16.msra.mxu0 %v10386_v31  ;;  %9467 = vmatpush3.bf16.msra.mxu1 %v10387_v16  ;;  %v5513_v4 = vadd.f32 %v5512_v51, %v5511_v3 }
 0x4e3   :  { %v9168_v21 = vpop.f32.mrb[63].mxu1  ;;  %9448 = vmatprep.subr.bf16.mxu0 %v10388_v35  ;;  %9468 = vmatprep.subr.bf16.mxu1 %v10389_v26  ;;  %v11155_v6 = vpop.eup %10410 }
 0x4e4   :  { %v11151_v63 = vadd.f32 %v9166_v11, %v5447_v60  ;;  %v3779_v41 = vsel %vm3772_vm6, %v11155_v6, 0.0  ;;  %v5515_v9 = vadd.f32 %v5514_v45, %v5513_v4 }
 0x4e6   :  { %9449 = vmatpush3.bf16.msra.mxu0 %v10390_v24  ;;  %9469 = vmatpush3.bf16.msra.mxu1 %v10391_v17  ;;  %v5492_v12 = vsel %vm3772_vm6, %v11151_v63, -inf  ;;  %v6000_v37 = vrot.slane %v5515_v9, %v10790_v2 }
 0x4e7   :  { %5493 = vmax.xlane.f32.xlu1 %v5492_v12  ;;  %9470 = vmatprep.subr.bf16.mxu1 %v10392_v57 }
 0x4e8   :  { %9478 = vmatprep.subr.bf16.mxu0 %v10393_v0 }
 0x4e9   :  { %7954 = vmatmul.mubr.bf16.vlgmr.msra.gmra.mrb[100].mxu0 %v11072_v52  ;;  %v10401_v52 = vld [vmem:[#allocation9 + $0xe98] sm:$0xff]  }
 0x4ea   :  { %9471 = vmatpush3.bf16.msra.mxu1 %v10394_v18  ;;  %9479 = vmatpush3.bf16.msra.mxu0 %v10395_v61 }
 0x4eb   :  { %8033 = vmatprep.mubr.bf16.mxu0 %v11094_v54  ;;  %3780 = vadd.xlane.f32.xlu1 %v3779_v41  ;;  %v10403_v54 = vld [vmem:[#allocation9 + $0xea0] sm:$0xff]  }
 0x4ec   :  { %9480 = vmatprep.subr.bf16.mxu0 %v10396_v22 }
 0x4ed   :  { %7994 = vmatmul.mubr.bf16.vlgmr.msra.gmra.mrb[88].mxu1 %v11089_v27  ;;  %v10404_v27 = vld [vmem:[#allocation9 + $0xee8] sm:$0xff]  }
 0x4ee   :  { %9481 = vmatpush3.bf16.msra.mxu0 %v10397_v50 }
 0x4ef   :  { %9482 = vmatprep.subr.bf16.mxu0 %v10398_v34 }
 0x4f2   :  { %9483 = vmatpush3.bf16.msra.mxu0 %v10399_v47 }
 0x4f3   :  { %9484 = vmatprep.subr.bf16.mxu0 %v10400_v48 }
 0x4f6   :  { %9485 = vmatpush3.bf16.msra.mxu0 %v10401_v52 }
 0x4f7   :  { %9486 = vmatprep.subr.bf16.mxu0 %v10402_v58 }
 0x4fa   :  { %9487 = vmatpush3.bf16.msra.mxu0 %v10403_v54 }
 0x4fb   :  { %9488 = vmatprep.subr.bf16.mxu0 %v10404_v27 }
 0x4fc   :  { %v9186_v55 = vpop.f32.mrb[76].mxu0 }
 0x4fd   :  { %v9187_v49 = vpop.f32.mrb[77].mxu0 }
 0x4fe   :  { %v9188_v10 = vadd.f32 %v9187_v49, %v9186_v55  ;;  %v9189_v42 = vpop.f32.mrb[78].mxu0  ;;  %9489 = vmatpush3.bf16.msra.mxu0 %v10405_v15 }
 0x4ff   :  { %v9190_v53 = vpop.f32.mrb[79].mxu0  ;;  %9490 = vmatprep.subr.bf16.mxu0 %v10406_v14 }
 0x500   :  { %v9208_v19 = vpop.f32.mrb[64].mxu1  ;;  %v7476_v28 = vadd.f32 %v9188_v10, %v6000_v37 }
 0x501   :  { %v9209_v40 = vpop.f32.mrb[65].mxu1 }
 0x502   :  { %v9210_v43 = vadd.f32 %v9209_v40, %v9208_v19  ;;  %v9211_v44 = vpop.f32.mrb[66].mxu1  ;;  %9491 = vmatpush3.bf16.msra.mxu0 %v10407_v36 }
 0x503   :  { %v9212_v46 = vpop.f32.mrb[67].mxu1  ;;  %9492 = vmatprep.subr.bf16.mxu0 %v10408_v5 }
 0x504   :  { %v7516_v13 = vadd.f32 %v9210_v43, %v7476_v28 }
 0x506   :  { %9493 = vmatpush3.bf16.msra.mxu0 %v10409_v33 }
 0x509   :  { %8034 = vmatmul.mubr.bf16.vlgmr.msra.gmra.mrb[104].mxu0 %v11096_v29 }
 0x51c   :  { %v9230_v2 = vpop.f32.mrb[80].mxu0 }
 0x51d   :  { %v9231_v1 = vpop.f32.mrb[81].mxu0 }
 0x51e   :  { %v9232_v32 = vadd.f32 %v9231_v1, %v9230_v2  ;;  %v9233_v39 = vpop.f32.mrb[82].mxu0 }
 0x51f   :  { %v9234_v56 = vpop.f32.mrb[83].mxu0 }
 0x520   :  { %v7556_v20 = vadd.f32 %v9232_v32, %v7516_v13  ;;  %v9252_v31 = vpop.f32.mrb[68].mxu1 }
 0x521   :  { %v9253_v16 = vpop.f32.mrb[69].mxu1 }
 0x522   :  { %v9254_v7 = vadd.f32 %v9253_v16, %v9252_v31  ;;  %v9255_v35 = vpop.f32.mrb[70].mxu1 }
 0x523   :  { %v9256_v26 = vpop.f32.mrb[71].mxu1 }
 0x524   :  { %v7596_v60 = vadd.f32 %v9254_v7, %v7556_v20 }
 0x530   :  { %v4634_v25 = vpop.xlane.xlu0 %4633 }
 0x531   :  { %v4635_v30 = vsub.f32 %v11132_v38, %v4634_v25 }
 0x533   :  { %v4636_v11 = vmul.f32 1.442695, %v4635_v30 }
 0x535   :  { %10412 = vpow2.f32 %v4636_v11 }
 0x53c   :  { %v9274_v62 = vpop.f32.mrb[84].mxu0 }
 0x53d   :  { %v9275_v24 = vpop.f32.mrb[85].mxu0 }
 0x53e   :  { %v9276_v29 = vadd.f32 %v9275_v24, %v9274_v62  ;;  %v9277_v17 = vpop.f32.mrb[86].mxu0 }
 0x53f   :  { %v11165_v21 = vpop.eup %10412  ;;  %v9278_v57 = vpop.f32.mrb[87].mxu0 }
 0x540   :  { %v7636_v0 = vadd.f32 %v9276_v29, %v7596_v60  ;;  %v9296_v12 = vpop.f32.mrb[72].mxu1  ;;  %v4638_v18 = vsel %vm3772_vm6, %v11165_v21, 0.0 }
 0x541   :  { %v9297_v61 = vpop.f32.mrb[73].mxu1  ;;  %4639 = vadd.xlane.f32.xlu0 %v4638_v18 }
 0x542   :  { %v9298_v22 = vadd.f32 %v9297_v61, %v9296_v12  ;;  %v9299_v41 = vpop.f32.mrb[74].mxu1 }
 0x543   :  { %v9300_v50 = vpop.f32.mrb[75].mxu1 }
 0x544   :  { %v7676_v38 = vadd.f32 %v9298_v22, %v7636_v0 }
 0x55c   :  { %v9318_v34 = vpop.f32.mrb[88].mxu0 }
 0x55d   :  { %v9319_v47 = vpop.f32.mrb[89].mxu0 }
 0x55e   :  { %v9320_v48 = vadd.f32 %v9319_v47, %v9318_v34  ;;  %v9321_v59 = vpop.f32.mrb[90].mxu0 }
 0x55f   :  { %v9322_v8 = vpop.f32.mrb[91].mxu0 }
 0x560   :  { %v7716_v52 = vadd.f32 %v9320_v48, %v7676_v38  ;;  %v9340_v58 = vpop.f32.mrb[76].mxu1 }
 0x561   :  { %v9341_v3 = vpop.f32.mrb[77].mxu1 }
 0x562   :  { %v9342_v51 = vadd.f32 %v9341_v3, %v9340_v58  ;;  %v9343_v23 = vpop.f32.mrb[78].mxu1 }
 0x563   :  { %v9344_v54 = vpop.f32.mrb[79].mxu1 }
 0x564   :  { %v7756_v4 = vadd.f32 %v9342_v51, %v7716_v52 }
 0x574   :  { %v5494_v45 = vpop.xlane.xlu1 %5493 }
 0x575   :  { %v5495_v27 = vsub.f32 %v11151_v63, %v5494_v45 }
 0x577   :  { %v5496_v9 = vmul.f32 1.442695, %v5495_v27 }
 0x579   :  { %10414 = vpow2.f32 %v5496_v9 }
 0x57c   :  { %v9362_v15 = vpop.f32.mrb[92].mxu0 }
 0x57d   :  { %v9363_v14 = vpop.f32.mrb[93].mxu0 }
 0x57e   :  { %v9364_v55 = vadd.f32 %v9363_v14, %v9362_v15  ;;  %v9365_v49 = vpop.f32.mrb[94].mxu0 }
 0x57f   :  { %v9366_v37 = vpop.f32.mrb[95].mxu0 }
 0x580   :  { %v7796_v10 = vadd.f32 %v9364_v55, %v7756_v4  ;;  %v9384_v42 = vpop.f32.mrb[80].mxu1 }
 0x581   :  { %v9385_v36 = vpop.f32.mrb[81].mxu1 }
 0x582   :  { %v9386_v53 = vadd.f32 %v9385_v36, %v9384_v42  ;;  %v9387_v5 = vpop.f32.mrb[82].mxu1 }
 0x583   :  { %v11170_v19 = vpop.eup %10414  ;;  %v9388_v40 = vpop.f32.mrb[83].mxu1 }
 0x584   :  { %v7836_v28 = vadd.f32 %v9386_v53, %v7796_v10  ;;  %v5498_v43 = vsel %vm3772_vm6, %v11170_v19, 0.0 }
 0x585   :  { %5499 = vadd.xlane.f32.xlu1 %v5498_v43 }
 0x59c   :  { %v9406_v63 = vpop.f32.mrb[96].mxu0 }
 0x59d   :  { %v9407_v44 = vpop.f32.mrb[97].mxu0 }
 0x59e   :  { %v9408_v33 = vadd.f32 %v9407_v44, %v9406_v63  ;;  %v9409_v46 = vpop.f32.mrb[98].mxu0 }
 0x59f   :  { %v9410_v13 = vpop.f32.mrb[99].mxu0 }
 0x5a0   :  { %v7876_v2 = vadd.f32 %v9408_v33, %v7836_v28  ;;  %v9428_v1 = vpop.f32.mrb[84].mxu1 }
 0x5a1   :  { %v9429_v32 = vpop.f32.mrb[85].mxu1 }
 0x5a2   :  { %v9430_v39 = vadd.f32 %v9429_v32, %v9428_v1  ;;  %v9431_v56 = vpop.f32.mrb[86].mxu1 }
 0x5a3   :  { %v9432_v20 = vpop.f32.mrb[87].mxu1 }
 0x5a4   :  { %v7916_v31 = vadd.f32 %v9430_v39, %v7876_v2 }
 0x5a5   :  { %10543 = shalt.err (!%p10540_p2)
}
 0x5a6   :  { %s10544_s9 = scalar_lea.hbm %s11208_s7, 320 }
 0x5a7   :  { %p10545_p3 = scmp.ne.s32.totalorder %s11208_s7, %s10544_s9  ;;  %p10548_p4 = scmp.lt.u32.totalorder %s10544_s9, %s11208_s7 }
 0x5a9   :  { %p10550_p5 = pnand %p10548_p4, %p10545_p3 }
 0x5ab   :  { %10553 = shalt.err (!%p10550_p5)
}
 0x5ac   :  { %8065 = dma.vmem_to_hbm [thread:$0]  %s8063_s27, 320, %s11208_s7, [#allocation14]   ;;  %v3781_v38 = vpop.xlane.xlu1 %3780 }
 0x5ad   :  { %s10603_s7 = smov [#allocation12]  }
 0x5ae   :  { %s8049_s4 = sshll.u32 %s10603_s7, 4  ;;  %s8050_s4 = int_to_ptr.vmem [resolvable:$true] %s8049_s4 }
 0x5af   :  { %s10554_s15 = scalar_lea.vmem %s8050_s4, 64  ;;  %p10559_p7 = scmp.lt.s32.totalorder %s8050_s4, %s8050_s4 }
 0x5b0   :  { %p10555_p6 = scmp.ne.s32.totalorder %s8050_s4, %s10554_s15  ;;  %p10560_p8 = scmp.lt.s32.totalorder %s10554_s15, %s10554_s15 }
 0x5b2   :  { %p10561_p9 = por %p10560_p8, %p10559_p7 }
 0x5b4   :  { %p10562_p10 = pnand %p10561_p9, %p10555_p6 }
 0x5bc   :  { %v9450_v16 = vpop.f32.mrb[100].mxu0 }
 0x5bd   :  { %v9451_v7 = vpop.f32.mrb[101].mxu0 }
 0x5be   :  { %v9452_v35 = vadd.f32 %v9451_v7, %v9450_v16  ;;  %v9453_v26 = vpop.f32.mrb[102].mxu0 }
 0x5bf   :  { %v9454_v60 = vpop.f32.mrb[103].mxu0 }
 0x5c0   :  { %v7956_v25 = vadd.f32 %v9452_v35, %v7916_v31  ;;  %v9472_v30 = vpop.f32.mrb[88].mxu1 }
 0x5c1   :  { %v9473_v11 = vpop.f32.mrb[89].mxu1 }
 0x5c2   :  { %v9474_v62 = vadd.f32 %v9473_v11, %v9472_v30  ;;  %v9475_v24 = vpop.f32.mrb[90].mxu1 }
 0x5c3   :  { %v9476_v29 = vpop.f32.mrb[91].mxu1 }
 0x5c4   :  { %v7996_v17 = vadd.f32 %v9474_v62, %v7956_v25 }
 0x5ce   :  { %v4640_v50 = vpop.xlane.xlu0 %4639 }
 0x5cf   :  { %10416 = vrcp.f32 %v4640_v50 }
 0x5d0   :  { %10418 = vrcp.f32 %v3781_v38 }
 0x5d9   :  { %v10417_v47 = vpop.eup %10416 }
 0x5da   :  { %v10419_v48 = vpop.eup %10418  ;;  %v4642_v59 = vmul.f32 %v10417_v47, %v11165_v21 }
 0x5db   :  { %v3783_v8 = vmul.f32 %v10419_v48, %v11155_v6 }
 0x5dc   :  { %v9494_v57 = vpop.f32.mrb[104].mxu0 }
 0x5dd   :  { %v9495_v0 = vpop.f32.mrb[105].mxu0  ;;  %v4643_v58 = vadd.f32 %v4642_v59, %v3783_v8 }
 0x5de   :  { %v9496_v12 = vadd.f32 %v9495_v0, %v9494_v57  ;;  %v9497_v18 = vpop.f32.mrb[106].mxu0 }
 0x5df   :  { %v9498_v61 = vpop.f32.mrb[107].mxu0 }
 0x5e0   :  { %v8036_v22 = vadd.f32 %v9496_v12, %v7996_v17 }
 0x5e2   :  { %v8041_v41 = vmul.f32 0.33333334, %v8036_v22 }
 0x5e4   :  { %8043 = vst [vmem:[#allocation12 + $0x2] sm:$0x3] %v8041_v41 }
 0x612   :  { %v5500_v34 = vpop.xlane.xlu1 %5499 }
 0x613   :  { %10420 = vrcp.f32 %v5500_v34 }
 0x61d   :  { %v10421_v52 = vpop.eup %10420 }
 0x61e   :  { %v5502_v3 = vmul.f32 %v10421_v52, %v11170_v19 }
 0x620   :  { %v5503_v51 = vadd.f32 %v5502_v3, %v4643_v58 }
 0x622   :  { %v5504_v23 = vmul.f32 0.33333334, %v5503_v51 }
 0x624   :  { %5505 = vst [vmem:[#allocation12] sm:$0x3] %v5504_v23 }
 0x625   :  { %10565 = shalt.err (!%p10562_p10)
}
 0x626   :  { %s10566_s5 = scalar_lea.hbm %s11207_s6, 64 }
 0x627   :  { %p10567_p11 = scmp.ne.s32.totalorder %s11207_s6, %s10566_s5  ;;  %p10570_p12 = scmp.lt.u32.totalorder %s10566_s5, %s11207_s6 }
 0x629   :  { %p10572_p13 = pnand %p10570_p12, %p10567_p11 }
 0x62b   :  { %10575 = shalt.err (!%p10572_p13)
}
 0x62c   :  { %s10604_s23 = smov 32   ;;  %s10605_s24 = smov 2  }
 0x62d   :  { %8055 = dma.vmem_to_hbm [thread:$0]  %s8050_s4, 64, %s11207_s6, [#allocation5], %s10604_s23, %s10604_s23, %s10605_s24  }
 0x62e   :  { %10582 = dma.done.wait [#allocation5], 64  }
 0x62f   :  { %10583 = vsyncadd [#allocation5], 4294967232 }
 0x630   :  { %10584 = dma.done.wait [#allocation14], 320  }
 0x631   :  { %10585 = vsyncadd [#allocation14], 4294966976 }
 0x632   :  { %8072 = vsyncpa [#allocation4], 1 }
 0x633   :  { %8073 = vsyncpa [#allocation7], 1 }
 0x634   :  { %8074 = vsyncpa [#allocation10], 1 }
 0x635   :  { %8075 = vsyncpa [#allocation5], 1 }
 0x636   :  { %8076 = vsyncpa [#allocation14], 1 }

</bundles_post_ra>
